<compile_context>
chip_gen: v5e
topology: v5e:2x2
jax: 0.10.0
libtpu: 0.0.40
codegen_flags: <defaults>
</compile_context>

<pallas_src>
import math
from functools import partial

import jax
import jax.numpy as jnp
from jax.experimental import pallas as pl
from jax.experimental.pallas import tpu as pltpu


def _round_up(x, m):
    return (x + m - 1) // m * m


def _device_kind():
    try:
        return jax.devices()[0].device_kind.lower()
    except Exception:
        return ""


def _default_res_dtype():
    # bf16-native VPU only on v6e / v7x; keep the residual stream in f32 on
    # v5e and older parts (bf16 elementwise there lowers to convert->f32).
    kind = _device_kind()
    if ("v6" in kind) or ("v7" in kind) or ("tpu7" in kind):
        return jnp.bfloat16
    return jnp.float32


def _min_grid_steps():
    # v7x has 2 TensorCores per chip; a 1-step grid would idle one of them.
    kind = _device_kind()
    return 2 if (("v7" in kind) or ("tpu7" in kind)) else 1


def _vmem_capacity_bytes():
    try:
        cap = getattr(pltpu.get_tpu_info(), "vmem_capacity_bytes", None)
        if cap:
            return int(cap)
    except Exception:
        pass
    return 64 * 1024 * 1024  # conservative fallback (v7x per-TC size)


def _angle_resnet_kernel(eps, res_dtype,
                         s_ref, si_ref,
                         w_init_ref, w_in_ref, b_comb_ref,
                         w1_ref, b1_ref, w2_ref, b2_ref,
                         w_out_ref, b_out_ref, pair_ref,
                         out_ref):
    dot_dtype = w_in_ref.dtype          # bf16 operands, f32 accumulation
    out_pad = pair_ref.shape[0]         # lane-padded output width (128)

    # s_initial = linear_initial(relu(s_initial)); s = linear_in(relu(s))
    # (both input biases folded into b_comb in the wrapper).
    si = jnp.maximum(si_ref[...], 0.0)
    s = jnp.maximum(s_ref[...], 0.0)
    si_p = jnp.dot(si, w_init_ref[...], preferred_element_type=jnp.float32)
    s_p = jnp.dot(s, w_in_ref[...], preferred_element_type=jnp.float32)
    x = (s_p + si_p).astype(res_dtype) + b_comb_ref[...]

    # Resnet blocks: x = x + linear_2(relu(linear_1(relu(x))))
    # NOTE: the two front-end projections could be fused into one K=256 dot on
    # 256x256-MXU parts (v6e/v7x); left as two 128x128 dots so the v5e path
    # stays native -- low priority vs. the bf16/lane-density changes.
    num_blocks = w1_ref.shape[0]
    for i in range(num_blocks):          # static unroll over the small stack
        a = jnp.maximum(x, 0.0).astype(dot_dtype)
        h = jnp.dot(a, w1_ref[i],
                    preferred_element_type=jnp.float32).astype(res_dtype) + b1_ref[i]
        h = jnp.maximum(h, 0.0).astype(dot_dtype)
        h = jnp.dot(h, w2_ref[i],
                    preferred_element_type=jnp.float32).astype(res_dtype) + b2_ref[i]
        x = x + h

    # linear_out(relu(x)) -> [tm, out_pad]  (columns >= 2*num_angles are zero)
    a = jnp.maximum(x, 0.0).astype(dot_dtype)
    out = jnp.dot(a, w_out_ref[...], preferred_element_type=jnp.float32)
    out = out + b_out_ref[...]

    # unnormalized half of the fused, lane-dense output slab
    out_ref[:, :out_pad] = out.astype(out_ref.dtype)

    # Per-angle (adjacent lane pairs) L2 normalization:
    # sumsq = (out*out) @ pair, pair = constant 2x2-block-diagonal matrix
    # (bf16 operands into the MXU; 0/1 entries are exact).
    sq = (out * out).astype(dot_dtype)
    sumsq = jnp.dot(sq, pair_ref[...], preferred_element_type=jnp.float32)
    inv = jax.lax.rsqrt(jnp.maximum(sumsq, eps))   # EUP rsqrt, off the VALU path
    out_ref[:, out_pad:] = (out * inv).astype(out_ref.dtype)


def angle_resnet_forward(s, s_initial, params, *, num_angles, eps=1e-8,
                         tm=1024, dot_dtype=jnp.bfloat16, res_dtype=None):
    """Pallas forward of AngleResnet (default, no-mask normalization path).

    Returns (unnormalized_s, s), each shaped [*, num_angles, 2] in f32.
    """
    # TODO(synk): optional is_first/second_molecule_type_residue_mask
    # boolean advanced-indexing normalization path is not implemented
    # (the default no-mask path of the PyTorch module is implemented).
    if res_dtype is None:
        res_dtype = _default_res_dtype()

    *batch, c_in = s.shape
    n = math.prod(batch) if batch else 1

    c_hidden = params["w_in"].shape[1]
    out_dim = params["w_out"].shape[1]
    num_blocks = params["w1"].shape[0]
    assert out_dim == 2 * num_angles
    out_pad = _round_up(out_dim, 128)       # lane-dense output slab width

    # Cast once in the wrapper: bf16 operands feed the MXU directly and halve
    # the dominant HBM input traffic; biases live in the residual-stream dtype.
    s2 = s.reshape(n, c_in).astype(dot_dtype)
    si2 = s_initial.reshape(n, c_in).astype(dot_dtype)
    w_init = params["w_init"].astype(dot_dtype)
    w_in = params["w_in"].astype(dot_dtype)
    w1 = params["w1"].astype(dot_dtype)
    w2 = params["w2"].astype(dot_dtype)
    b_comb = (params["b_in"] + params["b_init"]).astype(res_dtype)   # folded bias
    b1 = params["b1"].astype(res_dtype)
    b2 = params["b2"].astype(res_dtype)
    # Zero-pad the output projection/bias to the 128-lane slab.
    w_out = jnp.pad(params["w_out"],
                    ((0, 0), (0, out_pad - out_dim))).astype(dot_dtype)
    b_out = jnp.pad(params["b_out"],
                    ((0, 0), (0, out_pad - out_dim))).astype(jnp.float32)

    # Constant pair-sum matrix (2x2 blocks of ones on the diagonal), built once
    # and zero-padded to the lane-dense width.
    pair = jnp.kron(jnp.eye(num_angles, dtype=jnp.float32),
                    jnp.ones((2, 2), jnp.float32))
    pair = jnp.pad(pair, ((0, out_pad - out_dim), (0, out_pad - out_dim)))
    pair = pair.astype(dot_dtype)

    # Row tiling: large tiles amortize the ~0.35us/step overhead.  Pad the
    # flattened batch to a tile multiple; on v7x cap the tile so the grid has
    # at least 2 "parallel" steps (one per TensorCore).
    row_align = 16  # bf16 sublane packing
    tm_eff = max(row_align, min(_round_up(tm, row_align), _round_up(n, row_align)))
    min_steps = _min_grid_steps()
    if min_steps > 1:
        tm_eff = min(tm_eff,
                     max(row_align, _round_up(pl.cdiv(n, min_steps), row_align)))
    n_pad = _round_up(n, tm_eff)
    if n_pad != n:
        s2 = jnp.pad(s2, ((0, n_pad - n), (0, 0)))
        si2 = jnp.pad(si2, ((0, n_pad - n), (0, 0)))
    grid = (n_pad // tm_eff,)

    # Constant operands never change across grid steps: single-buffer them.
    def const(shape):
        nd = len(shape)
        return pl.BlockSpec(shape, lambda i, _nd=nd: (0,) * _nd,
                            pipeline_mode=pl.Buffered(1))

    in_specs = [
        pl.BlockSpec((tm_eff, c_in), lambda i: (i, 0)),       # s
        pl.BlockSpec((tm_eff, c_in), lambda i: (i, 0)),       # s_initial
        const((c_in, c_hidden)),                              # w_init
        const((c_in, c_hidden)),                              # w_in
        const((1, c_hidden)),                                 # b_comb
        const((num_blocks, c_hidden, c_hidden)),              # w1 (stacked)
        const((num_blocks, 1, c_hidden)),                     # b1
        const((num_blocks, c_hidden, c_hidden)),              # w2
        const((num_blocks, 1, c_hidden)),                     # b2
        const((c_hidden, out_pad)),                           # w_out (padded)
        const((1, out_pad)),                                  # b_out (padded)
        const((out_pad, out_pad)),                            # pair (padded)
    ]
    # Fused lane-dense output: [:, :out_pad]=unnormalized, [:, out_pad:]=normalized.
    out_specs = pl.BlockSpec((tm_eff, 2 * out_pad), lambda i: (i, 0))

    # Explicit VMEM budget (double-buffered row tiles + single-buffered
    # constants + activation slack), clamped against the generation's actual
    # VMEM capacity with headroom for compiler-internal scratch.
    itm = jnp.dtype(dot_dtype).itemsize
    rtm = jnp.dtype(res_dtype).itemsize
    bytes_const = (itm * (w_init.size + w_in.size + w1.size + w2.size
                          + w_out.size + pair.size)
                   + rtm * (b_comb.size + b1.size + b2.size) + 4 * b_out.size)
    bytes_io = 2 * (2 * tm_eff * c_in * itm) + 2 * (tm_eff * 2 * out_pad * 4)
    bytes_act = 10 * tm_eff * max(c_in, c_hidden, out_pad) * 4
    need = bytes_const + bytes_io + bytes_act
    vmem_cap = _vmem_capacity_bytes()
    vmem_limit = int(max(32 * 1024 * 1024, min(int(0.75 * vmem_cap), 2 * need)))

    grid_spec = pltpu.PrefetchScalarGridSpec(
        num_scalar_prefetch=0, grid=grid,
        in_specs=in_specs, out_specs=out_specs)

    fused = pl.pallas_call(
        partial(_angle_resnet_kernel, float(eps), res_dtype),
        out_shape=jax.ShapeDtypeStruct((n_pad, 2 * out_pad), jnp.float32),
        grid_spec=grid_spec,
        compiler_params=pltpu.CompilerParams(
            dimension_semantics=("parallel",),   # lets v7x shard steps over 2 TCs
            vmem_limit_bytes=vmem_limit),
    )(s2, si2, w_init, w_in, b_comb, w1, b1, w2, b2, w_out, b_out, pair)

    out_shape = tuple(batch) + (num_angles, 2)
    unnorm = fused[:n, :out_dim].reshape(out_shape)
    norm = fused[:n, out_pad:out_pad + out_dim].reshape(out_shape)
    return unnorm, norm


def _reference_forward(s, s_initial, params, eps, *, dot_dtype=jnp.bfloat16,
                       res_dtype=jnp.float32):
    """Plain-JAX reference mirroring the kernel's numeric path (bf16 dot
    boundary, residual stream in res_dtype); semantics match the module."""
    dd = dot_dtype

    def proj(x, w):
        return jnp.dot(jnp.maximum(x, 0.0).astype(dd), w.astype(dd),
                       preferred_element_type=jnp.float32)

    b_comb = (params["b_in"] + params["b_init"]).astype(res_dtype)
    x = (proj(s, params["w_in"])
         + proj(s_initial, params["w_init"])).astype(res_dtype) + b_comb
    for i in range(params["w1"].shape[0]):
        h = proj(x, params["w1"][i]).astype(res_dtype) + params["b1"][i].astype(res_dtype)
        h = proj(h, params["w2"][i]).astype(res_dtype) + params["b2"][i].astype(res_dtype)
        x = x + h
    out = proj(x, params["w_out"]) + params["b_out"]
    out = out.reshape(out.shape[:-1] + (-1, 2))
    sq = (out * out).astype(dd).astype(jnp.float32)
    denom = jnp.sqrt(jnp.maximum(jnp.sum(sq, axis=-1, keepdims=True), eps))
    return out, out / denom


def make_params(key, c_in, c_hidden, num_blocks, num_angles):
    """Deterministic synthetic parameters (shapes match the module's __init__).

    Weights stored (in, out) so the kernel computes x @ W + b (== torch
    x @ W.T + b with W stored (out, in)).  The module's 'final' init would
    zero linear_2; small random values are used so the compute path is
    non-trivial.
    """
    ks = jax.random.split(key, 6 + 2 * num_blocks)
    out_dim = num_angles * 2

    def w(k, fan_in, shape):
        return jax.random.normal(k, shape, jnp.float32) / math.sqrt(fan_in)

    return {
        "w_init": w(ks[0], c_in, (c_in, c_hidden)),
        "b_init": jnp.zeros((1, c_hidden), jnp.float32),
        "w_in": w(ks[1], c_in, (c_in, c_hidden)),
        "b_in": jnp.zeros((1, c_hidden), jnp.float32),
        "w1": jnp.stack([w(ks[2 + i], c_hidden, (c_hidden, c_hidden))
                         for i in range(num_blocks)]),
        "b1": jnp.zeros((num_blocks, 1, c_hidden), jnp.float32),
        "w2": jnp.stack([w(ks[2 + num_blocks + i], c_hidden, (c_hidden, c_hidden))
                         for i in range(num_blocks)]),
        "b2": jnp.zeros((num_blocks, 1, c_hidden), jnp.float32),
        "w_out": w(ks[-1], c_hidden, (c_hidden, out_dim)),
        "b_out": jnp.zeros((1, out_dim), jnp.float32),
    }


if __name__ == "__main__":
    c_in = 128        # keep channel dims lane-aligned (multiple of 128)
    c_hidden = 128
    num_blocks = 2
    num_angles = 7
    eps = 1e-8
    batch = (2, 150)  # 300 residues -> exercises row padding + grid tiling

    key = jax.random.PRNGKey(0)
    k_s, k_si, k_p = jax.random.split(key, 3)
    s = jax.random.normal(k_s, batch + (c_in,), jnp.float32)
    s_initial = jax.random.normal(k_si, batch + (c_in,), jnp.float32)
    params = make_params(k_p, c_in, c_hidden, num_blocks, num_angles)

    res_dtype = _default_res_dtype()   # bf16 on v6e/v7x, f32 elsewhere
    unnorm, norm = angle_resnet_forward(
        s, s_initial, params, num_angles=num_angles, eps=eps,
        res_dtype=res_dtype)
    unnorm = jax.block_until_ready(unnorm)
    norm = jax.block_until_ready(norm)

    ref_unnorm, ref_norm = _reference_forward(
        s, s_initial, params, eps, res_dtype=res_dtype)
    assert unnorm.shape == batch + (num_angles, 2)
    assert norm.shape == batch + (num_angles, 2)
    assert jnp.allclose(unnorm, ref_unnorm, atol=5e-3, rtol=5e-3)
    assert jnp.allclose(norm, ref_norm, atol=5e-3, rtol=5e-3)

    print("KERNEL_OK")
</pallas_src>

<mosaic_0001>
module attributes {stable_mosaic.version = 11 : i64} {
  func.func @_angle_resnet_kernel(%arg0: i32, %arg1: memref<304x128xbf16, #tpu.memory_space<vmem>>, %arg2: memref<304x128xbf16, #tpu.memory_space<vmem>>, %arg3: memref<128x128xbf16, #tpu.memory_space<vmem>>, %arg4: memref<128x128xbf16, #tpu.memory_space<vmem>>, %arg5: memref<1x128xf32, #tpu.memory_space<vmem>>, %arg6: memref<2x128x128xbf16, #tpu.memory_space<vmem>>, %arg7: memref<2x1x128xf32, #tpu.memory_space<vmem>>, %arg8: memref<2x128x128xbf16, #tpu.memory_space<vmem>>, %arg9: memref<2x1x128xf32, #tpu.memory_space<vmem>>, %arg10: memref<128x128xbf16, #tpu.memory_space<vmem>>, %arg11: memref<1x128xf32, #tpu.memory_space<vmem>>, %arg12: memref<128x128xbf16, #tpu.memory_space<vmem>>, %arg13: memref<304x256xf32, #tpu.memory_space<vmem>>) attributes {dimension_semantics = [#tpu.dimension_semantics<parallel>], iteration_bounds = array<i64: 1>, scalar_prefetch = 0 : i64, scratch_operands = 0 : i64, tpu.core_type = #tpu.core_type<tc>, window_params = [{transform_indices = @transform_0, window_bounds = array<i64: 304, 128>}, {transform_indices = @transform_1, window_bounds = array<i64: 304, 128>}, {pipeline_mode = #tpu.pipeline_mode<synchronous>, transform_indices = @transform_2, window_bounds = array<i64: 128, 128>}, {pipeline_mode = #tpu.pipeline_mode<synchronous>, transform_indices = @transform_3, window_bounds = array<i64: 128, 128>}, {pipeline_mode = #tpu.pipeline_mode<synchronous>, transform_indices = @transform_4, window_bounds = array<i64: 1, 128>}, {pipeline_mode = #tpu.pipeline_mode<synchronous>, transform_indices = @transform_5, window_bounds = array<i64: 2, 128, 128>}, {pipeline_mode = #tpu.pipeline_mode<synchronous>, transform_indices = @transform_6, window_bounds = array<i64: 2, 1, 128>}, {pipeline_mode = #tpu.pipeline_mode<synchronous>, transform_indices = @transform_7, window_bounds = array<i64: 2, 128, 128>}, {pipeline_mode = #tpu.pipeline_mode<synchronous>, transform_indices = @transform_8, window_bounds = array<i64: 2, 1, 128>}, {pipeline_mode = #tpu.pipeline_mode<synchronous>, transform_indices = @transform_9, window_bounds = array<i64: 128, 128>}, {pipeline_mode = #tpu.pipeline_mode<synchronous>, transform_indices = @transform_10, window_bounds = array<i64: 1, 128>}, {pipeline_mode = #tpu.pipeline_mode<synchronous>, transform_indices = @transform_11, window_bounds = array<i64: 128, 128>}, {transform_indices = @transform_12, window_bounds = array<i64: 304, 256>}]} {
    %c0 = arith.constant 0 : index
    %c0_0 = arith.constant 0 : index
    %0 = vector.load %arg2[%c0, %c0_0] : memref<304x128xbf16, #tpu.memory_space<vmem>>, vector<304x128xbf16>
    %cst = arith.constant 0.000000e+00 : bf16
    %1 = vector.broadcast %cst : bf16 to vector<304x128xbf16>
    %2 = arith.maximumf %0, %1 : vector<304x128xbf16>
    %c0_1 = arith.constant 0 : index
    %c0_2 = arith.constant 0 : index
    %3 = vector.load %arg1[%c0_1, %c0_2] : memref<304x128xbf16, #tpu.memory_space<vmem>>, vector<304x128xbf16>
    %cst_3 = arith.constant 0.000000e+00 : bf16
    %4 = vector.broadcast %cst_3 : bf16 to vector<304x128xbf16>
    %5 = arith.maximumf %3, %4 : vector<304x128xbf16>
    %c0_4 = arith.constant 0 : index
    %c0_5 = arith.constant 0 : index
    %6 = vector.load %arg3[%c0_4, %c0_5] : memref<128x128xbf16, #tpu.memory_space<vmem>>, vector<128x128xbf16>
    %cst_6 = arith.constant dense<0.000000e+00> : vector<304x128xf32>
    %7 = tpu.matmul %2, %6, %cst_6 {dimension_numbers = #tpu.dot_dimension_numbers<[1], [0], [0], [1], [0, 0, 1, 1], [], []>} : vector<304x128xbf16>, vector<128x128xbf16>, vector<304x128xf32> -> vector<304x128xf32>
    %c0_7 = arith.constant 0 : index
    %c0_8 = arith.constant 0 : index
    %8 = vector.load %arg4[%c0_7, %c0_8] : memref<128x128xbf16, #tpu.memory_space<vmem>>, vector<128x128xbf16>
    %cst_9 = arith.constant dense<0.000000e+00> : vector<304x128xf32>
    %9 = tpu.matmul %5, %8, %cst_9 {dimension_numbers = #tpu.dot_dimension_numbers<[1], [0], [0], [1], [0, 0, 1, 1], [], []>} : vector<304x128xbf16>, vector<128x128xbf16>, vector<304x128xf32> -> vector<304x128xf32>
    %10 = arith.addf %9, %7 : vector<304x128xf32>
    %c0_10 = arith.constant 0 : index
    %c0_11 = arith.constant 0 : index
    %11 = vector.load %arg5[%c0_10, %c0_11] : memref<1x128xf32, #tpu.memory_space<vmem>>, vector<1x128xf32>
    %12 = vector.broadcast %11 : vector<1x128xf32> to vector<304x128xf32>
    %13 = arith.addf %10, %12 : vector<304x128xf32>
    %cst_12 = arith.constant 0.000000e+00 : f32
    %14 = vector.broadcast %cst_12 : f32 to vector<304x128xf32>
    %15 = arith.maximumf %13, %14 : vector<304x128xf32>
    %16 = arith.truncf %15 : vector<304x128xf32> to vector<304x128xbf16>
    %c0_13 = arith.constant 0 : index
    %c0_14 = arith.constant 0 : index
    %c0_15 = arith.constant 0 : index
    %17 = vector.load %arg6[%c0_13, %c0_14, %c0_15] : memref<2x128x128xbf16, #tpu.memory_space<vmem>>, vector<1x128x128xbf16>
    %18 = vector.shape_cast %17 : vector<1x128x128xbf16> to vector<128x128xbf16>
    %cst_16 = arith.constant dense<0.000000e+00> : vector<304x128xf32>
    %19 = tpu.matmul %16, %18, %cst_16 {dimension_numbers = #tpu.dot_dimension_numbers<[1], [0], [0], [1], [0, 0, 1, 1], [], []>} : vector<304x128xbf16>, vector<128x128xbf16>, vector<304x128xf32> -> vector<304x128xf32>
    %c0_17 = arith.constant 0 : index
    %c0_18 = arith.constant 0 : index
    %c0_19 = arith.constant 0 : index
    %20 = vector.load %arg7[%c0_17, %c0_18, %c0_19] : memref<2x1x128xf32, #tpu.memory_space<vmem>>, vector<1x1x128xf32>
    %21 = vector.shape_cast %20 : vector<1x1x128xf32> to vector<1x128xf32>
    %22 = vector.broadcast %21 : vector<1x128xf32> to vector<304x128xf32>
    %23 = arith.addf %19, %22 : vector<304x128xf32>
    %cst_20 = arith.constant 0.000000e+00 : f32
    %24 = vector.broadcast %cst_20 : f32 to vector<304x128xf32>
    %25 = arith.maximumf %23, %24 : vector<304x128xf32>
    %26 = arith.truncf %25 : vector<304x128xf32> to vector<304x128xbf16>
    %c0_21 = arith.constant 0 : index
    %c0_22 = arith.constant 0 : index
    %c0_23 = arith.constant 0 : index
    %27 = vector.load %arg8[%c0_21, %c0_22, %c0_23] : memref<2x128x128xbf16, #tpu.memory_space<vmem>>, vector<1x128x128xbf16>
    %28 = vector.shape_cast %27 : vector<1x128x128xbf16> to vector<128x128xbf16>
    %cst_24 = arith.constant dense<0.000000e+00> : vector<304x128xf32>
    %29 = tpu.matmul %26, %28, %cst_24 {dimension_numbers = #tpu.dot_dimension_numbers<[1], [0], [0], [1], [0, 0, 1, 1], [], []>} : vector<304x128xbf16>, vector<128x128xbf16>, vector<304x128xf32> -> vector<304x128xf32>
    %c0_25 = arith.constant 0 : index
    %c0_26 = arith.constant 0 : index
    %c0_27 = arith.constant 0 : index
    %30 = vector.load %arg9[%c0_25, %c0_26, %c0_27] : memref<2x1x128xf32, #tpu.memory_space<vmem>>, vector<1x1x128xf32>
    %31 = vector.shape_cast %30 : vector<1x1x128xf32> to vector<1x128xf32>
    %32 = vector.broadcast %31 : vector<1x128xf32> to vector<304x128xf32>
    %33 = arith.addf %29, %32 : vector<304x128xf32>
    %34 = arith.addf %13, %33 : vector<304x128xf32>
    %cst_28 = arith.constant 0.000000e+00 : f32
    %35 = vector.broadcast %cst_28 : f32 to vector<304x128xf32>
    %36 = arith.maximumf %34, %35 : vector<304x128xf32>
    %37 = arith.truncf %36 : vector<304x128xf32> to vector<304x128xbf16>
    %c1 = arith.constant 1 : index
    %c0_29 = arith.constant 0 : index
    %c0_30 = arith.constant 0 : index
    %38 = vector.load %arg6[%c1, %c0_29, %c0_30] : memref<2x128x128xbf16, #tpu.memory_space<vmem>>, vector<1x128x128xbf16>
    %39 = vector.shape_cast %38 : vector<1x128x128xbf16> to vector<128x128xbf16>
    %cst_31 = arith.constant dense<0.000000e+00> : vector<304x128xf32>
    %40 = tpu.matmul %37, %39, %cst_31 {dimension_numbers = #tpu.dot_dimension_numbers<[1], [0], [0], [1], [0, 0, 1, 1], [], []>} : vector<304x128xbf16>, vector<128x128xbf16>, vector<304x128xf32> -> vector<304x128xf32>
    %c1_32 = arith.constant 1 : index
    %c0_33 = arith.constant 0 : index
    %c0_34 = arith.constant 0 : index
    %41 = vector.load %arg7[%c1_32, %c0_33, %c0_34] : memref<2x1x128xf32, #tpu.memory_space<vmem>>, vector<1x1x128xf32>
    %42 = vector.shape_cast %41 : vector<1x1x128xf32> to vector<1x128xf32>
    %43 = vector.broadcast %42 : vector<1x128xf32> to vector<304x128xf32>
    %44 = arith.addf %40, %43 : vector<304x128xf32>
    %cst_35 = arith.constant 0.000000e+00 : f32
    %45 = vector.broadcast %cst_35 : f32 to vector<304x128xf32>
    %46 = arith.maximumf %44, %45 : vector<304x128xf32>
    %47 = arith.truncf %46 : vector<304x128xf32> to vector<304x128xbf16>
    %c1_36 = arith.constant 1 : index
    %c0_37 = arith.constant 0 : index
    %c0_38 = arith.constant 0 : index
    %48 = vector.load %arg8[%c1_36, %c0_37, %c0_38] : memref<2x128x128xbf16, #tpu.memory_space<vmem>>, vector<1x128x128xbf16>
    %49 = vector.shape_cast %48 : vector<1x128x128xbf16> to vector<128x128xbf16>
    %cst_39 = arith.constant dense<0.000000e+00> : vector<304x128xf32>
    %50 = tpu.matmul %47, %49, %cst_39 {dimension_numbers = #tpu.dot_dimension_numbers<[1], [0], [0], [1], [0, 0, 1, 1], [], []>} : vector<304x128xbf16>, vector<128x128xbf16>, vector<304x128xf32> -> vector<304x128xf32>
    %c1_40 = arith.constant 1 : index
    %c0_41 = arith.constant 0 : index
    %c0_42 = arith.constant 0 : index
    %51 = vector.load %arg9[%c1_40, %c0_41, %c0_42] : memref<2x1x128xf32, #tpu.memory_space<vmem>>, vector<1x1x128xf32>
    %52 = vector.shape_cast %51 : vector<1x1x128xf32> to vector<1x128xf32>
    %53 = vector.broadcast %52 : vector<1x128xf32> to vector<304x128xf32>
    %54 = arith.addf %50, %53 : vector<304x128xf32>
    %55 = arith.addf %34, %54 : vector<304x128xf32>
    %cst_43 = arith.constant 0.000000e+00 : f32
    %56 = vector.broadcast %cst_43 : f32 to vector<304x128xf32>
    %57 = arith.maximumf %55, %56 : vector<304x128xf32>
    %58 = arith.truncf %57 : vector<304x128xf32> to vector<304x128xbf16>
    %c0_44 = arith.constant 0 : index
    %c0_45 = arith.constant 0 : index
    %59 = vector.load %arg10[%c0_44, %c0_45] : memref<128x128xbf16, #tpu.memory_space<vmem>>, vector<128x128xbf16>
    %cst_46 = arith.constant dense<0.000000e+00> : vector<304x128xf32>
    %60 = tpu.matmul %58, %59, %cst_46 {dimension_numbers = #tpu.dot_dimension_numbers<[1], [0], [0], [1], [0, 0, 1, 1], [], []>} : vector<304x128xbf16>, vector<128x128xbf16>, vector<304x128xf32> -> vector<304x128xf32>
    %c0_47 = arith.constant 0 : index
    %c0_48 = arith.constant 0 : index
    %61 = vector.load %arg11[%c0_47, %c0_48] : memref<1x128xf32, #tpu.memory_space<vmem>>, vector<1x128xf32>
    %62 = vector.broadcast %61 : vector<1x128xf32> to vector<304x128xf32>
    %63 = arith.addf %60, %62 : vector<304x128xf32>
    %c0_49 = arith.constant 0 : index
    %c0_50 = arith.constant 0 : index
    %64 = vector.load %arg13[%c0_49, %c0_50] : memref<304x256xf32, #tpu.memory_space<vmem>>, vector<304x128xf32>
    tpu.vector_store %arg13[%c0_49, %c0_50], %63 {strides = array<i32>} : memref<304x256xf32, #tpu.memory_space<vmem>>, vector<304x128xf32>,
    %65 = arith.mulf %63, %63 : vector<304x128xf32>
    %66 = arith.truncf %65 : vector<304x128xf32> to vector<304x128xbf16>
    %c0_51 = arith.constant 0 : index
    %c0_52 = arith.constant 0 : index
    %67 = vector.load %arg12[%c0_51, %c0_52] : memref<128x128xbf16, #tpu.memory_space<vmem>>, vector<128x128xbf16>
    %cst_53 = arith.constant dense<0.000000e+00> : vector<304x128xf32>
    %68 = tpu.matmul %66, %67, %cst_53 {dimension_numbers = #tpu.dot_dimension_numbers<[1], [0], [0], [1], [0, 0, 1, 1], [], []>} : vector<304x128xbf16>, vector<128x128xbf16>, vector<304x128xf32> -> vector<304x128xf32>
    %cst_54 = arith.constant 9.99999993E-9 : f32
    %69 = vector.broadcast %cst_54 : f32 to vector<304x128xf32>
    %70 = arith.maximumf %68, %69 : vector<304x128xf32>
    %71 = math.rsqrt %70 : vector<304x128xf32>
    %72 = arith.mulf %63, %71 : vector<304x128xf32>
    %c0_55 = arith.constant 0 : index
    %c128 = arith.constant 128 : index
    %73 = vector.load %arg13[%c0_55, %c128] : memref<304x256xf32, #tpu.memory_space<vmem>>, vector<304x128xf32>
    tpu.vector_store %arg13[%c0_55, %c128], %72 {strides = array<i32>} : memref<304x256xf32, #tpu.memory_space<vmem>>, vector<304x128xf32>,
    return
  }
  func.func @transform_0(%arg0: i32) -> (i32, i32) {
    %c0_i32 = arith.constant 0 : i32
    %c0_i32_0 = arith.constant 0 : i32
    return %arg0, %c0_i32 : i32, i32
  }
  func.func @transform_1(%arg0: i32) -> (i32, i32) {
    %c0_i32 = arith.constant 0 : i32
    %c0_i32_0 = arith.constant 0 : i32
    return %arg0, %c0_i32 : i32, i32
  }
  func.func @transform_2(%arg0: i32) -> (i32, i32) {
    %c0_i32 = arith.constant 0 : i32
    %c0_i32_0 = arith.constant 0 : i32
    %c0_i32_1 = arith.constant 0 : i32
    return %c0_i32, %c0_i32_0 : i32, i32
  }
  func.func @transform_3(%arg0: i32) -> (i32, i32) {
    %c0_i32 = arith.constant 0 : i32
    %c0_i32_0 = arith.constant 0 : i32
    %c0_i32_1 = arith.constant 0 : i32
    return %c0_i32, %c0_i32_0 : i32, i32
  }
  func.func @transform_4(%arg0: i32) -> (i32, i32) {
    %c0_i32 = arith.constant 0 : i32
    %c0_i32_0 = arith.constant 0 : i32
    %c0_i32_1 = arith.constant 0 : i32
    return %c0_i32, %c0_i32_0 : i32, i32
  }
  func.func @transform_5(%arg0: i32) -> (i32, i32, i32) {
    %c0_i32 = arith.constant 0 : i32
    %c0_i32_0 = arith.constant 0 : i32
    %c0_i32_1 = arith.constant 0 : i32
    %c0_i32_2 = arith.constant 0 : i32
    return %c0_i32, %c0_i32_0, %c0_i32_1 : i32, i32, i32
  }
  func.func @transform_6(%arg0: i32) -> (i32, i32, i32) {
    %c0_i32 = arith.constant 0 : i32
    %c0_i32_0 = arith.constant 0 : i32
    %c0_i32_1 = arith.constant 0 : i32
    %c0_i32_2 = arith.constant 0 : i32
    return %c0_i32, %c0_i32_0, %c0_i32_1 : i32, i32, i32
  }
  func.func @transform_7(%arg0: i32) -> (i32, i32, i32) {
    %c0_i32 = arith.constant 0 : i32
    %c0_i32_0 = arith.constant 0 : i32
    %c0_i32_1 = arith.constant 0 : i32
    %c0_i32_2 = arith.constant 0 : i32
    return %c0_i32, %c0_i32_0, %c0_i32_1 : i32, i32, i32
  }
  func.func @transform_8(%arg0: i32) -> (i32, i32, i32) {
    %c0_i32 = arith.constant 0 : i32
    %c0_i32_0 = arith.constant 0 : i32
    %c0_i32_1 = arith.constant 0 : i32
    %c0_i32_2 = arith.constant 0 : i32
    return %c0_i32, %c0_i32_0, %c0_i32_1 : i32, i32, i32
  }
  func.func @transform_9(%arg0: i32) -> (i32, i32) {
    %c0_i32 = arith.constant 0 : i32
    %c0_i32_0 = arith.constant 0 : i32
    %c0_i32_1 = arith.constant 0 : i32
    return %c0_i32, %c0_i32_0 : i32, i32
  }
  func.func @transform_10(%arg0: i32) -> (i32, i32) {
    %c0_i32 = arith.constant 0 : i32
    %c0_i32_0 = arith.constant 0 : i32
    %c0_i32_1 = arith.constant 0 : i32
    return %c0_i32, %c0_i32_0 : i32, i32
  }
  func.func @transform_11(%arg0: i32) -> (i32, i32) {
    %c0_i32 = arith.constant 0 : i32
    %c0_i32_0 = arith.constant 0 : i32
    %c0_i32_1 = arith.constant 0 : i32
    return %c0_i32, %c0_i32_0 : i32, i32
  }
  func.func @transform_12(%arg0: i32) -> (i32, i32) {
    %c0_i32 = arith.constant 0 : i32
    %c0_i32_0 = arith.constant 0 : i32
    return %arg0, %c0_i32 : i32, i32
  }
}

</mosaic_0001>

<bundles_post_ra>
// kernel: tpu_custom_call.1
= control target key start
LH: loop header
LB: loop body
LE: loop exit
PB: predicated region body
PF: predicated region fallthrough
CT: control target
= control target key end

     0   :  { %17 = vsyncpa [#allocation3], 0  ;;  %s4608_s0 = inlined_call_operand.hbm [shape: bf16[304,128], index: 0, kind: input, shape index: {}]   ;;  %s4609_s1 = inlined_call_operand.hbm [shape: bf16[304,128], index: 1, kind: input, shape index: {}]   ;;  %s4610_s2 = inlined_call_operand.hbm [shape: bf16[128,128], index: 2, kind: input, shape index: {}]   ;;  %s4611_s3 = inlined_call_operand.hbm [shape: bf16[128,128], index: 3, kind: input, shape index: {}]   ;;  %s4612_s4 = inlined_call_operand.hbm [shape: f32[1,128], index: 4, kind: input, shape index: {}]   ;;  %s4613_s5 = inlined_call_operand.hbm [shape: bf16[2,128,128], index: 5, kind: input, shape index: {}]   ;;  %s4614_s6 = inlined_call_operand.vmem [shape: f32[2,1,128], index: 6, kind: input, shape index: {}]   ;;  %s4615_s7 = inlined_call_operand.hbm [shape: bf16[2,128,128], index: 7, kind: input, shape index: {}]   ;;  %s4616_s8 = inlined_call_operand.vmem [shape: f32[2,1,128], index: 8, kind: input, shape index: {}]   ;;  %s4617_s9 = inlined_call_operand.hbm [shape: bf16[128,128], index: 9, kind: input, shape index: {}]   ;;  %s4618_s10 = inlined_call_operand.vmem [shape: f32[1,128], index: 10, kind: input, shape index: {}]   ;;  %s4619_s11 = inlined_call_operand.hbm [shape: bf16[128,128], index: 11, kind: input, shape index: {}]   ;;  %s4620_s12 = inlined_call_operand.hbm [shape: f32[304,256], index: 12, kind: output, shape index: {}]  }
   0x1   :  { %18 = vsyncpa [#allocation6], 0 }
   0x2   :  { %19 = vsyncpa [#allocation9], 0 }
   0x3   :  { %20 = vsyncpa [#allocation12], 0 }
   0x4   :  { %21 = vsyncpa [#allocation15], 0 }
   0x5   :  { %22 = vsyncpa [#allocation4], 0  ;;  %s40_s23 = sshll.u32 %s4609_s1, 4  ;;  %s3688_s24 = smov [#allocation5]   ;;  %s41_s23 = int_to_ptr.hbm [resolvable:$true] %s40_s23 }
   0x6   :  { %s42_s25 = sshll.u32 %s3688_s24, 4  ;;  %s66_s28 = sshll.u32 %s4611_s3, 4  ;;  %s43_s25 = int_to_ptr.vmem [resolvable:$true] %s42_s25  ;;  %s67_s28 = int_to_ptr.hbm [resolvable:$true] %s66_s28 }
   0x7   :  { %s3689_s29 = smov 64   ;;  %s3690_s30 = smov 4  }
   0x8   :  { %48 = dma.hbm_to_vmem [thread:$0]  %s41_s23, 2432, %s43_s25, [#allocation6], %s3689_s29, %s3689_s29, %s3690_s30  }
   0x9   :  { %s3691_s13 = smov [#allocation8]   ;;  %s90_s1 = sshll.u32 %s4613_s5, 4  ;;  %s91_s1 = int_to_ptr.hbm [resolvable:$true] %s90_s1 }
   0xa   :  { %s68_s14 = sshll.u32 %s3691_s13, 4  ;;  %s120_s18 = sshll.u32 %s4617_s9, 4  ;;  %s69_s14 = int_to_ptr.vmem [resolvable:$true] %s68_s14  ;;  %s121_s18 = int_to_ptr.hbm [resolvable:$true] %s120_s18 }
   0xb   :  { %74 = dma.hbm_to_vmem [thread:$0]  %s67_s28, 1024, %s69_s14, [#allocation9], %s3689_s29, %s3689_s29, %s3690_s30  }
   0xc   :  { %s3692_s19 = smov [#allocation11]   ;;  %s3693_s21 = smov [#allocation14]  }
   0xd   :  { %s92_s20 = sshll.u32 %s3692_s19, 4  ;;  %s122_s5 = sshll.u32 %s3693_s21, 4  ;;  %s93_s20 = int_to_ptr.vmem [resolvable:$true] %s92_s20  ;;  %s123_s5 = int_to_ptr.vmem [resolvable:$true] %s122_s5 }
   0xe   :  { %98 = dma.hbm_to_vmem [thread:$0]  %s91_s1, 2048, %s93_s20, [#allocation12], %s3689_s29, %s3689_s29, %s3690_s30  }
   0xf   :  { %s27_s24 = sshll.u32 %s4608_s0, 4  ;;  %s53_s26 = sshll.u32 %s4610_s2, 4  ;;  %s28_s24 = int_to_ptr.hbm [resolvable:$true] %s27_s24  ;;  %s54_s26 = int_to_ptr.hbm [resolvable:$true] %s53_s26 }
  0x10   :  { %128 = dma.hbm_to_vmem [thread:$0]  %s121_s18, 1024, %s123_s5, [#allocation15], %s3689_s29, %s3689_s29, %s3690_s30  }
  0x11   :  { %s3694_s27 = smov [#allocation2]   ;;  %s3695_s13 = smov [#allocation7]  }
  0x12   :  { %s29_s28 = sshll.u32 %s3694_s27, 4  ;;  %s55_s0 = sshll.u32 %s3695_s13, 4  ;;  %s30_s28 = int_to_ptr.vmem [resolvable:$true] %s29_s28  ;;  %s56_s0 = int_to_ptr.vmem [resolvable:$true] %s55_s0 }
  0x13   :  { %35 = dma.hbm_to_vmem [thread:$0]  %s28_s24, 2432, %s30_s28, [#allocation3], %s3689_s29, %s3689_s29, %s3690_s30  }
  0x14   :  { %s80_s16 = sshll.u32 %s4612_s4, 4  ;;  %s105_s3 = sshll.u32 %s4615_s7, 4  ;;  %s81_s16 = int_to_ptr.hbm [resolvable:$true] %s80_s16  ;;  %s106_s3 = int_to_ptr.hbm [resolvable:$true] %s105_s3 }
  0x15   :  { %61 = dma.hbm_to_vmem [thread:$0]  %s54_s26, 1024, %s56_s0, [#allocation6], %s3689_s29, %s3689_s29, %s3690_s30  }
  0x16   :  { %s3696_s17 = smov [#allocation10]   ;;  %s3697_s19 = smov [#allocation13]  }
  0x17   :  { %s82_s18 = sshll.u32 %s3696_s17, 4  ;;  %s107_s20 = sshll.u32 %s3697_s19, 4  ;;  %s83_s18 = int_to_ptr.vmem [resolvable:$true] %s82_s18  ;;  %s108_s20 = int_to_ptr.vmem [resolvable:$true] %s107_s20 }
  0x18   :  { %85 = dma.hbm_to_vmem [thread:$0]  %s81_s16, 16, %s83_s18, [#allocation9]  }
  0x19   :  { %s135_s4 = sshll.u32 %s4619_s11, 4  ;;  %s3698_s22 = smov [#allocation16]   ;;  %s136_s4 = int_to_ptr.hbm [resolvable:$true] %s135_s4 }
  0x1a   :  { %113 = dma.hbm_to_vmem [thread:$0]  %s106_s3, 2048, %s108_s20, [#allocation12], %s3689_s29, %s3689_s29, %s3690_s30  }
  0x1b   :  { %s137_s23 = sshll.u32 %s3698_s22, 4  ;;  %s138_s23 = int_to_ptr.vmem [resolvable:$true] %s137_s23 }
  0x1c   :  { %143 = dma.hbm_to_vmem [thread:$0]  %s136_s4, 1024, %s138_s23, [#allocation15], %s3689_s29, %s3689_s29, %s3690_s30  }
  0x1d   :  { %3676 = dma.done.wait [#allocation3], 2432  }
  0x1e   :  { %3677 = vsyncadd [#allocation3], 4294964864 }
  0x1f   :  { %3678 = dma.done.wait [#allocation6], 3456  }
  0x20   :  { %3679 = vsyncadd [#allocation6], 4294963840 }
  0x21   :  { %3680 = dma.done.wait [#allocation9], 1040  }
  0x22   :  { %3681 = vsyncadd [#allocation9], 4294966256 }
  0x23   :  { %3682 = dma.done.wait [#allocation12], 4096  }
  0x24   :  { %3683 = vsyncadd [#allocation12], 4294963200 }
  0x25   :  { %3684 = dma.done.wait [#allocation15], 2048  }
  0x26   :  { %3685 = vsyncadd [#allocation15], 4294965248  ;;  %v3094_v0 = vld [vmem:[#allocation7 + $0x38] sm:$0xff]  ;;  %v3093_v2 = vld [vmem:[#allocation7 + $0x30] sm:$0xff]  ;;  %s2812_s15 = sshll.u32 %s4620_s12, 4  ;;  %s3700_s16 = smov 256   ;;  %s2813_s15 = int_to_ptr.hbm [resolvable:$true] %s2812_s15 }
  0x27   :  { %v3102_v1 = vld [vmem:[#allocation8 + $0x38] sm:$0xff]  ;;  %510 = vmatpush.bf16.msra.mxu0 %v3094_v0  ;;  %v3101_v3 = vld [vmem:[#allocation8 + $0x30] sm:$0xff]  ;;  %v3092_v4 = vld [vmem:[#allocation7 + $0x28] sm:$0xff]  ;;  %s3701_s2 = smov 16  }
  0x28   :  { %678 = vmatpush.bf16.msra.mxu1 %v3102_v1  ;;  %v3100_v5 = vld [vmem:[#allocation8 + $0x28] sm:$0xff]  ;;  %v3091_v6 = vld [vmem:[#allocation7 + $0x20] sm:$0xff]  ;;  %v3090_v8 = vld [vmem:[#allocation7 + $0x18] sm:$0xff] }
  0x29   :  { %v3099_v7 = vld [vmem:[#allocation8 + $0x20] sm:$0xff]  ;;  %v3098_v9 = vld [vmem:[#allocation8 + $0x18] sm:$0xff]  ;;  %v3089_v10 = vld [vmem:[#allocation7 + $0x10] sm:$0xff] }
  0x2a   :  { %v3097_v11 = vld [vmem:[#allocation8 + $0x10] sm:$0xff]  ;;  %v3152_v12 = vld [vmem:[#allocation5] sm:$0xff]   ;;  %v3087_v24 = vld [vmem:[#allocation7] sm:$0xff] }
  0x2b   :  { %511 = vmatpush.bf16.msra.mxu0 %v3093_v2  ;;  %v3228_v13 = vld [vmem:[#allocation2] sm:$0xff]   ;;  %v3153_v14 = vunpack.c.l.bf16 %v3152_v12  ;;  %v3154_v15 = vunpack.c.h.bf16 %v3152_v12  ;;  %v3088_v18 = vld [vmem:[#allocation7 + $0x8] sm:$0xff]  ;;  %v3095_v25 = vld [vmem:[#allocation8] sm:$0xff] }
  0x2c   :  { %679 = vmatpush.bf16.msra.mxu1 %v3101_v3  ;;  %v3229_v16 = vunpack.c.l.bf16 %v3228_v13  ;;  %v3230_v17 = vunpack.c.h.bf16 %v3228_v13  ;;  %v3096_v19 = vld [vmem:[#allocation8 + $0x8] sm:$0xff]  ;;  %v3303_v28 = vld [vmem:[#allocation5 + $0x8] sm:$0xff]   ;;  %v3321_v29 = vld [vmem:[#allocation2 + $0x8] sm:$0xff]  }
  0x2d   :  { %v256_v20 = vmax.f32 %v3153_v14, 0.0  ;;  %v257_v21 = vmax.f32 %v3154_v15, 0.0  ;;  %v3157_v30 = vunpack.c.l.bf16 %v3303_v28  ;;  %v3158_v31 = vunpack.c.h.bf16 %v3303_v28  ;;  %v3304_v40 = vld [vmem:[#allocation5 + $0x10] sm:$0xff]   ;;  %v3322_v41 = vld [vmem:[#allocation2 + $0x10] sm:$0xff]   ;;  %v3323_v53 = vld [vmem:[#allocation2 + $0x18] sm:$0xff]  }
  0x2e   :  { %v389_v22 = vmax.f32 %v3229_v16, 0.0  ;;  %v390_v23 = vmax.f32 %v3230_v17, 0.0  ;;  %v3233_v32 = vunpack.c.l.bf16 %v3321_v29  ;;  %v3234_v33 = vunpack.c.h.bf16 %v3321_v29  ;;  %v3305_v52 = vld [vmem:[#allocation5 + $0x18] sm:$0xff]   ;;  %v3306_v0 = vld [vmem:[#allocation5 + $0x20] sm:$0xff]   ;;  %v3324_v1 = vld [vmem:[#allocation2 + $0x20] sm:$0xff]  }
  0x2f   :  { %512 = vmatpush.bf16.msra.mxu0 %v3092_v4  ;;  %v294_v26 = vpack.c.bf16 %v257_v21, %v256_v20  ;;  %v258_v34 = vmax.f32 %v3157_v30, 0.0  ;;  %v259_v35 = vmax.f32 %v3158_v31, 0.0  ;;  %v3161_v42 = vunpack.c.l.bf16 %v3304_v40  ;;  %v3110_v12 = vld [vmem:[#allocation11 + $0x38] sm:$0xff]  ;;  %v3307_v13 = vld [vmem:[#allocation5 + $0x28] sm:$0xff]  }
  0x30   :  { %680 = vmatpush.bf16.msra.mxu1 %v3100_v5  ;;  %v427_v27 = vpack.c.bf16 %v390_v23, %v389_v22  ;;  %v391_v36 = vmax.f32 %v3233_v32, 0.0  ;;  %v392_v37 = vmax.f32 %v3234_v33, 0.0  ;;  %v3162_v43 = vunpack.c.h.bf16 %v3304_v40  ;;  %v3325_v14 = vld [vmem:[#allocation2 + $0x28] sm:$0xff]   ;;  %949 = vmatpush.bf16.msra.mxu2 %v3110_v12  ;;  %v3108_v28 = vld [vmem:[#allocation11 + $0x28] sm:$0xff]  ;;  %v3107_v33 = vld [vmem:[#allocation11 + $0x20] sm:$0xff] }
  0x31   :  { %v295_v38 = vpack.c.bf16 %v259_v35, %v258_v34  ;;  %v3237_v44 = vunpack.c.l.bf16 %v3322_v41  ;;  %v3238_v45 = vunpack.c.h.bf16 %v3322_v41  ;;  %v260_v46 = vmax.f32 %v3161_v42, 0.0  ;;  %v3106_v40 = vld [vmem:[#allocation11 + $0x18] sm:$0xff]  ;;  %v3105_v41 = vld [vmem:[#allocation11 + $0x10] sm:$0xff] }
  0x32   :  { %v428_v39 = vpack.c.bf16 %v392_v37, %v391_v36  ;;  %v261_v47 = vmax.f32 %v3162_v43, 0.0  ;;  %v3165_v54 = vunpack.c.l.bf16 %v3305_v52  ;;  %v3166_v55 = vunpack.c.h.bf16 %v3305_v52  ;;  %v3126_v42 = vld [vmem:[#allocation11 + $0x78] sm:$0xff] }
  0x33   :  { %513 = vmatpush.bf16.msra.mxu0 %v3091_v6  ;;  %v393_v48 = vmax.f32 %v3237_v44, 0.0  ;;  %v394_v49 = vmax.f32 %v3238_v45, 0.0  ;;  %v3241_v56 = vunpack.c.l.bf16 %v3323_v53  ;;  %v3242_v57 = vunpack.c.h.bf16 %v3323_v53  ;;  %v3309_v43 = vld [vmem:[#allocation5 + $0x38] sm:$0xff]   ;;  %v3327_v44 = vld [vmem:[#allocation2 + $0x38] sm:$0xff]  }
  0x34   :  { %681 = vmatpush.bf16.msra.mxu1 %v3099_v7  ;;  %v296_v50 = vpack.c.bf16 %v261_v47, %v260_v46  ;;  %v262_v58 = vmax.f32 %v3165_v54, 0.0  ;;  %v263_v59 = vmax.f32 %v3166_v55, 0.0  ;;  %v3169_v2 = vunpack.c.l.bf16 %v3306_v0  ;;  %v3103_v54 = vld [vmem:[#allocation11] sm:$0xff] }
  0x35   :  { %v429_v51 = vpack.c.bf16 %v394_v49, %v393_v48  ;;  %v395_v60 = vmax.f32 %v3241_v56, 0.0  ;;  %v396_v61 = vmax.f32 %v3242_v57, 0.0  ;;  %v3170_v3 = vunpack.c.h.bf16 %v3306_v0  ;;  %v3104_v49 = vld [vmem:[#allocation11 + $0x8] sm:$0xff] }
  0x36   :  { %v297_v62 = vpack.c.bf16 %v263_v59, %v262_v58  ;;  %v3245_v4 = vunpack.c.l.bf16 %v3324_v1  ;;  %v3246_v5 = vunpack.c.h.bf16 %v3324_v1  ;;  %v264_v6 = vmax.f32 %v3169_v2, 0.0  ;;  %v3310_v57 = vld [vmem:[#allocation5 + $0x40] sm:$0xff]   ;;  %v3328_v58 = vld [vmem:[#allocation2 + $0x40] sm:$0xff]  }
  0x37   :  { %514 = vmatpush.bf16.msra.mxu0 %v3090_v8  ;;  %v430_v63 = vpack.c.bf16 %v396_v61, %v395_v60  ;;  %v265_v7 = vmax.f32 %v3170_v3, 0.0  ;;  %v3173_v15 = vunpack.c.l.bf16 %v3307_v13  ;;  %v3174_v16 = vunpack.c.h.bf16 %v3307_v13 }
  0x38   :  { %682 = vmatpush.bf16.msra.mxu1 %v3098_v9  ;;  %v397_v8 = vmax.f32 %v3245_v4, 0.0  ;;  %v398_v9 = vmax.f32 %v3246_v5, 0.0  ;;  %v3249_v17 = vunpack.c.l.bf16 %v3325_v14  ;;  %v3181_v45 = vunpack.c.l.bf16 %v3309_v43 }
  0x39   :  { %v267_v20 = vmax.f32 %v3174_v16, 0.0  ;;  %v3182_v46 = vunpack.c.h.bf16 %v3309_v43  ;;  %v3257_v47 = vunpack.c.l.bf16 %v3327_v44  ;;  %v3258_v48 = vunpack.c.h.bf16 %v3327_v44 }
  0x3a   :  { %v399_v21 = vmax.f32 %v3249_v17, 0.0  ;;  %v3185_v59 = vunpack.c.l.bf16 %v3310_v57  ;;  %v3186_v60 = vunpack.c.h.bf16 %v3310_v57  ;;  %v3261_v61 = vunpack.c.l.bf16 %v3328_v58 }
  0x3b   :  { %515 = vmatpush.bf16.msra.mxu0 %v3089_v10  ;;  %v298_v10 = vpack.c.bf16 %v265_v7, %v264_v6  ;;  %v403_v52 = vmax.f32 %v3257_v47, 0.0  ;;  %v404_v53 = vmax.f32 %v3258_v48, 0.0  ;;  %v3311_v7 = vld [vmem:[#allocation5 + $0x48] sm:$0xff]  }
  0x3c   :  { %683 = vmatpush.bf16.msra.mxu1 %v3097_v11  ;;  %v431_v11 = vpack.c.bf16 %v398_v9, %v397_v8  ;;  %v273_v0 = vmax.f32 %v3186_v60, 0.0  ;;  %v405_v1 = vmax.f32 %v3261_v61, 0.0  ;;  %v3329_v8 = vld [vmem:[#allocation2 + $0x48] sm:$0xff]   ;;  %v3190_v12 = vunpack.c.h.bf16 %v3311_v7 }
  0x3d   :  { %v434_v56 = vpack.c.bf16 %v404_v53, %v403_v52  ;;  %v3265_v13 = vunpack.c.l.bf16 %v3329_v8 }
  0x3f   :  { %516 = vmatpush.bf16.msra.mxu0 %v3088_v18  ;;  %v3250_v18 = vunpack.c.h.bf16 %v3325_v14  ;;  %v3266_v14 = vunpack.c.h.bf16 %v3329_v8 }
  0x40   :  { %684 = vmatpush.bf16.msra.mxu1 %v3096_v19  ;;  %v266_v19 = vmax.f32 %v3173_v15, 0.0 }
  0x41   :  { %v400_v22 = vmax.f32 %v3250_v18, 0.0 }
  0x42   :  { %v299_v23 = vpack.c.bf16 %v267_v20, %v266_v19 }
  0x43   :  { %517 = vmatpush.bf16.msra.mxu0 %v3087_v24  ;;  %v432_v24 = vpack.c.bf16 %v400_v22, %v399_v21  ;;  %v275_v21 = vmax.f32 %v3190_v12, 0.0  ;;  %v407_v22 = vmax.f32 %v3265_v13, 0.0 }
  0x44   :  { %685 = vmatpush.bf16.msra.mxu1 %v3095_v25  ;;  %v3109_v25 = vld [vmem:[#allocation11 + $0x30] sm:$0xff] }
  0x45   :  { %950 = vmatpush.bf16.msra.mxu2 %v3109_v25 }
  0x46   :  { %518 = vmatmul.bf16.vlgmr.msra.gmra.mxu0 %v294_v26  ;;  %v3308_v26 = vld [vmem:[#allocation5 + $0x30] sm:$0xff]  }
  0x47   :  { %686 = vmatmul.bf16.vlgmr.msra.gmra.mxu1 %v427_v27  ;;  %v3326_v27 = vld [vmem:[#allocation2 + $0x30] sm:$0xff]   ;;  %v3177_v29 = vunpack.c.l.bf16 %v3308_v26  ;;  %v3178_v30 = vunpack.c.h.bf16 %v3308_v26  ;;  %1447 = vmatpush.bf16.msrb.mxu0 %v3126_v42 }
  0x48   :  { %v3253_v31 = vunpack.c.l.bf16 %v3326_v27  ;;  %v3254_v32 = vunpack.c.h.bf16 %v3326_v27 }
  0x49   :  { %951 = vmatpush.bf16.msra.mxu2 %v3108_v28  ;;  %v268_v34 = vmax.f32 %v3177_v29, 0.0  ;;  %v269_v35 = vmax.f32 %v3178_v30, 0.0 }
  0x4a   :  { %v401_v36 = vmax.f32 %v3253_v31, 0.0  ;;  %v402_v37 = vmax.f32 %v3254_v32, 0.0  ;;  %v3312_v32 = vld [vmem:[#allocation5 + $0x50] sm:$0xff]  }
  0x4d   :  { %952 = vmatpush.bf16.msra.mxu2 %v3107_v33  ;;  %v3330_v33 = vld [vmem:[#allocation2 + $0x50] sm:$0xff]  }
  0x51   :  { %953 = vmatpush.bf16.msra.mxu2 %v3106_v40 }
  0x55   :  { %954 = vmatpush.bf16.msra.mxu2 %v3105_v41 }
  0x56   :  { %523 = vmatmul.bf16.gmra.mxu0 %v295_v38  ;;  %v300_v38 = vpack.c.bf16 %v269_v35, %v268_v34  ;;  %v3193_v35 = vunpack.c.l.bf16 %v3312_v32 }
  0x57   :  { %691 = vmatmul.bf16.gmra.mxu1 %v428_v39  ;;  %v433_v39 = vpack.c.bf16 %v402_v37, %v401_v36  ;;  %v3194_v36 = vunpack.c.h.bf16 %v3312_v32  ;;  %v3269_v37 = vunpack.c.l.bf16 %v3330_v33 }
  0x58   :  { %v276_v43 = vmax.f32 %v3193_v35, 0.0 }
  0x59   :  { %955 = vmatpush.bf16.msra.mxu2 %v3104_v49 }
  0x5d   :  { %956 = vmatpush.bf16.msra.mxu2 %v3103_v54 }
  0x66   :  { %528 = vmatmul.bf16.gmra.mxu0 %v296_v50  ;;  %v270_v50 = vmax.f32 %v3181_v45, 0.0  ;;  %v277_v45 = vmax.f32 %v3194_v36, 0.0 }
  0x67   :  { %696 = vmatmul.bf16.gmra.mxu1 %v429_v51  ;;  %v271_v51 = vmax.f32 %v3182_v46, 0.0  ;;  %v409_v46 = vmax.f32 %v3269_v37, 0.0 }
  0x69   :  { %v301_v55 = vpack.c.bf16 %v271_v51, %v270_v50  ;;  %v304_v51 = vpack.c.bf16 %v277_v45, %v276_v43  ;;  %v3333_v43 = vld [vmem:[#allocation2 + $0x68] sm:$0xff]  }
  0x76   :  { %533 = vmatmul.bf16.gmra.mxu0 %v297_v62  ;;  %v3262_v62 = vunpack.c.h.bf16 %v3328_v58 }
  0x77   :  { %701 = vmatmul.bf16.gmra.mxu1 %v430_v63  ;;  %v272_v63 = vmax.f32 %v3185_v59, 0.0 }
  0x78   :  { %v406_v2 = vmax.f32 %v3262_v62, 0.0 }
  0x79   :  { %v302_v3 = vpack.c.bf16 %v273_v0, %v272_v63 }
  0x7a   :  { %v435_v4 = vpack.c.bf16 %v406_v2, %v405_v1 }
  0x86   :  { %538 = vmatmul.bf16.gmra.mxu0 %v298_v10  ;;  %v3818_v10 = vld [vmem:[#allocation10] ss:$0 sm:$0xff] }
  0x87   :  { %706 = vmatmul.bf16.gmra.mxu1 %v431_v11  ;;  %v3189_v11 = vunpack.c.l.bf16 %v3311_v7 }
  0x89   :  { %v274_v19 = vmax.f32 %v3189_v11, 0.0 }
  0x8b   :  { %v303_v28 = vpack.c.bf16 %v275_v21, %v274_v19 }
  0x96   :  { %543 = vmatmul.bf16.gmra.mxu0 %v299_v23  ;;  %v408_v23 = vmax.f32 %v3266_v14, 0.0 }
  0x97   :  { %711 = vmatmul.bf16.gmra.mxu1 %v432_v24  ;;  %v3125_v24 = vld [vmem:[#allocation11 + $0x70] sm:$0xff] }
  0x98   :  { %1448 = vmatpush.bf16.msrb.mxu0 %v3125_v24  ;;  %v436_v29 = vpack.c.bf16 %v408_v23, %v407_v22 }
  0xa6   :  { %548 = vmatmul.bf16.gmra.mxu0 %v300_v38  ;;  %v3270_v38 = vunpack.c.h.bf16 %v3330_v33 }
  0xa7   :  { %716 = vmatmul.bf16.gmra.mxu1 %v433_v39 }
  0xa8   :  { %v410_v47 = vmax.f32 %v3270_v38, 0.0 }
  0xaa   :  { %v437_v52 = vpack.c.bf16 %v410_v47, %v409_v46 }
  0xb6   :  { %553 = vmatmul.bf16.gmra.mxu0 %v301_v55  ;;  %v3313_v55 = vld [vmem:[#allocation5 + $0x58] sm:$0xff]  }
  0xb7   :  { %721 = vmatmul.bf16.gmra.mxu1 %v434_v56  ;;  %v3331_v56 = vld [vmem:[#allocation2 + $0x58] sm:$0xff]   ;;  %v3197_v58 = vunpack.c.l.bf16 %v3313_v55  ;;  %v3198_v59 = vunpack.c.h.bf16 %v3313_v55 }
  0xb8   :  { %v3273_v60 = vunpack.c.l.bf16 %v3331_v56  ;;  %v3274_v61 = vunpack.c.h.bf16 %v3331_v56 }
  0xb9   :  { %v278_v2 = vmax.f32 %v3197_v58, 0.0 }
  0xc3   :  { %v519_v5 = vpop.f32.mrf.mxu0 }
  0xc4   :  { %v687_v6 = vpop.f32.mrf.mxu1 }
  0xc5   :  { %v688_v9 = vadd.f32 %v687_v6, %v519_v5  ;;  %v411_v5 = vmax.f32 %v3273_v60, 0.0  ;;  %v412_v6 = vmax.f32 %v3274_v61, 0.0 }
  0xc6   :  { %558 = vmatmul.bf16.gmra.mxu0 %v302_v3 }
  0xc7   :  { %726 = vmatmul.bf16.gmra.mxu1 %v435_v4  ;;  %v3821_v17 = vadd.f32 %v3818_v10, %v688_v9  ;;  %v279_v4 = vmax.f32 %v3198_v59, 0.0  ;;  %v438_v12 = vpack.c.bf16 %v412_v6, %v411_v5  ;;  %v3334_v5 = vld [vmem:[#allocation2 + $0x70] sm:$0xff]  }
  0xc9   :  { %v824_v25 = vmax.f32 %v3821_v17, 0.0  ;;  %v305_v11 = vpack.c.bf16 %v279_v4, %v278_v2  ;;  %v3316_v4 = vld [vmem:[#allocation5 + $0x70] sm:$0xff]  }
  0xcb   :  { %v521_v15 = vpop.f32.mrf.mxu0 }
  0xcc   :  { %v689_v16 = vpop.f32.mrf.mxu1 }
  0xcd   :  { %v690_v18 = vadd.f32 %v689_v16, %v521_v15  ;;  %v3314_v15 = vld [vmem:[#allocation5 + $0x60] sm:$0xff]  }
  0xce   :  { %v3124_v16 = vld [vmem:[#allocation11 + $0x68] sm:$0xff]  ;;  %v3201_v21 = vunpack.c.l.bf16 %v3314_v15  ;;  %v3202_v22 = vunpack.c.h.bf16 %v3314_v15 }
  0xcf   :  { %v3824_v20 = vadd.f32 %v3818_v10, %v690_v18  ;;  %v3332_v18 = vld [vmem:[#allocation2 + $0x60] sm:$0xff]   ;;  %1449 = vmatpush.bf16.msrb.mxu0 %v3124_v16 }
  0xd0   :  { %v3277_v23 = vunpack.c.l.bf16 %v3332_v18  ;;  %v3278_v24 = vunpack.c.h.bf16 %v3332_v18 }
  0xd1   :  { %v825_v26 = vmax.f32 %v3824_v20, 0.0 }
  0xd2   :  { %v413_v32 = vmax.f32 %v3277_v23, 0.0  ;;  %v414_v33 = vmax.f32 %v3278_v24, 0.0  ;;  %v3123_v23 = vld [vmem:[#allocation11 + $0x60] sm:$0xff] }
  0xd3   :  { %v862_v27 = vpack.c.bf16 %v825_v26, %v824_v25  ;;  %v524_v30 = vpop.f32.mrf.mxu0  ;;  %1450 = vmatpush.bf16.msrb.mxu0 %v3123_v23 }
  0xd4   :  { %v692_v31 = vpop.f32.mrf.mxu1  ;;  %v439_v38 = vpack.c.bf16 %v414_v33, %v413_v32  ;;  %v3118_v33 = vld [vmem:[#allocation13 + $0x38] sm:$0xff] }
  0xd5   :  { %957 = vmatmul.bf16.vlgmr.msra.gmra.mxu2 %v862_v27  ;;  %v693_v34 = vadd.f32 %v692_v31, %v524_v30  ;;  %v281_v31 = vmax.f32 %v3202_v22, 0.0  ;;  %1178 = vmatpush.bf16.msra.mxu3 %v3118_v33 }
  0xd6   :  { %563 = vmatmul.bf16.gmra.mxu0 %v303_v28 }
  0xd7   :  { %731 = vmatmul.bf16.gmra.mxu1 %v436_v29  ;;  %v3829_v41 = vadd.f32 %v3818_v10, %v693_v34  ;;  %v280_v29 = vmax.f32 %v3201_v21, 0.0 }
  0xd9   :  { %v826_v48 = vmax.f32 %v3829_v41, 0.0  ;;  %v306_v37 = vpack.c.bf16 %v281_v31, %v280_v29 }
  0xdb   :  { %v526_v39 = vpop.f32.mrf.mxu0 }
  0xdc   :  { %v694_v40 = vpop.f32.mrf.mxu1 }
  0xdd   :  { %v695_v42 = vadd.f32 %v694_v40, %v526_v39 }
  0xdf   :  { %v3832_v44 = vadd.f32 %v3818_v10, %v695_v42  ;;  %v3315_v42 = vld [vmem:[#allocation5 + $0x68] sm:$0xff]  }
  0xe0   :  { %v3205_v46 = vunpack.c.l.bf16 %v3315_v42  ;;  %v3206_v47 = vunpack.c.h.bf16 %v3315_v42 }
  0xe1   :  { %v827_v49 = vmax.f32 %v3832_v44, 0.0 }
  0xe2   :  { %v283_v56 = vmax.f32 %v3206_v47, 0.0 }
  0xe3   :  { %v863_v50 = vpack.c.bf16 %v827_v49, %v826_v48  ;;  %v529_v53 = vpop.f32.mrf.mxu0  ;;  %v3281_v48 = vunpack.c.l.bf16 %v3333_v43  ;;  %v3282_v49 = vunpack.c.h.bf16 %v3333_v43 }
  0xe4   :  { %v697_v54 = vpop.f32.mrf.mxu1 }
  0xe5   :  { %962 = vmatmul.bf16.gmra.mxu2 %v863_v50  ;;  %v698_v57 = vadd.f32 %v697_v54, %v529_v53  ;;  %v282_v54 = vmax.f32 %v3205_v46, 0.0  ;;  %v416_v58 = vmax.f32 %v3282_v49, 0.0  ;;  %v3116_v49 = vld [vmem:[#allocation13 + $0x28] sm:$0xff] }
  0xe6   :  { %568 = vmatmul.bf16.gmra.mxu0 %v304_v51 }
  0xe7   :  { %736 = vmatmul.bf16.gmra.mxu1 %v437_v52  ;;  %v3837_v0 = vadd.f32 %v3818_v10, %v698_v57  ;;  %v415_v57 = vmax.f32 %v3281_v48, 0.0 }
  0xe9   :  { %v828_v7 = vmax.f32 %v3837_v0, 0.0 }
  0xeb   :  { %v531_v62 = vpop.f32.mrf.mxu0 }
  0xec   :  { %v699_v63 = vpop.f32.mrf.mxu1 }
  0xed   :  { %v700_v1 = vadd.f32 %v699_v63, %v531_v62  ;;  %v307_v62 = vpack.c.bf16 %v283_v56, %v282_v54  ;;  %v440_v63 = vpack.c.bf16 %v416_v58, %v415_v57  ;;  %v3115_v58 = vld [vmem:[#allocation13 + $0x20] sm:$0xff] }
  0xef   :  { %v3840_v3 = vadd.f32 %v3818_v10, %v700_v1 }
  0xf1   :  { %v829_v8 = vmax.f32 %v3840_v3, 0.0 }
  0xf3   :  { %v864_v9 = vpack.c.bf16 %v829_v8, %v828_v7  ;;  %v534_v13 = vpop.f32.mrf.mxu0  ;;  %v3209_v7 = vunpack.c.l.bf16 %v3316_v4  ;;  %v3210_v8 = vunpack.c.h.bf16 %v3316_v4  ;;  %v3134_v4 = vld [vmem:[#allocation13 + $0x78] sm:$0xff] }
  0xf4   :  { %v702_v14 = vpop.f32.mrf.mxu1  ;;  %1678 = vmatpush.bf16.msrb.mxu1 %v3134_v4 }
  0xf5   :  { %967 = vmatmul.bf16.gmra.mxu2 %v864_v9  ;;  %v703_v19 = vadd.f32 %v702_v14, %v534_v13  ;;  %v3285_v9 = vunpack.c.l.bf16 %v3334_v5  ;;  %v284_v16 = vmax.f32 %v3209_v7, 0.0 }
  0xf6   :  { %573 = vmatmul.bf16.gmra.mxu0 %v305_v11  ;;  %v3286_v11 = vunpack.c.h.bf16 %v3334_v5  ;;  %v3336_v5 = vld [vmem:[#allocation2 + $0x80] sm:$0xff]  }
  0xf7   :  { %741 = vmatmul.bf16.gmra.mxu1 %v438_v12  ;;  %v3845_v27 = vadd.f32 %v3818_v10, %v703_v19  ;;  %v285_v19 = vmax.f32 %v3210_v8, 0.0  ;;  %v417_v21 = vmax.f32 %v3285_v9, 0.0  ;;  %v3113_v8 = vld [vmem:[#allocation13 + $0x10] sm:$0xff] }
  0xf8   :  { %v418_v22 = vmax.f32 %v3286_v11, 0.0  ;;  %v3293_v11 = vunpack.c.l.bf16 %v3336_v5 }
  0xf9   :  { %v830_v34 = vmax.f32 %v3845_v27, 0.0 }
  0xfa   :  { %v441_v29 = vpack.c.bf16 %v418_v22, %v417_v21  ;;  %v3112_v22 = vld [vmem:[#allocation13 + $0x8] sm:$0xff] }
  0xfb   :  { %v536_v25 = vpop.f32.mrf.mxu0 }
  0xfc   :  { %v704_v26 = vpop.f32.mrf.mxu1 }
  0xfd   :  { %v705_v28 = vadd.f32 %v704_v26, %v536_v25 }
  0xff   :  { %v3848_v30 = vadd.f32 %v3818_v10, %v705_v28  ;;  %v308_v28 = vpack.c.bf16 %v285_v19, %v284_v16 }
 0x101   :  { %v831_v35 = vmax.f32 %v3848_v30, 0.0 }
 0x103   :  { %v865_v36 = vpack.c.bf16 %v831_v35, %v830_v34  ;;  %v539_v39 = vpop.f32.mrf.mxu0  ;;  %v3317_v34 = vld [vmem:[#allocation5 + $0x78] sm:$0xff]   ;;  %v3335_v35 = vld [vmem:[#allocation2 + $0x78] sm:$0xff]  }
 0x104   :  { %v707_v40 = vpop.f32.mrf.mxu1  ;;  %v3290_v42 = vunpack.c.h.bf16 %v3335_v35 }
 0x105   :  { %972 = vmatmul.bf16.gmra.mxu2 %v865_v36  ;;  %v708_v45 = vadd.f32 %v707_v40, %v539_v39  ;;  %v3214_v39 = vunpack.c.h.bf16 %v3317_v34  ;;  %v3289_v40 = vunpack.c.l.bf16 %v3335_v35  ;;  %v3122_v35 = vld [vmem:[#allocation11 + $0x58] sm:$0xff] }
 0x106   :  { %578 = vmatmul.bf16.gmra.mxu0 %v306_v37  ;;  %v3213_v37 = vunpack.c.l.bf16 %v3317_v34  ;;  %v420_v54 = vmax.f32 %v3290_v42, 0.0 }
 0x107   :  { %746 = vmatmul.bf16.gmra.mxu1 %v439_v38  ;;  %v3853_v52 = vadd.f32 %v3818_v10, %v708_v45  ;;  %v3117_v38 = vld [vmem:[#allocation13 + $0x30] sm:$0xff]  ;;  %1451 = vmatpush.bf16.msrb.mxu0 %v3122_v35 }
 0x108   :  { %1179 = vmatpush.bf16.msra.mxu3 %v3117_v38  ;;  %v286_v48 = vmax.f32 %v3213_v37, 0.0  ;;  %v3319_v38 = vld [vmem:[#allocation5 + $0x88] sm:$0xff]  }
 0x109   :  { %v832_v59 = vmax.f32 %v3853_v52, 0.0  ;;  %v3221_v42 = vunpack.c.l.bf16 %v3319_v38 }
 0x10b   :  { %v541_v50 = vpop.f32.mrf.mxu0 }
 0x10c   :  { %v709_v51 = vpop.f32.mrf.mxu1  ;;  %1180 = vmatpush.bf16.msra.mxu3 %v3116_v49 }
 0x10d   :  { %v710_v53 = vadd.f32 %v709_v51, %v541_v50  ;;  %v287_v51 = vmax.f32 %v3214_v39, 0.0  ;;  %v3337_v39 = vld [vmem:[#allocation2 + $0x88] sm:$0xff]  }
 0x10f   :  { %v3856_v55 = vadd.f32 %v3818_v10, %v710_v53  ;;  %v419_v53 = vmax.f32 %v3289_v40, 0.0 }
 0x110   :  { %1181 = vmatpush.bf16.msra.mxu3 %v3115_v58 }
 0x111   :  { %v833_v60 = vmax.f32 %v3856_v55, 0.0 }
 0x113   :  { %v866_v61 = vpack.c.bf16 %v833_v60, %v832_v59  ;;  %v544_v1 = vpop.f32.mrf.mxu0  ;;  %v309_v60 = vpack.c.bf16 %v287_v51, %v286_v48 }
 0x114   :  { %v712_v2 = vpop.f32.mrf.mxu1 }
 0x115   :  { %977 = vmatmul.bf16.gmra.mxu2 %v866_v61  ;;  %v713_v6 = vadd.f32 %v712_v2, %v544_v1  ;;  %v442_v61 = vpack.c.bf16 %v420_v54, %v419_v53  ;;  %v3114_v1 = vld [vmem:[#allocation13 + $0x18] sm:$0xff]  ;;  %v3318_v2 = vld [vmem:[#allocation5 + $0x80] sm:$0xff]   ;;  %v290_v54 = vmax.f32 %v3221_v42, 0.0 }
 0x116   :  { %583 = vmatmul.bf16.gmra.mxu0 %v307_v62  ;;  %1182 = vmatpush.bf16.msra.mxu3 %v3114_v1  ;;  %v3217_v7 = vunpack.c.l.bf16 %v3318_v2  ;;  %v3218_v9 = vunpack.c.h.bf16 %v3318_v2 }
 0x117   :  { %751 = vmatmul.bf16.gmra.mxu1 %v440_v63  ;;  %v3861_v14 = vadd.f32 %v3818_v10, %v713_v6 }
 0x118   :  { %v288_v21 = vmax.f32 %v3217_v7, 0.0  ;;  %v3338_v7 = vld [vmem:[#allocation2 + $0x90] sm:$0xff]  }
 0x119   :  { %v834_v24 = vmax.f32 %v3861_v14, 0.0 }
 0x11a   :  { %1183 = vmatpush.bf16.msra.mxu3 %v3113_v8 }
 0x11b   :  { %v546_v12 = vpop.f32.mrf.mxu0 }
 0x11c   :  { %v714_v13 = vpop.f32.mrf.mxu1 }
 0x11d   :  { %v715_v15 = vadd.f32 %v714_v13, %v546_v12  ;;  %v3294_v12 = vunpack.c.h.bf16 %v3336_v5  ;;  %v3320_v5 = vld [vmem:[#allocation5 + $0x90] sm:$0xff]  }
 0x11e   :  { %1184 = vmatpush.bf16.msra.mxu3 %v3112_v22 }
 0x11f   :  { %v3864_v18 = vadd.f32 %v3818_v10, %v715_v15 }
 0x121   :  { %v835_v25 = vmax.f32 %v3864_v18, 0.0 }
 0x123   :  { %v867_v26 = vpack.c.bf16 %v835_v25, %v834_v24  ;;  %v549_v31 = vpop.f32.mrf.mxu0  ;;  %v289_v24 = vmax.f32 %v3218_v9, 0.0  ;;  %v421_v25 = vmax.f32 %v3293_v11, 0.0  ;;  %v3225_v9 = vunpack.c.l.bf16 %v3320_v5 }
 0x124   :  { %v717_v32 = vpop.f32.mrf.mxu1  ;;  %v3226_v11 = vunpack.c.h.bf16 %v3320_v5 }
 0x125   :  { %982 = vmatmul.bf16.gmra.mxu2 %v867_v26  ;;  %v718_v36 = vadd.f32 %v717_v32, %v549_v31  ;;  %v422_v26 = vmax.f32 %v3294_v12, 0.0  ;;  %v3111_v31 = vld [vmem:[#allocation13] sm:$0xff]  ;;  %v310_v33 = vpack.c.bf16 %v289_v24, %v288_v21  ;;  %v3895_v12 = vld [vmem:[%s4614_s6] ss:$0 sm:$0xff] }
 0x126   :  { %588 = vmatmul.bf16.gmra.mxu0 %v308_v28  ;;  %1185 = vmatpush.bf16.msra.mxu3 %v3111_v31 }
 0x127   :  { %756 = vmatmul.bf16.gmra.mxu1 %v441_v29  ;;  %v3869_v46 = vadd.f32 %v3818_v10, %v718_v36  ;;  %v443_v34 = vpack.c.bf16 %v422_v26, %v421_v25  ;;  %v292_v25 = vmax.f32 %v3225_v9, 0.0  ;;  %v293_v26 = vmax.f32 %v3226_v11, 0.0 }
 0x129   :  { %v836_v56 = vmax.f32 %v3869_v46, 0.0 }
 0x12b   :  { %v551_v43 = vpop.f32.mrf.mxu0 }
 0x12c   :  { %v719_v45 = vpop.f32.mrf.mxu1 }
 0x12d   :  { %v720_v47 = vadd.f32 %v719_v45, %v551_v43  ;;  %v3222_v43 = vunpack.c.h.bf16 %v3319_v38  ;;  %v3297_v45 = vunpack.c.l.bf16 %v3337_v39  ;;  %v312_v38 = vpack.c.bf16 %v293_v26, %v292_v25 }
 0x12f   :  { %v3872_v50 = vadd.f32 %v3818_v10, %v720_v47  ;;  %v3298_v47 = vunpack.c.h.bf16 %v3337_v39  ;;  %v423_v58 = vmax.f32 %v3297_v45, 0.0 }
 0x131   :  { %v837_v57 = vmax.f32 %v3872_v50, 0.0 }
 0x133   :  { %v868_v59 = vpack.c.bf16 %v837_v57, %v836_v56  ;;  %v554_v62 = vpop.f32.mrf.mxu0  ;;  %v291_v57 = vmax.f32 %v3222_v43, 0.0 }
 0x134   :  { %v722_v63 = vpop.f32.mrf.mxu1 }
 0x135   :  { %987 = vmatmul.bf16.gmra.mxu2 %v868_v59  ;;  %v723_v6 = vadd.f32 %v722_v63, %v554_v62  ;;  %v424_v59 = vmax.f32 %v3298_v47, 0.0  ;;  %v311_v63 = vpack.c.bf16 %v291_v57, %v290_v54  ;;  %v3121_v54 = vld [vmem:[#allocation11 + $0x50] sm:$0xff] }
 0x136   :  { %593 = vmatmul.bf16.gmra.mxu0 %v309_v60 }
 0x137   :  { %761 = vmatmul.bf16.gmra.mxu1 %v442_v61  ;;  %v3877_v16 = vadd.f32 %v3818_v10, %v723_v6  ;;  %v444_v1 = vpack.c.bf16 %v424_v59, %v423_v58  ;;  %1452 = vmatpush.bf16.msrb.mxu0 %v3121_v54 }
 0x139   :  { %v838_v28 = vmax.f32 %v3877_v16, 0.0 }
 0x13b   :  { %v556_v13 = vpop.f32.mrf.mxu0 }
 0x13c   :  { %v724_v15 = vpop.f32.mrf.mxu1 }
 0x13d   :  { %v725_v19 = vadd.f32 %v724_v15, %v556_v13  ;;  %v3301_v13 = vunpack.c.l.bf16 %v3338_v7  ;;  %v3302_v15 = vunpack.c.h.bf16 %v3338_v7 }
 0x13f   :  { %v3880_v23 = vadd.f32 %v3818_v10, %v725_v19  ;;  %v425_v31 = vmax.f32 %v3301_v13, 0.0 }
 0x141   :  { %v839_v29 = vmax.f32 %v3880_v23, 0.0 }
 0x143   :  { %v869_v32 = vpack.c.bf16 %v839_v29, %v838_v28  ;;  %v559_v36 = vpop.f32.mrf.mxu0 }
 0x144   :  { %v727_v37 = vpop.f32.mrf.mxu1 }
 0x145   :  { %992 = vmatmul.bf16.gmra.mxu2 %v869_v32  ;;  %v728_v40 = vadd.f32 %v727_v37, %v559_v36  ;;  %v426_v32 = vmax.f32 %v3302_v15, 0.0 }
 0x146   :  { %598 = vmatmul.bf16.gmra.mxu0 %v310_v33  ;;  %v3133_v33 = vld [vmem:[#allocation13 + $0x70] sm:$0xff] }
 0x147   :  { %766 = vmatmul.bf16.gmra.mxu1 %v443_v34  ;;  %v3885_v51 = vadd.f32 %v3818_v10, %v728_v40  ;;  %v445_v43 = vpack.c.bf16 %v426_v32, %v425_v31 }
 0x148   :  { %1679 = vmatpush.bf16.msrb.mxu1 %v3133_v33 }
 0x149   :  { %v840_v60 = vmax.f32 %v3885_v51, 0.0 }
 0x14b   :  { %v561_v48 = vpop.f32.mrf.mxu0 }
 0x14c   :  { %v729_v49 = vpop.f32.mrf.mxu1 }
 0x14d   :  { %v730_v53 = vadd.f32 %v729_v49, %v561_v48 }
 0x14f   :  { %v3888_v56 = vadd.f32 %v3818_v10, %v730_v53 }
 0x151   :  { %v841_v61 = vmax.f32 %v3888_v56, 0.0 }
 0x153   :  { %v870_v62 = vpack.c.bf16 %v841_v61, %v840_v60  ;;  %v564_v2 = vpop.f32.mrf.mxu0 }
 0x154   :  { %v732_v4 = vpop.f32.mrf.mxu1 }
 0x155   :  { %997 = vmatmul.bf16.gmra.mxu2 %v870_v62  ;;  %v733_v8 = vadd.f32 %v732_v4, %v564_v2 }
 0x156   :  { %603 = vmatmul.bf16.gmra.mxu0 %v311_v63 }
 0x157   :  { %771 = vmatmul.bf16.gmra.mxu1 %v444_v1  ;;  %v3898_v22 = vadd.f32 %v3818_v10, %v733_v8 }
 0x158   :  { %v958_v6 = vpop.f32.mrf.mxu2 }
 0x159   :  { %v959_v28 = vadd.f32 %v3895_v12, %v958_v6  ;;  %v842_v36 = vmax.f32 %v3898_v22, 0.0 }
 0x15b   :  { %v566_v19 = vpop.f32.mrf.mxu0  ;;  %v1053_v39 = vmax.f32 %v959_v28, 0.0 }
 0x15c   :  { %v734_v21 = vpop.f32.mrf.mxu1 }
 0x15d   :  { %v735_v24 = vadd.f32 %v734_v21, %v566_v19 }
 0x15f   :  { %v3902_v29 = vadd.f32 %v3818_v10, %v735_v24 }
 0x160   :  { %v960_v34 = vpop.f32.mrf.mxu2 }
 0x161   :  { %v961_v35 = vadd.f32 %v3895_v12, %v960_v34  ;;  %v843_v37 = vmax.f32 %v3902_v29, 0.0 }
 0x163   :  { %v1054_v40 = vmax.f32 %v961_v35, 0.0  ;;  %v871_v42 = vpack.c.bf16 %v843_v37, %v842_v36  ;;  %v569_v45 = vpop.f32.mrf.mxu0 }
 0x164   :  { %v737_v47 = vpop.f32.mrf.mxu1 }
 0x165   :  { %1002 = vmatmul.bf16.gmra.mxu2 %v871_v42  ;;  %v1091_v48 = vpack.c.bf16 %v1054_v40, %v1053_v39  ;;  %v738_v53 = vadd.f32 %v737_v47, %v569_v45 }
 0x166   :  { %608 = vmatmul.bf16.gmra.mxu0 %v312_v38  ;;  %v3132_v38 = vld [vmem:[#allocation13 + $0x68] sm:$0xff] }
 0x167   :  { %776 = vmatmul.bf16.gmra.mxu1 %v445_v43  ;;  %1186 = vmatmul.bf16.vlgmr.msra.gmra.mxu3 %v1091_v48  ;;  %v3908_v59 = vadd.f32 %v3818_v10, %v738_v53 }
 0x168   :  { %v963_v49 = vpop.f32.mrf.mxu2  ;;  %1680 = vmatpush.bf16.msrb.mxu1 %v3132_v38 }
 0x169   :  { %v964_v61 = vadd.f32 %v3895_v12, %v963_v49  ;;  %v844_v2 = vmax.f32 %v3908_v59, 0.0 }
 0x16b   :  { %v571_v57 = vpop.f32.mrf.mxu0  ;;  %v1055_v5 = vmax.f32 %v964_v61, 0.0 }
 0x16c   :  { %v739_v58 = vpop.f32.mrf.mxu1 }
 0x16d   :  { %v740_v60 = vadd.f32 %v739_v58, %v571_v57 }
 0x16f   :  { %v3912_v62 = vadd.f32 %v3818_v10, %v740_v60 }
 0x170   :  { %v965_v63 = vpop.f32.mrf.mxu2 }
 0x171   :  { %v966_v1 = vadd.f32 %v3895_v12, %v965_v63  ;;  %v845_v4 = vmax.f32 %v3912_v62, 0.0 }
 0x173   :  { %v1056_v6 = vmax.f32 %v966_v1, 0.0  ;;  %v872_v7 = vpack.c.bf16 %v845_v4, %v844_v2  ;;  %v574_v8 = vpop.f32.mrf.mxu0  ;;  %v3120_v1 = vld [vmem:[#allocation11 + $0x48] sm:$0xff] }
 0x174   :  { %v742_v9 = vpop.f32.mrf.mxu1  ;;  %1453 = vmatpush.bf16.msrb.mxu0 %v3120_v1 }
 0x175   :  { %1007 = vmatmul.bf16.gmra.mxu2 %v872_v7  ;;  %v1092_v11 = vpack.c.bf16 %v1056_v6, %v1055_v5  ;;  %v743_v15 = vadd.f32 %v742_v9, %v574_v8 }
 0x177   :  { %1191 = vmatmul.bf16.gmra.mxu3 %v1092_v11  ;;  %v3918_v24 = vadd.f32 %v3818_v10, %v743_v15 }
 0x178   :  { %v968_v13 = vpop.f32.mrf.mxu2 }
 0x179   :  { %v969_v26 = vadd.f32 %v3895_v12, %v968_v13  ;;  %v846_v33 = vmax.f32 %v3918_v24, 0.0 }
 0x17b   :  { %v576_v19 = vpop.f32.mrf.mxu0  ;;  %v1057_v35 = vmax.f32 %v969_v26, 0.0 }
 0x17c   :  { %v744_v21 = vpop.f32.mrf.mxu1 }
 0x17d   :  { %v745_v25 = vadd.f32 %v744_v21, %v576_v19 }
 0x17f   :  { %v3922_v28 = vadd.f32 %v3818_v10, %v745_v25 }
 0x180   :  { %v970_v31 = vpop.f32.mrf.mxu2 }
 0x181   :  { %v971_v32 = vadd.f32 %v3895_v12, %v970_v31  ;;  %v847_v34 = vmax.f32 %v3922_v28, 0.0 }
 0x183   :  { %v1058_v36 = vmax.f32 %v971_v32, 0.0  ;;  %v873_v37 = vpack.c.bf16 %v847_v34, %v846_v33  ;;  %v579_v39 = vpop.f32.mrf.mxu0 }
 0x184   :  { %v747_v40 = vpop.f32.mrf.mxu1 }
 0x185   :  { %1012 = vmatmul.bf16.gmra.mxu2 %v873_v37  ;;  %v1093_v42 = vpack.c.bf16 %v1058_v36, %v1057_v35  ;;  %v748_v45 = vadd.f32 %v747_v40, %v579_v39 }
 0x187   :  { %1196 = vmatmul.bf16.gmra.mxu3 %v1093_v42  ;;  %v3928_v49 = vadd.f32 %v3818_v10, %v748_v45  ;;  %v3131_v45 = vld [vmem:[#allocation13 + $0x60] sm:$0xff] }
 0x188   :  { %v973_v43 = vpop.f32.mrf.mxu2  ;;  %1681 = vmatpush.bf16.msrb.mxu1 %v3131_v45 }
 0x189   :  { %v974_v54 = vadd.f32 %v3895_v12, %v973_v43  ;;  %v848_v60 = vmax.f32 %v3928_v49, 0.0 }
 0x18b   :  { %v581_v47 = vpop.f32.mrf.mxu0  ;;  %v1059_v2 = vmax.f32 %v974_v54, 0.0 }
 0x18c   :  { %v749_v48 = vpop.f32.mrf.mxu1 }
 0x18d   :  { %v750_v53 = vadd.f32 %v749_v48, %v581_v47 }
 0x18f   :  { %v3932_v57 = vadd.f32 %v3818_v10, %v750_v53 }
 0x190   :  { %v975_v58 = vpop.f32.mrf.mxu2 }
 0x191   :  { %v849_v61 = vmax.f32 %v3932_v57, 0.0  ;;  %v976_v63 = vadd.f32 %v3895_v12, %v975_v58 }
 0x193   :  { %v1060_v4 = vmax.f32 %v976_v63, 0.0  ;;  %v874_v5 = vpack.c.bf16 %v849_v61, %v848_v60  ;;  %v584_v6 = vpop.f32.mrf.mxu0 }
 0x194   :  { %v752_v7 = vpop.f32.mrf.mxu1 }
 0x195   :  { %1017 = vmatmul.bf16.gmra.mxu2 %v874_v5  ;;  %v1094_v8 = vpack.c.bf16 %v1060_v4, %v1059_v2  ;;  %v753_v11 = vadd.f32 %v752_v7, %v584_v6 }
 0x197   :  { %1201 = vmatmul.bf16.gmra.mxu3 %v1094_v8  ;;  %v3938_v19 = vadd.f32 %v3818_v10, %v753_v11 }
 0x198   :  { %v978_v9 = vpop.f32.mrf.mxu2 }
 0x199   :  { %v979_v25 = vadd.f32 %v3895_v12, %v978_v9  ;;  %v850_v32 = vmax.f32 %v3938_v19, 0.0 }
 0x19b   :  { %v586_v13 = vpop.f32.mrf.mxu0  ;;  %v1061_v35 = vmax.f32 %v979_v25, 0.0 }
 0x19c   :  { %v754_v15 = vpop.f32.mrf.mxu1 }
 0x19d   :  { %v755_v21 = vadd.f32 %v754_v15, %v586_v13  ;;  %v3119_v15 = vld [vmem:[#allocation11 + $0x40] sm:$0xff] }
 0x19e   :  { %1454 = vmatpush.bf16.msrb.mxu0 %v3119_v15 }
 0x19f   :  { %v3942_v26 = vadd.f32 %v3818_v10, %v755_v21 }
 0x1a0   :  { %v980_v31 = vpop.f32.mrf.mxu2 }
 0x1a1   :  { %v851_v33 = vmax.f32 %v3942_v26, 0.0  ;;  %v981_v34 = vadd.f32 %v3895_v12, %v980_v31 }
 0x1a3   :  { %v1062_v36 = vmax.f32 %v981_v34, 0.0  ;;  %v875_v37 = vpack.c.bf16 %v851_v33, %v850_v32  ;;  %v589_v38 = vpop.f32.mrf.mxu0 }
 0x1a4   :  { %v757_v39 = vpop.f32.mrf.mxu1 }
 0x1a5   :  { %1022 = vmatmul.bf16.gmra.mxu2 %v875_v37  ;;  %v1095_v40 = vpack.c.bf16 %v1062_v36, %v1061_v35  ;;  %v758_v43 = vadd.f32 %v757_v39, %v589_v38 }
 0x1a7   :  { %1206 = vmatmul.bf16.gmra.mxu3 %v1095_v40  ;;  %v3948_v53 = vadd.f32 %v3818_v10, %v758_v43 }
 0x1a8   :  { %v983_v42 = vpop.f32.mrf.mxu2 }
 0x1a9   :  { %v984_v58 = vadd.f32 %v3895_v12, %v983_v42  ;;  %v852_v63 = vmax.f32 %v3948_v53, 0.0 }
 0x1ab   :  { %v591_v47 = vpop.f32.mrf.mxu0  ;;  %v1063_v4 = vmax.f32 %v984_v58, 0.0  ;;  %v3142_v58 = vld [vmem:[#allocation14 + $0x38] sm:$0xff] }
 0x1ac   :  { %v759_v48 = vpop.f32.mrf.mxu1  ;;  %1945 = vmatpush.bf16.msrb.mxu2 %v3142_v58 }
 0x1ad   :  { %v760_v54 = vadd.f32 %v759_v48, %v591_v47 }
 0x1af   :  { %v3952_v60 = vadd.f32 %v3818_v10, %v760_v54 }
 0x1b0   :  { %v985_v61 = vpop.f32.mrf.mxu2 }
 0x1b1   :  { %v853_v1 = vmax.f32 %v3952_v60, 0.0  ;;  %v986_v2 = vadd.f32 %v3895_v12, %v985_v61 }
 0x1b3   :  { %v1064_v5 = vmax.f32 %v986_v2, 0.0  ;;  %v876_v6 = vpack.c.bf16 %v853_v1, %v852_v63  ;;  %v594_v7 = vpop.f32.mrf.mxu0 }
 0x1b4   :  { %v762_v8 = vpop.f32.mrf.mxu1 }
 0x1b5   :  { %1027 = vmatmul.bf16.gmra.mxu2 %v876_v6  ;;  %v1096_v9 = vpack.c.bf16 %v1064_v5, %v1063_v4  ;;  %v763_v13 = vadd.f32 %v762_v8, %v594_v7 }
 0x1b7   :  { %1211 = vmatmul.bf16.gmra.mxu3 %v1096_v9  ;;  %v3958_v31 = vadd.f32 %v3818_v10, %v763_v13 }
 0x1b8   :  { %v988_v11 = vpop.f32.mrf.mxu2 }
 0x1b9   :  { %v989_v33 = vadd.f32 %v3895_v12, %v988_v11  ;;  %v854_v36 = vmax.f32 %v3958_v31, 0.0  ;;  %v3130_v11 = vld [vmem:[#allocation13 + $0x58] sm:$0xff] }
 0x1ba   :  { %1682 = vmatpush.bf16.msrb.mxu1 %v3130_v11  ;;  %v3990_v11 = vld [vmem:[%s4616_s8] ss:$0 sm:$0xff] }
 0x1bb   :  { %v596_v21 = vpop.f32.mrf.mxu0  ;;  %v1065_v39 = vmax.f32 %v989_v33, 0.0 }
 0x1bc   :  { %v764_v25 = vpop.f32.mrf.mxu1 }
 0x1bd   :  { %v765_v32 = vadd.f32 %v764_v25, %v596_v21 }
 0x1bf   :  { %v3962_v34 = vadd.f32 %v3818_v10, %v765_v32 }
 0x1c0   :  { %v990_v35 = vpop.f32.mrf.mxu2 }
 0x1c1   :  { %v855_v37 = vmax.f32 %v3962_v34, 0.0  ;;  %v991_v38 = vadd.f32 %v3895_v12, %v990_v35 }
 0x1c3   :  { %v1066_v40 = vmax.f32 %v991_v38, 0.0  ;;  %v877_v42 = vpack.c.bf16 %v855_v37, %v854_v36  ;;  %v599_v43 = vpop.f32.mrf.mxu0 }
 0x1c4   :  { %v767_v45 = vpop.f32.mrf.mxu1 }
 0x1c5   :  { %1032 = vmatmul.bf16.gmra.mxu2 %v877_v42  ;;  %v1097_v47 = vpack.c.bf16 %v1066_v40, %v1065_v39  ;;  %v768_v54 = vadd.f32 %v767_v45, %v599_v43 }
 0x1c7   :  { %1216 = vmatmul.bf16.gmra.mxu3 %v1097_v47  ;;  %v3968_v1 = vadd.f32 %v3818_v10, %v768_v54 }
 0x1c8   :  { %v993_v48 = vpop.f32.mrf.mxu2 }
 0x1c9   :  { %v994_v4 = vadd.f32 %v3895_v12, %v993_v48  ;;  %v856_v7 = vmax.f32 %v3968_v1, 0.0 }
 0x1cb   :  { %v601_v61 = vpop.f32.mrf.mxu0  ;;  %v1067_v13 = vmax.f32 %v994_v4, 0.0 }
 0x1cc   :  { %v769_v63 = vpop.f32.mrf.mxu1 }
 0x1cd   :  { %v770_v2 = vadd.f32 %v769_v63, %v601_v61 }
 0x1cf   :  { %v3972_v5 = vadd.f32 %v3818_v10, %v770_v2 }
 0x1d0   :  { %v995_v6 = vpop.f32.mrf.mxu2 }
 0x1d1   :  { %v857_v8 = vmax.f32 %v3972_v5, 0.0  ;;  %v996_v9 = vadd.f32 %v3895_v12, %v995_v6 }
 0x1d3   :  { %v1068_v15 = vmax.f32 %v996_v9, 0.0  ;;  %v878_v21 = vpack.c.bf16 %v857_v8, %v856_v7  ;;  %v604_v25 = vpop.f32.mrf.mxu0 }
 0x1d4   :  { %v772_v32 = vpop.f32.mrf.mxu1 }
 0x1d5   :  { %1037 = vmatmul.bf16.gmra.mxu2 %v878_v21  ;;  %v1098_v33 = vpack.c.bf16 %v1068_v15, %v1067_v13  ;;  %v773_v36 = vadd.f32 %v772_v32, %v604_v25 }
 0x1d7   :  { %1221 = vmatmul.bf16.gmra.mxu3 %v1098_v33  ;;  %v3978_v39 = vadd.f32 %v3818_v10, %v773_v36 }
 0x1d8   :  { %v998_v35 = vpop.f32.mrf.mxu2 }
 0x1d9   :  { %v999_v42 = vadd.f32 %v3895_v12, %v998_v35  ;;  %v858_v47 = vmax.f32 %v3978_v39, 0.0 }
 0x1db   :  { %v606_v37 = vpop.f32.mrf.mxu0  ;;  %v1069_v58 = vmax.f32 %v999_v42, 0.0 }
 0x1dc   :  { %v774_v38 = vpop.f32.mrf.mxu1 }
 0x1dd   :  { %v775_v40 = vadd.f32 %v774_v38, %v606_v37  ;;  %v3141_v37 = vld [vmem:[#allocation14 + $0x30] sm:$0xff] }
 0x1de   :  { %1946 = vmatpush.bf16.msrb.mxu2 %v3141_v37 }
 0x1df   :  { %v3982_v43 = vadd.f32 %v3818_v10, %v775_v40 }
 0x1e0   :  { %v1000_v45 = vpop.f32.mrf.mxu2 }
 0x1e1   :  { %v859_v48 = vmax.f32 %v3982_v43, 0.0  ;;  %v1001_v54 = vadd.f32 %v3895_v12, %v1000_v45 }
 0x1e3   :  { %v1070_v61 = vmax.f32 %v1001_v54, 0.0  ;;  %v879_v63 = vpack.c.bf16 %v859_v48, %v858_v47  ;;  %v609_v2 = vpop.f32.mrf.mxu0 }
 0x1e4   :  { %v777_v4 = vpop.f32.mrf.mxu1 }
 0x1e5   :  { %1042 = vmatmul.bf16.gmra.mxu2 %v879_v63  ;;  %v1099_v6 = vpack.c.bf16 %v1070_v61, %v1069_v58  ;;  %v778_v8 = vadd.f32 %v777_v4, %v609_v2 }
 0x1e7   :  { %1226 = vmatmul.bf16.gmra.mxu3 %v1099_v6  ;;  %v3993_v21 = vadd.f32 %v3818_v10, %v778_v8 }
 0x1e8   :  { %v1003_v7 = vpop.f32.mrf.mxu2 }
 0x1e9   :  { %v1004_v32 = vadd.f32 %v3895_v12, %v1003_v7  ;;  %v860_v38 = vmax.f32 %v3993_v21, 0.0  ;;  %v3129_v7 = vld [vmem:[#allocation13 + $0x50] sm:$0xff] }
 0x1ea   :  { %v1187_v9 = vpop.f32.mrf.mxu3  ;;  %1683 = vmatpush.bf16.msrb.mxu1 %v3129_v7  ;;  %v3140_v7 = vld [vmem:[#allocation14 + $0x28] sm:$0xff] }
 0x1eb   :  { %v611_v13 = vpop.f32.mrf.mxu0  ;;  %v1188_v35 = vadd.f32 %v3990_v11, %v1187_v9  ;;  %v1071_v45 = vmax.f32 %v1004_v32, 0.0  ;;  %1947 = vmatpush.bf16.msrb.mxu2 %v3140_v7 }
 0x1ec   :  { %v779_v15 = vpop.f32.mrf.mxu1 }
 0x1ed   :  { %v780_v25 = vadd.f32 %v779_v15, %v611_v13  ;;  %v4004_v58 = vadd.f32 %v1188_v35, %v3821_v17 }
 0x1ef   :  { %v3997_v33 = vadd.f32 %v3818_v10, %v780_v25  ;;  %v1320_v2 = vmax.f32 %v4004_v58, 0.0 }
 0x1f0   :  { %v1005_v36 = vpop.f32.mrf.mxu2 }
 0x1f1   :  { %v861_v40 = vmax.f32 %v3997_v33, 0.0  ;;  %v1006_v42 = vadd.f32 %v3895_v12, %v1005_v36 }
 0x1f2   :  { %v1189_v48 = vpop.f32.mrf.mxu3 }
 0x1f3   :  { %v1072_v47 = vmax.f32 %v1006_v42, 0.0  ;;  %v880_v54 = vpack.c.bf16 %v861_v40, %v860_v38  ;;  %v1190_v10 = vadd.f32 %v3990_v11, %v1189_v48 }
 0x1f5   :  { %1047 = vmatmul.bf16.gmra.mxu2 %v880_v54  ;;  %v1100_v61 = vpack.c.bf16 %v1072_v47, %v1071_v45  ;;  %v4008_v63 = vadd.f32 %v1190_v10, %v3824_v20 }
 0x1f7   :  { %v1321_v4 = vmax.f32 %v4008_v63, 0.0  ;;  %1231 = vmatmul.bf16.gmra.mxu3 %v1100_v61 }
 0x1f8   :  { %v1008_v6 = vpop.f32.mrf.mxu2 }
 0x1f9   :  { %v1358_v8 = vpack.c.bf16 %v1321_v4, %v1320_v2  ;;  %v1009_v17 = vadd.f32 %v3895_v12, %v1008_v6 }
 0x1fa   :  { %v1192_v9 = vpop.f32.mrf.mxu3 }
 0x1fb   :  { %1455 = vmatmul.bf16.vlgmr.msrb.gmra.mxu0 %v1358_v8  ;;  %v1193_v13 = vadd.f32 %v3990_v11, %v1192_v9  ;;  %v1073_v20 = vmax.f32 %v1009_v17, 0.0 }
 0x1fd   :  { %v4016_v36 = vadd.f32 %v1193_v13, %v3829_v41 }
 0x1ff   :  { %v1322_v42 = vmax.f32 %v4016_v36, 0.0 }
 0x200   :  { %v1010_v15 = vpop.f32.mrf.mxu2 }
 0x201   :  { %v1011_v25 = vadd.f32 %v3895_v12, %v1010_v15 }
 0x202   :  { %v1194_v35 = vpop.f32.mrf.mxu3 }
 0x203   :  { %v1074_v32 = vmax.f32 %v1011_v25, 0.0  ;;  %v1195_v37 = vadd.f32 %v3990_v11, %v1194_v35 }
 0x205   :  { %v1101_v38 = vpack.c.bf16 %v1074_v32, %v1073_v20  ;;  %v4020_v40 = vadd.f32 %v1195_v37, %v3832_v44 }
 0x207   :  { %v1323_v45 = vmax.f32 %v4020_v40, 0.0  ;;  %1236 = vmatmul.bf16.gmra.mxu3 %v1101_v38 }
 0x208   :  { %v1013_v47 = vpop.f32.mrf.mxu2 }
 0x209   :  { %v1359_v48 = vpack.c.bf16 %v1323_v45, %v1322_v42  ;;  %v1014_v10 = vadd.f32 %v3895_v12, %v1013_v47  ;;  %v3128_v42 = vld [vmem:[#allocation13 + $0x48] sm:$0xff] }
 0x20a   :  { %v1197_v54 = vpop.f32.mrf.mxu3  ;;  %1684 = vmatpush.bf16.msrb.mxu1 %v3128_v42 }
 0x20b   :  { %1460 = vmatmul.bf16.gmra.mxu0 %v1359_v48  ;;  %v1198_v41 = vadd.f32 %v3990_v11, %v1197_v54  ;;  %v1075_v4 = vmax.f32 %v1014_v10, 0.0 }
 0x20d   :  { %v4028_v8 = vadd.f32 %v1198_v41, %v3837_v0 }
 0x20f   :  { %v1324_v15 = vmax.f32 %v4028_v8, 0.0 }
 0x210   :  { %v1015_v61 = vpop.f32.mrf.mxu2 }
 0x211   :  { %v1016_v2 = vadd.f32 %v3895_v12, %v1015_v61 }
 0x212   :  { %v1199_v44 = vpop.f32.mrf.mxu3 }
 0x213   :  { %v1076_v6 = vmax.f32 %v1016_v2, 0.0  ;;  %v1200_v9 = vadd.f32 %v3990_v11, %v1199_v44 }
 0x215   :  { %v1102_v17 = vpack.c.bf16 %v1076_v6, %v1075_v4  ;;  %v4032_v13 = vadd.f32 %v1200_v9, %v3840_v3 }
 0x217   :  { %v1325_v25 = vmax.f32 %v4032_v13, 0.0  ;;  %1241 = vmatmul.bf16.gmra.mxu3 %v1102_v17 }
 0x218   :  { %v1018_v20 = vpop.f32.mrf.mxu2 }
 0x219   :  { %v1360_v32 = vpack.c.bf16 %v1325_v25, %v1324_v15  ;;  %v1019_v37 = vadd.f32 %v3895_v12, %v1018_v20 }
 0x21a   :  { %v1202_v35 = vpop.f32.mrf.mxu3 }
 0x21b   :  { %1465 = vmatmul.bf16.gmra.mxu0 %v1360_v32  ;;  %v1203_v0 = vadd.f32 %v3990_v11, %v1202_v35  ;;  %v1077_v3 = vmax.f32 %v1019_v37, 0.0 }
 0x21d   :  { %v4040_v54 = vadd.f32 %v1203_v0, %v3845_v27 }
 0x21f   :  { %v1326_v2 = vmax.f32 %v4040_v54, 0.0 }
 0x220   :  { %v1020_v38 = vpop.f32.mrf.mxu2 }
 0x221   :  { %v1021_v45 = vadd.f32 %v3895_v12, %v1020_v38 }
 0x222   :  { %v1204_v48 = vpop.f32.mrf.mxu3 }
 0x223   :  { %v1078_v47 = vmax.f32 %v1021_v45, 0.0  ;;  %v1205_v10 = vadd.f32 %v3990_v11, %v1204_v48 }
 0x225   :  { %v1103_v41 = vpack.c.bf16 %v1078_v47, %v1077_v3  ;;  %v4044_v61 = vadd.f32 %v1205_v10, %v3848_v30  ;;  %v3139_v3 = vld [vmem:[#allocation14 + $0x20] sm:$0xff] }
 0x226   :  { %1948 = vmatpush.bf16.msrb.mxu2 %v3139_v3 }
 0x227   :  { %v1327_v4 = vmax.f32 %v4044_v61, 0.0  ;;  %1246 = vmatmul.bf16.gmra.mxu3 %v1103_v41 }
 0x228   :  { %v1023_v6 = vpop.f32.mrf.mxu2 }
 0x229   :  { %v1361_v44 = vpack.c.bf16 %v1327_v4, %v1326_v2  ;;  %v1024_v9 = vadd.f32 %v3895_v12, %v1023_v6 }
 0x22a   :  { %v1207_v7 = vpop.f32.mrf.mxu3 }
 0x22b   :  { %1470 = vmatmul.bf16.gmra.mxu0 %v1361_v44  ;;  %v1208_v27 = vadd.f32 %v3990_v11, %v1207_v7  ;;  %v1079_v25 = vmax.f32 %v1024_v9, 0.0  ;;  %v3127_v44 = vld [vmem:[#allocation13 + $0x40] sm:$0xff] }
 0x22c   :  { %1685 = vmatpush.bf16.msrb.mxu1 %v3127_v44 }
 0x22d   :  { %v4052_v32 = vadd.f32 %v1208_v27, %v3853_v52 }
 0x22f   :  { %v1328_v38 = vmax.f32 %v4052_v32, 0.0 }
 0x230   :  { %v1025_v17 = vpop.f32.mrf.mxu2 }
 0x231   :  { %v1026_v15 = vadd.f32 %v3895_v12, %v1025_v17 }
 0x232   :  { %v1209_v30 = vpop.f32.mrf.mxu3 }
 0x233   :  { %v1080_v20 = vmax.f32 %v1026_v15, 0.0  ;;  %v1210_v35 = vadd.f32 %v3990_v11, %v1209_v30 }
 0x235   :  { %v1104_v37 = vpack.c.bf16 %v1080_v20, %v1079_v25  ;;  %v4056_v0 = vadd.f32 %v1210_v35, %v3856_v55 }
 0x237   :  { %v1329_v42 = vmax.f32 %v4056_v0, 0.0  ;;  %1251 = vmatmul.bf16.gmra.mxu3 %v1104_v37 }
 0x238   :  { %v1028_v45 = vpop.f32.mrf.mxu2 }
 0x239   :  { %v1362_v47 = vpack.c.bf16 %v1329_v42, %v1328_v38  ;;  %v1029_v52 = vadd.f32 %v3895_v12, %v1028_v45 }
 0x23a   :  { %v1212_v48 = vpop.f32.mrf.mxu3 }
 0x23b   :  { %1475 = vmatmul.bf16.gmra.mxu0 %v1362_v47  ;;  %v1213_v10 = vadd.f32 %v3990_v11, %v1212_v48  ;;  %v1081_v55 = vmax.f32 %v1029_v52, 0.0 }
 0x23d   :  { %v4064_v7 = vadd.f32 %v1213_v10, %v3861_v14 }
 0x23f   :  { %v1330_v15 = vmax.f32 %v4064_v7, 0.0 }
 0x240   :  { %v1030_v41 = vpop.f32.mrf.mxu2 }
 0x241   :  { %v1031_v2 = vadd.f32 %v3895_v12, %v1030_v41 }
 0x242   :  { %v1214_v6 = vpop.f32.mrf.mxu3 }
 0x243   :  { %v1082_v4 = vmax.f32 %v1031_v2, 0.0  ;;  %v1215_v9 = vadd.f32 %v3990_v11, %v1214_v6 }
 0x245   :  { %v1105_v27 = vpack.c.bf16 %v1082_v4, %v1081_v55  ;;  %v4068_v17 = vadd.f32 %v1215_v9, %v3864_v18  ;;  %v3150_v4 = vld [vmem:[#allocation16 + $0x38] sm:$0xff] }
 0x246   :  { %2208 = vmatpush.bf16.msrb.mxu3 %v3150_v4 }
 0x247   :  { %v1331_v25 = vmax.f32 %v4068_v17, 0.0  ;;  %1256 = vmatmul.bf16.gmra.mxu3 %v1105_v27 }
 0x248   :  { %v1033_v20 = vpop.f32.mrf.mxu2 }
 0x249   :  { %v1363_v30 = vpack.c.bf16 %v1331_v25, %v1330_v15  ;;  %v1034_v37 = vadd.f32 %v3895_v12, %v1033_v20  ;;  %v3138_v15 = vld [vmem:[#allocation14 + $0x18] sm:$0xff] }
 0x24a   :  { %v1217_v35 = vpop.f32.mrf.mxu3  ;;  %1949 = vmatpush.bf16.msrb.mxu2 %v3138_v15 }
 0x24b   :  { %1480 = vmatmul.bf16.gmra.mxu0 %v1363_v30  ;;  %v1218_v14 = vadd.f32 %v3990_v11, %v1217_v35  ;;  %v1083_v45 = vmax.f32 %v1034_v37, 0.0 }
 0x24d   :  { %v4076_v47 = vadd.f32 %v1218_v14, %v3869_v46 }
 0x24f   :  { %v1332_v41 = vmax.f32 %v4076_v47, 0.0 }
 0x250   :  { %v1035_v38 = vpop.f32.mrf.mxu2 }
 0x251   :  { %v1036_v42 = vadd.f32 %v3895_v12, %v1035_v38 }
 0x252   :  { %v1219_v18 = vpop.f32.mrf.mxu3 }
 0x253   :  { %v1084_v3 = vmax.f32 %v1036_v42, 0.0  ;;  %v1220_v48 = vadd.f32 %v3990_v11, %v1219_v18 }
 0x255   :  { %v1106_v52 = vpack.c.bf16 %v1084_v3, %v1083_v45  ;;  %v4080_v10 = vadd.f32 %v1220_v48, %v3872_v50 }
 0x257   :  { %v1333_v2 = vmax.f32 %v4080_v10, 0.0  ;;  %1261 = vmatmul.bf16.gmra.mxu3 %v1106_v52 }
 0x258   :  { %v1038_v55 = vpop.f32.mrf.mxu2 }
 0x259   :  { %v1364_v6 = vpack.c.bf16 %v1333_v2, %v1332_v41  ;;  %v1039_v46 = vadd.f32 %v3895_v12, %v1038_v55 }
 0x25a   :  { %v1222_v44 = vpop.f32.mrf.mxu3 }
 0x25b   :  { %1485 = vmatmul.bf16.gmra.mxu0 %v1364_v6  ;;  %v1223_v9 = vadd.f32 %v3990_v11, %v1222_v44  ;;  %v1085_v25 = vmax.f32 %v1039_v46, 0.0 }
 0x25d   :  { %v4088_v35 = vadd.f32 %v1223_v9, %v3877_v16 }
 0x25f   :  { %v1334_v42 = vmax.f32 %v4088_v35, 0.0 }
 0x260   :  { %v1040_v27 = vpop.f32.mrf.mxu2 }
 0x261   :  { %v1041_v50 = vadd.f32 %v3895_v12, %v1040_v27 }
 0x262   :  { %v1224_v30 = vpop.f32.mrf.mxu3 }
 0x263   :  { %v1086_v20 = vmax.f32 %v1041_v50, 0.0  ;;  %v1225_v37 = vadd.f32 %v3990_v11, %v1224_v30 }
 0x265   :  { %v1107_v14 = vpack.c.bf16 %v1086_v20, %v1085_v25  ;;  %v4092_v38 = vadd.f32 %v1225_v37, %v3880_v23 }
 0x267   :  { %v1335_v45 = vmax.f32 %v4092_v38, 0.0  ;;  %1266 = vmatmul.bf16.gmra.mxu3 %v1107_v14 }
 0x268   :  { %v1043_v3 = vpop.f32.mrf.mxu2 }
 0x269   :  { %v1365_v18 = vpack.c.bf16 %v1335_v45, %v1334_v42  ;;  %v1044_v52 = vadd.f32 %v3895_v12, %v1043_v3  ;;  %v3149_v45 = vld [vmem:[#allocation16 + $0x30] sm:$0xff] }
 0x26a   :  { %v1227_v48 = vpop.f32.mrf.mxu3  ;;  %2209 = vmatpush.bf16.msrb.mxu3 %v3149_v45 }
 0x26b   :  { %1490 = vmatmul.bf16.gmra.mxu0 %v1365_v18  ;;  %v1228_v16 = vadd.f32 %v3990_v11, %v1227_v48  ;;  %v1087_v55 = vmax.f32 %v1044_v52, 0.0 }
 0x26d   :  { %v4100_v6 = vadd.f32 %v1228_v16, %v3885_v51  ;;  %v4111_v51 = vld [vmem:[%s4614_s6 + $0x1] ss:$0 sm:$0xff] }
 0x26f   :  { %v1336_v27 = vmax.f32 %v4100_v6, 0.0 }
 0x270   :  { %v1045_v41 = vpop.f32.mrf.mxu2 }
 0x271   :  { %v1046_v2 = vadd.f32 %v3895_v12, %v1045_v41 }
 0x272   :  { %v1229_v23 = vpop.f32.mrf.mxu3 }
 0x273   :  { %v1088_v4 = vmax.f32 %v1046_v2, 0.0  ;;  %v1230_v44 = vadd.f32 %v3990_v11, %v1229_v23 }
 0x275   :  { %v1108_v46 = vpack.c.bf16 %v1088_v4, %v1087_v55  ;;  %v4104_v9 = vadd.f32 %v1230_v44, %v3888_v56 }
 0x277   :  { %v1337_v15 = vmax.f32 %v4104_v9, 0.0  ;;  %1271 = vmatmul.bf16.gmra.mxu3 %v1108_v46 }
 0x278   :  { %v1048_v50 = vpop.f32.mrf.mxu2  ;;  %v1456_v25 = vpop.f32.mrf.mxu0 }
 0x279   :  { %v1366_v20 = vpack.c.bf16 %v1337_v15, %v1336_v27  ;;  %v1049_v37 = vadd.f32 %v3895_v12, %v1048_v50  ;;  %v1457_v56 = vadd.f32 %v4111_v51, %v1456_v25  ;;  %v3137_v50 = vld [vmem:[#allocation14 + $0x10] sm:$0xff] }
 0x27a   :  { %v1232_v30 = vpop.f32.mrf.mxu3  ;;  %1950 = vmatpush.bf16.msrb.mxu2 %v3137_v50 }
 0x27b   :  { %1495 = vmatmul.bf16.gmra.mxu0 %v1366_v20  ;;  %v1233_v14 = vadd.f32 %v3990_v11, %v1232_v30  ;;  %v1089_v52 = vmax.f32 %v1049_v37, 0.0  ;;  %v1551_v2 = vmax.f32 %v1457_v56, 0.0 }
 0x27d   :  { %v4119_v55 = vadd.f32 %v1233_v14, %v3898_v22 }
 0x280   :  { %v1050_v42 = vpop.f32.mrf.mxu2  ;;  %v1458_v18 = vpop.f32.mrf.mxu0 }
 0x281   :  { %v1051_v3 = vadd.f32 %v3895_v12, %v1050_v42  ;;  %v1459_v48 = vadd.f32 %v4111_v51, %v1458_v18  ;;  %v1338_v12 = vmax.f32 %v4119_v55, 0.0 }
 0x282   :  { %v1234_v41 = vpop.f32.mrf.mxu3 }
 0x283   :  { %v1090_v16 = vmax.f32 %v1051_v3, 0.0  ;;  %v1552_v4 = vmax.f32 %v1459_v48, 0.0  ;;  %v1235_v23 = vadd.f32 %v3990_v11, %v1234_v41 }
 0x285   :  { %v1109_v44 = vpack.c.bf16 %v1090_v16, %v1089_v52  ;;  %v1589_v46 = vpack.c.bf16 %v1552_v4, %v1551_v2  ;;  %v4123_v27 = vadd.f32 %v1235_v23, %v3902_v29 }
 0x287   :  { %v1339_v15 = vmax.f32 %v4123_v27, 0.0  ;;  %1276 = vmatmul.bf16.gmra.mxu3 %v1109_v44  ;;  %1686 = vmatmul.bf16.vlgmr.msrb.gmra.mxu1 %v1589_v46 }
 0x288   :  { %v1461_v25 = vpop.f32.mrf.mxu0 }
 0x289   :  { %v1367_v20 = vpack.c.bf16 %v1339_v15, %v1338_v12  ;;  %v1462_v30 = vadd.f32 %v4111_v51, %v1461_v25 }
 0x28a   :  { %v1237_v22 = vpop.f32.mrf.mxu3 }
 0x28b   :  { %1500 = vmatmul.bf16.gmra.mxu0 %v1367_v20  ;;  %v1238_v37 = vadd.f32 %v3990_v11, %v1237_v22  ;;  %v1553_v42 = vmax.f32 %v1462_v30, 0.0 }
 0x28d   :  { %v4131_v45 = vadd.f32 %v1238_v37, %v3908_v59 }
 0x28f   :  { %v1340_v16 = vmax.f32 %v4131_v45, 0.0 }
 0x290   :  { %v1463_v56 = vpop.f32.mrf.mxu0 }
 0x291   :  { %v1464_v29 = vadd.f32 %v4111_v51, %v1463_v56 }
 0x292   :  { %v1239_v14 = vpop.f32.mrf.mxu3 }
 0x293   :  { %v1554_v3 = vmax.f32 %v1464_v29, 0.0  ;;  %v1240_v18 = vadd.f32 %v3990_v11, %v1239_v14  ;;  %v3148_v29 = vld [vmem:[#allocation16 + $0x28] sm:$0xff] }
 0x294   :  { %2210 = vmatpush.bf16.msrb.mxu3 %v3148_v29 }
 0x295   :  { %v4135_v48 = vadd.f32 %v1240_v18, %v3912_v62  ;;  %v1590_v52 = vpack.c.bf16 %v1554_v3, %v1553_v42 }
 0x297   :  { %v1341_v41 = vmax.f32 %v4135_v48, 0.0  ;;  %1691 = vmatmul.bf16.gmra.mxu1 %v1590_v52 }
 0x298   :  { %v1466_v2 = vpop.f32.mrf.mxu0 }
 0x299   :  { %v1368_v4 = vpack.c.bf16 %v1341_v41, %v1340_v16  ;;  %v1467_v44 = vadd.f32 %v4111_v51, %v1466_v2 }
 0x29a   :  { %v1242_v23 = vpop.f32.mrf.mxu3 }
 0x29b   :  { %1505 = vmatmul.bf16.gmra.mxu0 %v1368_v4  ;;  %v1243_v59 = vadd.f32 %v3990_v11, %v1242_v23  ;;  %v1555_v62 = vmax.f32 %v1467_v44, 0.0 }
 0x29d   :  { %v4143_v50 = vadd.f32 %v1243_v59, %v3918_v24  ;;  %v3136_v24 = vld [vmem:[#allocation14 + $0x8] sm:$0xff] }
 0x29e   :  { %1951 = vmatpush.bf16.msrb.mxu2 %v3136_v24 }
 0x29f   :  { %v1342_v37 = vmax.f32 %v4143_v50, 0.0 }
 0x2a0   :  { %v1468_v46 = vpop.f32.mrf.mxu0 }
 0x2a1   :  { %v1469_v12 = vadd.f32 %v4111_v51, %v1468_v46 }
 0x2a2   :  { %v1244_v15 = vpop.f32.mrf.mxu3 }
 0x2a3   :  { %v1556_v25 = vmax.f32 %v1469_v12, 0.0  ;;  %v1245_v20 = vadd.f32 %v3990_v11, %v1244_v15 }
 0x2a5   :  { %v4147_v22 = vadd.f32 %v1245_v20, %v3922_v28  ;;  %v1591_v30 = vpack.c.bf16 %v1556_v25, %v1555_v62 }
 0x2a7   :  { %v1343_v56 = vmax.f32 %v4147_v22, 0.0  ;;  %1696 = vmatmul.bf16.gmra.mxu1 %v1591_v30 }
 0x2a8   :  { %v1471_v14 = vpop.f32.mrf.mxu0 }
 0x2a9   :  { %v1369_v42 = vpack.c.bf16 %v1343_v56, %v1342_v37  ;;  %v1472_v18 = vadd.f32 %v4111_v51, %v1471_v14 }
 0x2aa   :  { %v1247_v3 = vpop.f32.mrf.mxu3 }
 0x2ab   :  { %1510 = vmatmul.bf16.gmra.mxu0 %v1369_v42  ;;  %v1248_v52 = vadd.f32 %v3990_v11, %v1247_v3  ;;  %v1557_v2 = vmax.f32 %v1472_v18, 0.0 }
 0x2ad   :  { %v4155_v4 = vadd.f32 %v1248_v52, %v3928_v49 }
 0x2af   :  { %v1344_v12 = vmax.f32 %v4155_v4, 0.0 }
 0x2b0   :  { %v1473_v28 = vpop.f32.mrf.mxu0 }
 0x2b1   :  { %v1474_v16 = vadd.f32 %v4111_v51, %v1473_v28 }
 0x2b2   :  { %v1249_v41 = vpop.f32.mrf.mxu3 }
 0x2b3   :  { %v1558_v23 = vmax.f32 %v1474_v16, 0.0  ;;  %v1250_v44 = vadd.f32 %v3990_v11, %v1249_v41 }
 0x2b5   :  { %v4159_v59 = vadd.f32 %v1250_v44, %v3932_v57  ;;  %v1592_v46 = vpack.c.bf16 %v1558_v23, %v1557_v2  ;;  %v3147_v23 = vld [vmem:[#allocation16 + $0x20] sm:$0xff] }
 0x2b6   :  { %2211 = vmatpush.bf16.msrb.mxu3 %v3147_v23 }
 0x2b7   :  { %v1345_v15 = vmax.f32 %v4159_v59, 0.0  ;;  %1701 = vmatmul.bf16.gmra.mxu1 %v1592_v46  ;;  %v3135_v46 = vld [vmem:[#allocation14] sm:$0xff] }
 0x2b8   :  { %v1476_v62 = vpop.f32.mrf.mxu0  ;;  %1952 = vmatpush.bf16.msrb.mxu2 %v3135_v46 }
 0x2b9   :  { %v1370_v25 = vpack.c.bf16 %v1345_v15, %v1344_v12  ;;  %v1477_v30 = vadd.f32 %v4111_v51, %v1476_v62 }
 0x2ba   :  { %v1252_v20 = vpop.f32.mrf.mxu3 }
 0x2bb   :  { %1515 = vmatmul.bf16.gmra.mxu0 %v1370_v25  ;;  %v1253_v49 = vadd.f32 %v3990_v11, %v1252_v20  ;;  %v1559_v57 = vmax.f32 %v1477_v30, 0.0 }
 0x2bd   :  { %v4167_v14 = vadd.f32 %v1253_v49, %v3938_v19 }
 0x2bf   :  { %v1346_v52 = vmax.f32 %v4167_v14, 0.0 }
 0x2c0   :  { %v1478_v37 = vpop.f32.mrf.mxu0 }
 0x2c1   :  { %v1479_v56 = vadd.f32 %v4111_v51, %v1478_v37 }
 0x2c2   :  { %v1254_v29 = vpop.f32.mrf.mxu3 }
 0x2c3   :  { %v1560_v42 = vmax.f32 %v1479_v56, 0.0  ;;  %v1255_v3 = vadd.f32 %v3990_v11, %v1254_v29 }
 0x2c5   :  { %v4171_v24 = vadd.f32 %v1255_v3, %v3942_v26  ;;  %v1593_v18 = vpack.c.bf16 %v1560_v42, %v1559_v57 }
 0x2c7   :  { %v1347_v28 = vmax.f32 %v4171_v24, 0.0  ;;  %1706 = vmatmul.bf16.gmra.mxu1 %v1593_v18 }
 0x2c8   :  { %v1481_v16 = vpop.f32.mrf.mxu0 }
 0x2c9   :  { %v1371_v41 = vpack.c.bf16 %v1347_v28, %v1346_v52  ;;  %v1482_v19 = vadd.f32 %v4111_v51, %v1481_v16 }
 0x2ca   :  { %v1257_v2 = vpop.f32.mrf.mxu3 }
 0x2cb   :  { %1520 = vmatmul.bf16.gmra.mxu0 %v1371_v41  ;;  %v1258_v44 = vadd.f32 %v3990_v11, %v1257_v2  ;;  %v1561_v62 = vmax.f32 %v1482_v19, 0.0 }
 0x2cd   :  { %v4179_v25 = vadd.f32 %v1258_v44, %v3948_v53 }
 0x2cf   :  { %v1348_v56 = vmax.f32 %v4179_v25, 0.0 }
 0x2d0   :  { %v1483_v12 = vpop.f32.mrf.mxu0 }
 0x2d1   :  { %v1484_v26 = vadd.f32 %v4111_v51, %v1483_v12 }
 0x2d2   :  { %v1259_v15 = vpop.f32.mrf.mxu3 }
 0x2d3   :  { %v1562_v20 = vmax.f32 %v1484_v26, 0.0  ;;  %v1260_v30 = vadd.f32 %v3990_v11, %v1259_v15 }
 0x2d5   :  { %v4183_v49 = vadd.f32 %v1260_v30, %v3952_v60  ;;  %v1594_v37 = vpack.c.bf16 %v1562_v20, %v1561_v62 }
 0x2d7   :  { %v1349_v29 = vmax.f32 %v4183_v49, 0.0  ;;  %1711 = vmatmul.bf16.gmra.mxu1 %v1594_v37 }
 0x2d8   :  { %v1486_v57 = vpop.f32.mrf.mxu0 }
 0x2d9   :  { %v1372_v42 = vpack.c.bf16 %v1349_v29, %v1348_v56  ;;  %v1487_v18 = vadd.f32 %v4111_v51, %v1486_v57 }
 0x2da   :  { %v1262_v3 = vpop.f32.mrf.mxu3 }
 0x2db   :  { %1525 = vmatmul.bf16.gmra.mxu0 %v1372_v42  ;;  %v1263_v53 = vadd.f32 %v3990_v11, %v1262_v3  ;;  %v1563_v60 = vmax.f32 %v1487_v18, 0.0  ;;  %v3146_v3 = vld [vmem:[#allocation16 + $0x18] sm:$0xff] }
 0x2dc   :  { %2212 = vmatpush.bf16.msrb.mxu3 %v3146_v3 }
 0x2dd   :  { %v4191_v41 = vadd.f32 %v1263_v53, %v3958_v31 }
 0x2df   :  { %v1350_v46 = vmax.f32 %v4191_v41, 0.0 }
 0x2e0   :  { %v1488_v52 = vpop.f32.mrf.mxu0 }
 0x2e1   :  { %v1489_v28 = vadd.f32 %v4111_v51, %v1488_v52 }
 0x2e2   :  { %v1264_v16 = vpop.f32.mrf.mxu3 }
 0x2e3   :  { %v1564_v2 = vmax.f32 %v1489_v28, 0.0  ;;  %v1265_v23 = vadd.f32 %v3990_v11, %v1264_v16 }
 0x2e5   :  { %v4195_v19 = vadd.f32 %v1265_v23, %v3962_v34  ;;  %v1595_v44 = vpack.c.bf16 %v1564_v2, %v1563_v60 }
 0x2e7   :  { %v1351_v12 = vmax.f32 %v4195_v19, 0.0  ;;  %1716 = vmatmul.bf16.gmra.mxu1 %v1595_v44 }
 0x2e8   :  { %v1491_v26 = vpop.f32.mrf.mxu0 }
 0x2e9   :  { %v1373_v15 = vpack.c.bf16 %v1351_v12, %v1350_v46  ;;  %v1492_v20 = vadd.f32 %v4111_v51, %v1491_v26 }
 0x2ea   :  { %v1267_v62 = vpop.f32.mrf.mxu3 }
 0x2eb   :  { %1530 = vmatmul.bf16.gmra.mxu0 %v1373_v15  ;;  %v1268_v31 = vadd.f32 %v3990_v11, %v1267_v62  ;;  %v1565_v34 = vmax.f32 %v1492_v20, 0.0 }
 0x2ed   :  { %v4203_v29 = vadd.f32 %v1268_v31, %v3968_v1 }
 0x2ef   :  { %v1352_v52 = vmax.f32 %v4203_v29, 0.0 }
 0x2f0   :  { %v1493_v30 = vpop.f32.mrf.mxu0 }
 0x2f1   :  { %v1494_v37 = vadd.f32 %v4111_v51, %v1493_v30 }
 0x2f2   :  { %v1269_v56 = vpop.f32.mrf.mxu3 }
 0x2f3   :  { %v1566_v57 = vmax.f32 %v1494_v37, 0.0  ;;  %v1270_v42 = vadd.f32 %v3990_v11, %v1269_v56  ;;  %v4224_v37 = vld [vmem:[%s4616_s8 + $0x1] ss:$0 sm:$0xff] }
 0x2f5   :  { %v1596_v18 = vpack.c.bf16 %v1566_v57, %v1565_v34  ;;  %v4207_v53 = vadd.f32 %v1270_v42, %v3972_v5 }
 0x2f7   :  { %v1353_v28 = vmax.f32 %v4207_v53, 0.0  ;;  %1721 = vmatmul.bf16.gmra.mxu1 %v1596_v18 }
 0x2f8   :  { %v1496_v16 = vpop.f32.mrf.mxu0 }
 0x2f9   :  { %v1374_v60 = vpack.c.bf16 %v1353_v28, %v1352_v52  ;;  %v1497_v1 = vadd.f32 %v4111_v51, %v1496_v16 }
 0x2fa   :  { %v1272_v2 = vpop.f32.mrf.mxu3 }
 0x2fb   :  { %1535 = vmatmul.bf16.gmra.mxu0 %v1374_v60  ;;  %v1273_v23 = vadd.f32 %v3990_v11, %v1272_v2  ;;  %v1567_v5 = vmax.f32 %v1497_v1, 0.0 }
 0x2fd   :  { %v4215_v26 = vadd.f32 %v1273_v23, %v3978_v39 }
 0x2ff   :  { %v1354_v56 = vmax.f32 %v4215_v26, 0.0 }
 0x300   :  { %v1498_v44 = vpop.f32.mrf.mxu0 }
 0x301   :  { %v1499_v46 = vadd.f32 %v4111_v51, %v1498_v44 }
 0x302   :  { %v1274_v12 = vpop.f32.mrf.mxu3 }
 0x303   :  { %v1568_v15 = vmax.f32 %v1499_v46, 0.0  ;;  %v1275_v62 = vadd.f32 %v3990_v11, %v1274_v12 }
 0x304   :  { %v1687_v20 = vpop.f32.mrf.mxu1 }
 0x305   :  { %v1597_v31 = vpack.c.bf16 %v1568_v15, %v1567_v5  ;;  %v4219_v30 = vadd.f32 %v1275_v62, %v3982_v43  ;;  %v1688_v57 = vadd.f32 %v4224_v37, %v1687_v20 }
 0x307   :  { %v1355_v34 = vmax.f32 %v4219_v30, 0.0  ;;  %1726 = vmatmul.bf16.gmra.mxu1 %v1597_v31  ;;  %v1782_v43 = vadd.f32 %v1688_v57, %v4004_v58 }
 0x308   :  { %v1501_v39 = vpop.f32.mrf.mxu0 }
 0x309   :  { %v1375_v42 = vpack.c.bf16 %v1355_v34, %v1354_v56  ;;  %v1502_v28 = vadd.f32 %v4111_v51, %v1501_v39  ;;  %v1820_v1 = vmax.f32 %v1782_v43, 0.0 }
 0x30a   :  { %v1277_v3 = vpop.f32.mrf.mxu3 }
 0x30b   :  { %1540 = vmatmul.bf16.gmra.mxu0 %v1375_v42  ;;  %v1278_v16 = vadd.f32 %v3990_v11, %v1277_v3  ;;  %v1569_v46 = vmax.f32 %v1502_v28, 0.0  ;;  %v3145_v42 = vld [vmem:[#allocation16 + $0x10] sm:$0xff] }
 0x30c   :  { %v1689_v18 = vpop.f32.mrf.mxu1  ;;  %2213 = vmatpush.bf16.msrb.mxu3 %v3145_v42 }
 0x30d   :  { %v1690_v52 = vadd.f32 %v4224_v37, %v1689_v18  ;;  %v4236_v5 = vadd.f32 %v1278_v16, %v3993_v21 }
 0x30f   :  { %v1783_v60 = vadd.f32 %v1690_v52, %v4008_v63  ;;  %v1356_v63 = vmax.f32 %v4236_v5, 0.0 }
 0x310   :  { %v1503_v2 = vpop.f32.mrf.mxu0 }
 0x311   :  { %v1821_v23 = vmax.f32 %v1783_v60, 0.0  ;;  %v1504_v44 = vadd.f32 %v4111_v51, %v1503_v2 }
 0x312   :  { %v1279_v12 = vpop.f32.mrf.mxu3 }
 0x313   :  { %v1858_v15 = vpack.c.bf16 %v1821_v23, %v1820_v1  ;;  %v1570_v58 = vmax.f32 %v1504_v44, 0.0  ;;  %v1280_v62 = vadd.f32 %v3990_v11, %v1279_v12 }
 0x314   :  { %v1692_v20 = vpop.f32.mrf.mxu1 }
 0x315   :  { %v1598_v31 = vpack.c.bf16 %v1570_v58, %v1569_v46  ;;  %v4240_v56 = vadd.f32 %v1280_v62, %v3997_v33  ;;  %1953 = vmatmul.bf16.vlgmr.msrb.gmra.mxu2 %v1858_v15  ;;  %v1693_v57 = vadd.f32 %v4224_v37, %v1692_v20 }
 0x317   :  { %v1357_v34 = vmax.f32 %v4240_v56, 0.0  ;;  %1731 = vmatmul.bf16.gmra.mxu1 %v1598_v31  ;;  %v1784_v11 = vadd.f32 %v1693_v57, %v4016_v36 }
 0x318   :  { %v1506_v39 = vpop.f32.mrf.mxu0 }
 0x319   :  { %v1376_v21 = vpack.c.bf16 %v1357_v34, %v1356_v63  ;;  %v1507_v33 = vadd.f32 %v4111_v51, %v1506_v39  ;;  %v1822_v28 = vmax.f32 %v1784_v11, 0.0 }
 0x31b   :  { %1545 = vmatmul.bf16.gmra.mxu0 %v1376_v21  ;;  %v1571_v2 = vmax.f32 %v1507_v33, 0.0  ;;  %v3144_v33 = vld [vmem:[#allocation16 + $0x8] sm:$0xff] }
 0x31c   :  { %v1694_v3 = vpop.f32.mrf.mxu1  ;;  %2214 = vmatpush.bf16.msrb.mxu3 %v3144_v33 }
 0x31d   :  { %v1695_v18 = vadd.f32 %v4224_v37, %v1694_v3 }
 0x31f   :  { %v1785_v43 = vadd.f32 %v1695_v18, %v4020_v40 }
 0x320   :  { %v1508_v52 = vpop.f32.mrf.mxu0 }
 0x321   :  { %v1823_v16 = vmax.f32 %v1785_v43, 0.0  ;;  %v1509_v60 = vadd.f32 %v4111_v51, %v1508_v52 }
 0x323   :  { %v1572_v1 = vmax.f32 %v1509_v60, 0.0  ;;  %v1859_v23 = vpack.c.bf16 %v1823_v16, %v1822_v28 }
 0x324   :  { %v1697_v44 = vpop.f32.mrf.mxu1 }
 0x325   :  { %v1599_v46 = vpack.c.bf16 %v1572_v1, %v1571_v2  ;;  %1958 = vmatmul.bf16.gmra.mxu2 %v1859_v23  ;;  %v1698_v36 = vadd.f32 %v4224_v37, %v1697_v44 }
 0x327   :  { %1736 = vmatmul.bf16.gmra.mxu1 %v1599_v46  ;;  %v1786_v58 = vadd.f32 %v1698_v36, %v4028_v8 }
 0x328   :  { %v1511_v12 = vpop.f32.mrf.mxu0 }
 0x329   :  { %v1512_v62 = vadd.f32 %v4111_v51, %v1511_v12  ;;  %v1824_v63 = vmax.f32 %v1786_v58, 0.0 }
 0x32b   :  { %v1573_v57 = vmax.f32 %v1512_v62, 0.0 }
 0x32c   :  { %v1699_v15 = vpop.f32.mrf.mxu1 }
 0x32d   :  { %v1700_v40 = vadd.f32 %v4224_v37, %v1699_v15 }
 0x32f   :  { %v1787_v20 = vadd.f32 %v1700_v40, %v4032_v13 }
 0x330   :  { %v1513_v31 = vpop.f32.mrf.mxu0 }
 0x331   :  { %v1825_v34 = vmax.f32 %v1787_v20, 0.0  ;;  %v1514_v39 = vadd.f32 %v4111_v51, %v1513_v31 }
 0x333   :  { %v1574_v21 = vmax.f32 %v1514_v39, 0.0  ;;  %v1860_v42 = vpack.c.bf16 %v1825_v34, %v1824_v63 }
 0x334   :  { %v1702_v3 = vpop.f32.mrf.mxu1 }
 0x335   :  { %v1600_v11 = vpack.c.bf16 %v1574_v21, %v1573_v57  ;;  %1963 = vmatmul.bf16.gmra.mxu2 %v1860_v42  ;;  %v1703_v8 = vadd.f32 %v4224_v37, %v1702_v3 }
 0x337   :  { %1741 = vmatmul.bf16.gmra.mxu1 %v1600_v11  ;;  %v1788_v52 = vadd.f32 %v1703_v8, %v4040_v54 }
 0x338   :  { %v1516_v18 = vpop.f32.mrf.mxu0 }
 0x339   :  { %v1517_v28 = vadd.f32 %v4111_v51, %v1516_v18  ;;  %v1826_v2 = vmax.f32 %v1788_v52, 0.0 }
 0x33b   :  { %v1575_v44 = vmax.f32 %v1517_v28, 0.0 }
 0x33c   :  { %v1704_v43 = vpop.f32.mrf.mxu1 }
 0x33d   :  { %v1705_v13 = vadd.f32 %v4224_v37, %v1704_v43 }
 0x33f   :  { %v1789_v16 = vadd.f32 %v1705_v13, %v4044_v61 }
 0x340   :  { %v1518_v60 = vpop.f32.mrf.mxu0 }
 0x341   :  { %v1827_v1 = vmax.f32 %v1789_v16, 0.0  ;;  %v1519_v23 = vadd.f32 %v4111_v51, %v1518_v60 }
 0x343   :  { %v1576_v46 = vmax.f32 %v1519_v23, 0.0  ;;  %v1861_v12 = vpack.c.bf16 %v1827_v1, %v1826_v2 }
 0x344   :  { %v1707_v36 = vpop.f32.mrf.mxu1 }
 0x345   :  { %v1601_v15 = vpack.c.bf16 %v1576_v46, %v1575_v44  ;;  %1968 = vmatmul.bf16.gmra.mxu2 %v1861_v12  ;;  %v1708_v58 = vadd.f32 %v4224_v37, %v1707_v36  ;;  %v3143_v36 = vld [vmem:[#allocation16] sm:$0xff] }
 0x346   :  { %2215 = vmatpush.bf16.msrb.mxu3 %v3143_v36 }
 0x347   :  { %1746 = vmatmul.bf16.gmra.mxu1 %v1601_v15  ;;  %v1790_v62 = vadd.f32 %v1708_v58, %v4052_v32 }
 0x348   :  { %v1521_v54 = vpop.f32.mrf.mxu0 }
 0x349   :  { %v1522_v20 = vadd.f32 %v4111_v51, %v1521_v54  ;;  %v1828_v34 = vmax.f32 %v1790_v62, 0.0 }
 0x34b   :  { %v1577_v21 = vmax.f32 %v1522_v20, 0.0 }
 0x34c   :  { %v1709_v40 = vpop.f32.mrf.mxu1 }
 0x34d   :  { %v1710_v61 = vadd.f32 %v4224_v37, %v1709_v40 }
 0x34f   :  { %v1791_v31 = vadd.f32 %v1710_v61, %v4056_v0 }
 0x350   :  { %v1523_v63 = vpop.f32.mrf.mxu0 }
 0x351   :  { %v1829_v39 = vmax.f32 %v1791_v31, 0.0  ;;  %v1524_v57 = vadd.f32 %v4111_v51, %v1523_v63 }
 0x353   :  { %v1578_v42 = vmax.f32 %v1524_v57, 0.0  ;;  %v1862_v3 = vpack.c.bf16 %v1829_v39, %v1828_v34 }
 0x354   :  { %v1712_v11 = vpop.f32.mrf.mxu1 }
 0x355   :  { %v1602_v18 = vpack.c.bf16 %v1578_v42, %v1577_v21  ;;  %1973 = vmatmul.bf16.gmra.mxu2 %v1862_v3  ;;  %v1713_v32 = vadd.f32 %v4224_v37, %v1712_v11 }
 0x357   :  { %1751 = vmatmul.bf16.gmra.mxu1 %v1602_v18  ;;  %v1792_v43 = vadd.f32 %v1713_v32, %v4064_v7 }
 0x358   :  { %v1526_v8 = vpop.f32.mrf.mxu0 }
 0x359   :  { %v1527_v52 = vadd.f32 %v4111_v51, %v1526_v8  ;;  %v1830_v16 = vmax.f32 %v1792_v43, 0.0 }
 0x35b   :  { %v1579_v1 = vmax.f32 %v1527_v52, 0.0 }
 0x35c   :  { %v1714_v33 = vpop.f32.mrf.mxu1 }
 0x35d   :  { %v1715_v0 = vadd.f32 %v4224_v37, %v1714_v33 }
 0x35f   :  { %v1793_v13 = vadd.f32 %v1715_v0, %v4068_v17 }
 0x360   :  { %v1528_v28 = vpop.f32.mrf.mxu0 }
 0x361   :  { %v1831_v60 = vmax.f32 %v1793_v13, 0.0  ;;  %v1529_v2 = vadd.f32 %v4111_v51, %v1528_v28 }
 0x363   :  { %v1580_v23 = vmax.f32 %v1529_v2, 0.0  ;;  %v1863_v44 = vpack.c.bf16 %v1831_v60, %v1830_v16 }
 0x364   :  { %v1717_v46 = vpop.f32.mrf.mxu1 }
 0x365   :  { %v1603_v12 = vpack.c.bf16 %v1580_v23, %v1579_v1  ;;  %1978 = vmatmul.bf16.gmra.mxu2 %v1863_v44  ;;  %v1718_v15 = vadd.f32 %v4224_v37, %v1717_v46 }
 0x367   :  { %1756 = vmatmul.bf16.gmra.mxu1 %v1603_v12  ;;  %v1794_v17 = vadd.f32 %v1718_v15, %v4076_v47 }
 0x368   :  { %v1531_v7 = vpop.f32.mrf.mxu0 }
 0x369   :  { %v1532_v40 = vadd.f32 %v4111_v51, %v1531_v7  ;;  %v1832_v20 = vmax.f32 %v1794_v17, 0.0 }
 0x36b   :  { %v1581_v34 = vmax.f32 %v1532_v40, 0.0 }
 0x36c   :  { %v1719_v54 = vpop.f32.mrf.mxu1 }
 0x36d   :  { %v1720_v58 = vadd.f32 %v4224_v37, %v1719_v54 }
 0x36f   :  { %v1795_v62 = vadd.f32 %v1720_v58, %v4080_v10 }
 0x370   :  { %v1533_v61 = vpop.f32.mrf.mxu0 }
 0x371   :  { %v1833_v31 = vmax.f32 %v1795_v62, 0.0  ;;  %v1534_v63 = vadd.f32 %v4111_v51, %v1533_v61 }
 0x373   :  { %v1582_v39 = vmax.f32 %v1534_v63, 0.0  ;;  %v1864_v57 = vpack.c.bf16 %v1833_v31, %v1832_v20 }
 0x374   :  { %v1722_v21 = vpop.f32.mrf.mxu1 }
 0x375   :  { %v1604_v42 = vpack.c.bf16 %v1582_v39, %v1581_v34  ;;  %1983 = vmatmul.bf16.gmra.mxu2 %v1864_v57  ;;  %v1723_v47 = vadd.f32 %v4224_v37, %v1722_v21 }
 0x377   :  { %1761 = vmatmul.bf16.gmra.mxu1 %v1604_v42  ;;  %v1796_v18 = vadd.f32 %v1723_v47, %v4088_v35 }
 0x378   :  { %v1536_v3 = vpop.f32.mrf.mxu0 }
 0x379   :  { %v1537_v8 = vadd.f32 %v4111_v51, %v1536_v3  ;;  %v1834_v43 = vmax.f32 %v1796_v18, 0.0 }
 0x37b   :  { %v1583_v13 = vmax.f32 %v1537_v8, 0.0 }
 0x37c   :  { %v1724_v11 = vpop.f32.mrf.mxu1 }
 0x37d   :  { %v1725_v10 = vadd.f32 %v4224_v37, %v1724_v11 }
 0x37f   :  { %v1797_v32 = vadd.f32 %v1725_v10, %v4092_v38 }
 0x380   :  { %v1538_v33 = vpop.f32.mrf.mxu0 }
 0x381   :  { %v1835_v0 = vmax.f32 %v1797_v32, 0.0  ;;  %v1539_v52 = vadd.f32 %v4111_v51, %v1538_v33 }
 0x383   :  { %v1584_v28 = vmax.f32 %v1539_v52, 0.0  ;;  %v1865_v16 = vpack.c.bf16 %v1835_v0, %v1834_v43 }
 0x384   :  { %v1727_v60 = vpop.f32.mrf.mxu1 }
 0x385   :  { %v1605_v2 = vpack.c.bf16 %v1584_v28, %v1583_v13  ;;  %1988 = vmatmul.bf16.gmra.mxu2 %v1865_v16  ;;  %v1728_v35 = vadd.f32 %v4224_v37, %v1727_v60 }
 0x387   :  { %1766 = vmatmul.bf16.gmra.mxu1 %v1605_v2  ;;  %v1798_v44 = vadd.f32 %v1728_v35, %v4100_v6  ;;  %v4295_v6 = vld [vmem:[%s4618_s10] ss:$0 sm:$0xff] }
 0x388   :  { %v1541_v1 = vpop.f32.mrf.mxu0 }
 0x389   :  { %v1542_v46 = vadd.f32 %v4111_v51, %v1541_v1  ;;  %v1836_v7 = vmax.f32 %v1798_v44, 0.0 }
 0x38b   :  { %v1585_v17 = vmax.f32 %v1542_v46, 0.0 }
 0x38c   :  { %v1729_v23 = vpop.f32.mrf.mxu1 }
 0x38d   :  { %v1730_v38 = vadd.f32 %v4224_v37, %v1729_v23 }
 0x38f   :  { %v1799_v12 = vadd.f32 %v1730_v38, %v4104_v9 }
 0x390   :  { %v1543_v36 = vpop.f32.mrf.mxu0 }
 0x391   :  { %v1837_v15 = vmax.f32 %v1799_v12, 0.0  ;;  %v1544_v54 = vadd.f32 %v4111_v51, %v1543_v36 }
 0x393   :  { %v1586_v58 = vmax.f32 %v1544_v54, 0.0  ;;  %v1866_v40 = vpack.c.bf16 %v1837_v15, %v1836_v7 }
 0x394   :  { %v1732_v62 = vpop.f32.mrf.mxu1 }
 0x395   :  { %v1606_v61 = vpack.c.bf16 %v1586_v58, %v1585_v17  ;;  %1993 = vmatmul.bf16.gmra.mxu2 %v1866_v40  ;;  %v1733_v9 = vadd.f32 %v4224_v37, %v1732_v62 }
 0x397   :  { %1771 = vmatmul.bf16.gmra.mxu1 %v1606_v61  ;;  %v1800_v39 = vadd.f32 %v1733_v9, %v4119_v55 }
 0x398   :  { %v1546_v20 = vpop.f32.mrf.mxu0  ;;  %v1954_v31 = vpop.f32.mrf.mxu2 }
 0x399   :  { %v4299_v63 = vadd.f32 %v4295_v6, %v1954_v31  ;;  %v1547_v21 = vadd.f32 %v4111_v51, %v1546_v20  ;;  %v1838_v11 = vmax.f32 %v1800_v39, 0.0 }
 0x39b   :  { %2049 = vst [vmem:[#allocation17] sm:$0xff] %v4299_v63  ;;  %v1587_v32 = vmax.f32 %v1547_v21, 0.0  ;;  %v2087_v33 = vmul.f32 %v4299_v63, %v4299_v63 }
 0x39c   :  { %v1734_v34 = vpop.f32.mrf.mxu1 }
 0x39d   :  { %v1735_v57 = vadd.f32 %v4224_v37, %v1734_v34 }
 0x39f   :  { %v1801_v42 = vadd.f32 %v1735_v57, %v4123_v27 }
 0x3a0   :  { %v1548_v3 = vpop.f32.mrf.mxu0  ;;  %v1956_v47 = vpop.f32.mrf.mxu2 }
 0x3a1   :  { %v1839_v18 = vmax.f32 %v1801_v42, 0.0  ;;  %v1549_v10 = vadd.f32 %v4111_v51, %v1548_v3  ;;  %v4308_v8 = vadd.f32 %v4295_v6, %v1956_v47 }
 0x3a3   :  { %v1588_v55 = vmax.f32 %v1549_v10, 0.0  ;;  %2050 = vst [vmem:[#allocation17 + $0x10] sm:$0xff] %v4308_v8  ;;  %v2088_v43 = vmul.f32 %v4308_v8, %v4308_v8  ;;  %v1867_v27 = vpack.c.bf16 %v1839_v18, %v1838_v11 }
 0x3a4   :  { %v1737_v0 = vpop.f32.mrf.mxu1 }
 0x3a5   :  { %v1607_v52 = vpack.c.bf16 %v1588_v55, %v1587_v32  ;;  %1998 = vmatmul.bf16.gmra.mxu2 %v1867_v27  ;;  %v2125_v13 = vpack.c.bf16 %v2088_v43, %v2087_v33  ;;  %v1738_v28 = vadd.f32 %v4224_v37, %v1737_v0 }
 0x3a7   :  { %1776 = vmatmul.bf16.gmra.mxu1 %v1607_v52  ;;  %2216 = vmatmul.bf16.vlgmr.msrb.gmra.mxu3 %v2125_v13  ;;  %v1802_v2 = vadd.f32 %v1738_v28, %v4131_v45 }
 0x3a8   :  { %v1959_v51 = vpop.f32.mrf.mxu2 }
 0x3a9   :  { %v4317_v16 = vadd.f32 %v4295_v6, %v1959_v51  ;;  %v1840_v44 = vmax.f32 %v1802_v2, 0.0 }
 0x3ab   :  { %2051 = vst [vmem:[#allocation17 + $0x20] sm:$0xff] %v4317_v16  ;;  %v2089_v12 = vmul.f32 %v4317_v16, %v4317_v16 }
 0x3ac   :  { %v1739_v60 = vpop.f32.mrf.mxu1 }
 0x3ad   :  { %v1740_v1 = vadd.f32 %v4224_v37, %v1739_v60 }
 0x3af   :  { %v1803_v35 = vadd.f32 %v1740_v1, %v4135_v48 }
 0x3b0   :  { %v1961_v23 = vpop.f32.mrf.mxu2 }
 0x3b1   :  { %v1841_v38 = vmax.f32 %v1803_v35, 0.0  ;;  %v4324_v46 = vadd.f32 %v4295_v6, %v1961_v23 }
 0x3b3   :  { %2052 = vst [vmem:[#allocation17 + $0x30] sm:$0xff] %v4324_v46  ;;  %v1868_v36 = vpack.c.bf16 %v1841_v38, %v1840_v44  ;;  %v2090_v7 = vmul.f32 %v4324_v46, %v4324_v46 }
 0x3b4   :  { %v1742_v45 = vpop.f32.mrf.mxu1 }
 0x3b5   :  { %2003 = vmatmul.bf16.gmra.mxu2 %v1868_v36  ;;  %v2126_v15 = vpack.c.bf16 %v2090_v7, %v2089_v12  ;;  %v1743_v54 = vadd.f32 %v4224_v37, %v1742_v45 }
 0x3b7   :  { %2221 = vmatmul.bf16.gmra.mxu3 %v2126_v15  ;;  %v1804_v40 = vadd.f32 %v1743_v54, %v4143_v50 }
 0x3b8   :  { %v1964_v48 = vpop.f32.mrf.mxu2 }
 0x3b9   :  { %v4333_v17 = vadd.f32 %v4295_v6, %v1964_v48  ;;  %v1842_v31 = vmax.f32 %v1804_v40, 0.0 }
 0x3bb   :  { %2053 = vst [vmem:[#allocation17 + $0x40] sm:$0xff] %v4333_v17  ;;  %v2091_v39 = vmul.f32 %v4333_v17, %v4333_v17 }
 0x3bc   :  { %v1744_v58 = vpop.f32.mrf.mxu1 }
 0x3bd   :  { %v1745_v62 = vadd.f32 %v4224_v37, %v1744_v58 }
 0x3bf   :  { %v1805_v61 = vadd.f32 %v1745_v62, %v4147_v22 }
 0x3c0   :  { %v1966_v20 = vpop.f32.mrf.mxu2 }
 0x3c1   :  { %v1843_v9 = vmax.f32 %v1805_v61, 0.0  ;;  %v4340_v34 = vadd.f32 %v4295_v6, %v1966_v20 }
 0x3c3   :  { %2054 = vst [vmem:[#allocation17 + $0x50] sm:$0xff] %v4340_v34  ;;  %v1869_v57 = vpack.c.bf16 %v1843_v9, %v1842_v31  ;;  %v2092_v21 = vmul.f32 %v4340_v34, %v4340_v34 }
 0x3c4   :  { %v1747_v50 = vpop.f32.mrf.mxu1 }
 0x3c5   :  { %2008 = vmatmul.bf16.gmra.mxu2 %v1869_v57  ;;  %v2127_v42 = vpack.c.bf16 %v2092_v21, %v2091_v39  ;;  %v1748_v3 = vadd.f32 %v4224_v37, %v1747_v50 }
 0x3c7   :  { %2226 = vmatmul.bf16.gmra.mxu3 %v2127_v42  ;;  %v1806_v18 = vadd.f32 %v1748_v3, %v4155_v4 }
 0x3c8   :  { %v1969_v22 = vpop.f32.mrf.mxu2 }
 0x3c9   :  { %v4349_v47 = vadd.f32 %v4295_v6, %v1969_v22  ;;  %v1844_v55 = vmax.f32 %v1806_v18, 0.0 }
 0x3cb   :  { %2055 = vst [vmem:[#allocation17 + $0x60] sm:$0xff] %v4349_v47  ;;  %v2093_v0 = vmul.f32 %v4349_v47, %v4349_v47 }
 0x3cc   :  { %v1749_v11 = vpop.f32.mrf.mxu1 }
 0x3cd   :  { %v1750_v10 = vadd.f32 %v4224_v37, %v1749_v11 }
 0x3cf   :  { %v1807_v32 = vadd.f32 %v1750_v10, %v4159_v59 }
 0x3d0   :  { %v1971_v33 = vpop.f32.mrf.mxu2 }
 0x3d1   :  { %v1845_v43 = vmax.f32 %v1807_v32, 0.0  ;;  %v4356_v27 = vadd.f32 %v4295_v6, %v1971_v33 }
 0x3d3   :  { %2056 = vst [vmem:[#allocation17 + $0x70] sm:$0xff] %v4356_v27  ;;  %v1870_v52 = vpack.c.bf16 %v1845_v43, %v1844_v55  ;;  %v2094_v13 = vmul.f32 %v4356_v27, %v4356_v27 }
 0x3d4   :  { %v1752_v4 = vpop.f32.mrf.mxu1 }
 0x3d5   :  { %2013 = vmatmul.bf16.gmra.mxu2 %v1870_v52  ;;  %v2128_v51 = vpack.c.bf16 %v2094_v13, %v2093_v0  ;;  %v1753_v28 = vadd.f32 %v4224_v37, %v1752_v4 }
 0x3d7   :  { %2231 = vmatmul.bf16.gmra.mxu3 %v2128_v51  ;;  %v1808_v1 = vadd.f32 %v1753_v28, %v4167_v14 }
 0x3d8   :  { %v1974_v59 = vpop.f32.mrf.mxu2 }
 0x3d9   :  { %v4365_v60 = vadd.f32 %v4295_v6, %v1974_v59  ;;  %v1846_v38 = vmax.f32 %v1808_v1, 0.0 }
 0x3db   :  { %2057 = vst [vmem:[#allocation17 + $0x80] sm:$0xff] %v4365_v60  ;;  %v2095_v7 = vmul.f32 %v4365_v60, %v4365_v60 }
 0x3dc   :  { %v1754_v2 = vpop.f32.mrf.mxu1 }
 0x3dd   :  { %v1755_v35 = vadd.f32 %v4224_v37, %v1754_v2 }
 0x3df   :  { %v1809_v23 = vadd.f32 %v1755_v35, %v4171_v24 }
 0x3e0   :  { %v1976_v44 = vpop.f32.mrf.mxu2 }
 0x3e1   :  { %v1847_v12 = vmax.f32 %v1809_v23, 0.0  ;;  %v4372_v36 = vadd.f32 %v4295_v6, %v1976_v44 }
 0x3e3   :  { %2058 = vst [vmem:[#allocation17 + $0x90] sm:$0xff] %v4372_v36  ;;  %v1871_v45 = vpack.c.bf16 %v1847_v12, %v1846_v38  ;;  %v2096_v15 = vmul.f32 %v4372_v36, %v4372_v36 }
 0x3e4   :  { %v1757_v14 = vpop.f32.mrf.mxu1 }
 0x3e5   :  { %2018 = vmatmul.bf16.gmra.mxu2 %v1871_v45  ;;  %v2129_v48 = vpack.c.bf16 %v2096_v15, %v2095_v7  ;;  %v1758_v54 = vadd.f32 %v4224_v37, %v1757_v14 }
 0x3e7   :  { %2236 = vmatmul.bf16.gmra.mxu3 %v2129_v48  ;;  %v1810_v62 = vadd.f32 %v1758_v54, %v4179_v25 }
 0x3e8   :  { %v1979_v24 = vpop.f32.mrf.mxu2 }
 0x3e9   :  { %v4381_v58 = vadd.f32 %v4295_v6, %v1979_v24  ;;  %v1848_v9 = vmax.f32 %v1810_v62, 0.0 }
 0x3eb   :  { %2059 = vst [vmem:[#allocation17 + $0xa0] sm:$0xff] %v4381_v58  ;;  %v2097_v21 = vmul.f32 %v4381_v58, %v4381_v58 }
 0x3ec   :  { %v1759_v40 = vpop.f32.mrf.mxu1 }
 0x3ed   :  { %v1760_v61 = vadd.f32 %v4224_v37, %v1759_v40 }
 0x3ef   :  { %v1811_v20 = vadd.f32 %v1760_v61, %v4183_v49 }
 0x3f0   :  { %v1981_v31 = vpop.f32.mrf.mxu2 }
 0x3f1   :  { %v1849_v39 = vmax.f32 %v1811_v20, 0.0  ;;  %v4388_v57 = vadd.f32 %v4295_v6, %v1981_v31 }
 0x3f3   :  { %2060 = vst [vmem:[#allocation17 + $0xb0] sm:$0xff] %v4388_v57  ;;  %v1872_v50 = vpack.c.bf16 %v1849_v39, %v1848_v9  ;;  %v2098_v42 = vmul.f32 %v4388_v57, %v4388_v57 }
 0x3f4   :  { %v1762_v25 = vpop.f32.mrf.mxu1 }
 0x3f5   :  { %2023 = vmatmul.bf16.gmra.mxu2 %v1872_v50  ;;  %v2130_v22 = vpack.c.bf16 %v2098_v42, %v2097_v21  ;;  %v1763_v3 = vadd.f32 %v4224_v37, %v1762_v25 }
 0x3f7   :  { %2241 = vmatmul.bf16.gmra.mxu3 %v2130_v22  ;;  %v1812_v10 = vadd.f32 %v1763_v3, %v4191_v41 }
 0x3f8   :  { %v1984_v49 = vpop.f32.mrf.mxu2 }
 0x3f9   :  { %v4397_v11 = vadd.f32 %v4295_v6, %v1984_v49  ;;  %v1850_v43 = vmax.f32 %v1812_v10, 0.0 }
 0x3fb   :  { %2061 = vst [vmem:[#allocation17 + $0xc0] sm:$0xff] %v4397_v11  ;;  %v2099_v13 = vmul.f32 %v4397_v11, %v4397_v11 }
 0x3fc   :  { %v1764_v18 = vpop.f32.mrf.mxu1 }
 0x3fd   :  { %v1765_v32 = vadd.f32 %v4224_v37, %v1764_v18 }
 0x3ff   :  { %v1813_v33 = vadd.f32 %v1765_v32, %v4195_v19 }
 0x400   :  { %v1986_v55 = vpop.f32.mrf.mxu2 }
 0x401   :  { %v1851_v0 = vmax.f32 %v1813_v33, 0.0  ;;  %v4404_v52 = vadd.f32 %v4295_v6, %v1986_v55 }
 0x403   :  { %2062 = vst [vmem:[#allocation17 + $0xd0] sm:$0xff] %v4404_v52  ;;  %v1873_v4 = vpack.c.bf16 %v1851_v0, %v1850_v43  ;;  %v2100_v51 = vmul.f32 %v4404_v52, %v4404_v52 }
 0x404   :  { %v1767_v41 = vpop.f32.mrf.mxu1 }
 0x405   :  { %2028 = vmatmul.bf16.gmra.mxu2 %v1873_v4  ;;  %v2131_v59 = vpack.c.bf16 %v2100_v51, %v2099_v13  ;;  %v1768_v28 = vadd.f32 %v4224_v37, %v1767_v41 }
 0x407   :  { %2246 = vmatmul.bf16.gmra.mxu3 %v2131_v59  ;;  %v1814_v35 = vadd.f32 %v1768_v28, %v4203_v29 }
 0x408   :  { %v1989_v19 = vpop.f32.mrf.mxu2 }
 0x409   :  { %v4413_v2 = vadd.f32 %v4295_v6, %v1989_v19  ;;  %v1852_v12 = vmax.f32 %v1814_v35, 0.0 }
 0x40b   :  { %2063 = vst [vmem:[#allocation17 + $0xe0] sm:$0xff] %v4413_v2  ;;  %v2101_v15 = vmul.f32 %v4413_v2, %v4413_v2 }
 0x40c   :  { %v1769_v1 = vpop.f32.mrf.mxu1 }
 0x40d   :  { %v1770_v23 = vadd.f32 %v4224_v37, %v1769_v1 }
 0x40f   :  { %v1815_v44 = vadd.f32 %v1770_v23, %v4207_v53 }
 0x410   :  { %v1991_v38 = vpop.f32.mrf.mxu2 }
 0x411   :  { %v1853_v7 = vmax.f32 %v1815_v44, 0.0  ;;  %v4420_v45 = vadd.f32 %v4295_v6, %v1991_v38 }
 0x413   :  { %2064 = vst [vmem:[#allocation17 + $0xf0] sm:$0xff] %v4420_v45  ;;  %v2102_v14 = vmul.f32 %v4420_v45, %v4420_v45  ;;  %v1874_v48 = vpack.c.bf16 %v1853_v7, %v1852_v12 }
 0x414   :  { %v1772_v29 = vpop.f32.mrf.mxu1 }
 0x415   :  { %2033 = vmatmul.bf16.gmra.mxu2 %v1874_v48  ;;  %v2132_v24 = vpack.c.bf16 %v2102_v14, %v2101_v15  ;;  %v1773_v54 = vadd.f32 %v4224_v37, %v1772_v29 }
 0x417   :  { %2251 = vmatmul.bf16.gmra.mxu3 %v2132_v24  ;;  %v1816_v61 = vadd.f32 %v1773_v54, %v4215_v26 }
 0x418   :  { %v1994_v53 = vpop.f32.mrf.mxu2 }
 0x419   :  { %v4429_v40 = vadd.f32 %v4295_v6, %v1994_v53  ;;  %v1854_v39 = vmax.f32 %v1816_v61, 0.0 }
 0x41b   :  { %2065 = vst [vmem:[#allocation17 + $0x100] sm:$0xff] %v4429_v40  ;;  %v2103_v42 = vmul.f32 %v4429_v40, %v4429_v40 }
 0x41c   :  { %v1774_v62 = vpop.f32.mrf.mxu1 }
 0x41d   :  { %v1775_v20 = vadd.f32 %v4224_v37, %v1774_v62 }
 0x41f   :  { %v1817_v31 = vadd.f32 %v1775_v20, %v4219_v30 }
 0x420   :  { %v1996_v9 = vpop.f32.mrf.mxu2 }
 0x421   :  { %v1855_v21 = vmax.f32 %v1817_v31, 0.0  ;;  %v4436_v50 = vadd.f32 %v4295_v6, %v1996_v9 }
 0x423   :  { %2066 = vst [vmem:[#allocation17 + $0x110] sm:$0xff] %v4436_v50  ;;  %v2104_v25 = vmul.f32 %v4436_v50, %v4436_v50  ;;  %v1875_v22 = vpack.c.bf16 %v1855_v21, %v1854_v39 }
 0x424   :  { %v1777_v26 = vpop.f32.mrf.mxu1 }
 0x425   :  { %2038 = vmatmul.bf16.gmra.mxu2 %v1875_v22  ;;  %v2133_v49 = vpack.c.bf16 %v2104_v25, %v2103_v42  ;;  %v1778_v3 = vadd.f32 %v4224_v37, %v1777_v26 }
 0x427   :  { %2256 = vmatmul.bf16.gmra.mxu3 %v2133_v49  ;;  %v1818_v55 = vadd.f32 %v1778_v3, %v4236_v5 }
 0x428   :  { %v1999_v30 = vpop.f32.mrf.mxu2 }
 0x429   :  { %v4445_v18 = vadd.f32 %v4295_v6, %v1999_v30  ;;  %v1856_v4 = vmax.f32 %v1818_v55, 0.0 }
 0x42a   :  { %v2217_v10 = vpop.f32.mrf.mxu3 }
 0x42b   :  { %2067 = vst [vmem:[#allocation17 + $0x120] sm:$0xff] %v4445_v18  ;;  %v2312_v32 = vmax.f32 %v2217_v10, 1e-08  ;;  %v2105_v28 = vmul.f32 %v4445_v18, %v4445_v18 }
 0x42c   :  { %v1779_v33 = vpop.f32.mrf.mxu1 }
 0x42d   :  { %3359 = vrsqrt.f32 %v2312_v32  ;;  %v1780_v43 = vadd.f32 %v4224_v37, %v1779_v33  ;;  %vm2356_vm1 = vweird.f32 %v2312_v32 }
 0x42f   :  { %v1819_v0 = vadd.f32 %v1780_v43, %v4240_v56 }
 0x430   :  { %v2001_v13 = vpop.f32.mrf.mxu2 }
 0x431   :  { %v1857_v51 = vmax.f32 %v1819_v0, 0.0  ;;  %v4452_v41 = vadd.f32 %v4295_v6, %v2001_v13 }
 0x432   :  { %v2219_v59 = vpop.f32.mrf.mxu3 }
 0x433   :  { %v3360_v19 = vpop.eup %3359  ;;  %2068 = vst [vmem:[#allocation17 + $0x130] sm:$0xff] %v4452_v41  ;;  %v2106_v5 = vmul.f32 %v4452_v41, %v4452_v41  ;;  %v2313_v1 = vmax.f32 %v2219_v59, 1e-08  ;;  %v1876_v37 = vpack.c.bf16 %v1857_v51, %v1856_v4 }
 0x434   :  { %v2351_v35 = vmul.f32 %v3360_v19, %v2312_v32  ;;  %vm2357_vm0 = vweird.f32 %v3360_v19 }
 0x435   :  { %3361 = vrsqrt.f32 %v2313_v1  ;;  %2043 = vmatmul.bf16.gmra.mxu2 %v1876_v37  ;;  %v2134_v56 = vpack.c.bf16 %v2106_v5, %v2105_v28  ;;  %vm2358_vm2 = vmor %vm2356_vm1, %vm2357_vm0  ;;  %vm2366_vm4 = vweird.f32 %v2313_v1 }
 0x436   :  { %v2352_v23 = vmul.f32 %v3360_v19, %v2351_v35 }
 0x437   :  { %2261 = vmatmul.bf16.gmra.mxu3 %v2134_v56 }
 0x438   :  { %v2353_v44 = vmul.f32 0.5, %v2352_v23  ;;  %v2004_v38 = vpop.f32.mrf.mxu2 }
 0x439   :  { %v4460_v12 = vadd.f32 %v4295_v6, %v2004_v38 }
 0x43a   :  { %v2354_v7 = vsub.f32 1.5, %v2353_v44  ;;  %v2222_v15 = vpop.f32.mrf.mxu3 }
 0x43b   :  { %v3362_v14 = vpop.eup %3361  ;;  %2069 = vst [vmem:[#allocation17 + $0x140] sm:$0xff] %v4460_v12  ;;  %v2314_v48 = vmax.f32 %v2222_v15, 1e-08  ;;  %v2107_v42 = vmul.f32 %v4460_v12, %v4460_v12 }
 0x43c   :  { %v2355_v29 = vmul.f32 %v3360_v19, %v2354_v7  ;;  %v2361_v24 = vmul.f32 %v3362_v14, %v2313_v1  ;;  %vm2367_vm3 = vweird.f32 %v3362_v14 }
 0x43d   :  { %3363 = vrsqrt.f32 %v2314_v48  ;;  %vm2368_vm5 = vmor %vm2366_vm4, %vm2367_vm3  ;;  %vm2376_vm7 = vweird.f32 %v2314_v48 }
 0x43e   :  { %v2359_v53 = vsel %vm2358_vm2, %v3360_v19, %v2355_v29  ;;  %v2362_v54 = vmul.f32 %v3362_v14, %v2361_v24 }
 0x43f   :  { %v2730_v62 = vmul.f32 %v2359_v53, %v4299_v63 }
 0x440   :  { %v2363_v61 = vmul.f32 0.5, %v2362_v54  ;;  %v2006_v20 = vpop.f32.mrf.mxu2 }
 0x441   :  { %2768 = vst [vmem:[#allocation17 + $0x8] sm:$0xff] %v2730_v62  ;;  %v4465_v31 = vadd.f32 %v4295_v6, %v2006_v20 }
 0x442   :  { %v2364_v9 = vsub.f32 1.5, %v2363_v61  ;;  %v2224_v39 = vpop.f32.mrf.mxu3 }
 0x443   :  { %v3364_v21 = vpop.eup %3363  ;;  %2070 = vst [vmem:[#allocation17 + $0x150] sm:$0xff] %v4465_v31  ;;  %v2108_v25 = vmul.f32 %v4465_v31, %v4465_v31  ;;  %v2315_v22 = vmax.f32 %v2224_v39, 1e-08 }
 0x444   :  { %v2365_v63 = vmul.f32 %v3362_v14, %v2364_v9  ;;  %v2371_v26 = vmul.f32 %v3364_v21, %v2314_v48  ;;  %vm2377_vm6 = vweird.f32 %v3364_v21 }
 0x445   :  { %3365 = vrsqrt.f32 %v2315_v22  ;;  %v2135_v49 = vpack.c.bf16 %v2108_v25, %v2107_v42  ;;  %vm2378_vm8 = vmor %vm2376_vm7, %vm2377_vm6  ;;  %vm2386_vm10 = vweird.f32 %v2315_v22 }
 0x446   :  { %v2369_v30 = vsel %vm2368_vm5, %v3362_v14, %v2365_v63  ;;  %v2372_v3 = vmul.f32 %v3364_v21, %v2371_v26 }
 0x447   :  { %v2731_v10 = vmul.f32 %v2369_v30, %v4308_v8  ;;  %2266 = vmatmul.bf16.gmra.mxu3 %v2135_v49 }
 0x448   :  { %v2373_v32 = vmul.f32 0.5, %v2372_v3  ;;  %v2009_v33 = vpop.f32.mrf.mxu2 }
 0x449   :  { %2769 = vst [vmem:[#allocation17 + $0x18] sm:$0xff] %v2731_v10  ;;  %v4474_v55 = vadd.f32 %v4295_v6, %v2009_v33 }
 0x44a   :  { %v2374_v43 = vsub.f32 1.5, %v2373_v32  ;;  %v2227_v0 = vpop.f32.mrf.mxu3 }
 0x44b   :  { %v3366_v13 = vpop.eup %3365  ;;  %2071 = vst [vmem:[#allocation17 + $0x160] sm:$0xff] %v4474_v55  ;;  %v2316_v4 = vmax.f32 %v2227_v0, 1e-08  ;;  %v2109_v44 = vmul.f32 %v4474_v55, %v4474_v55 }
 0x44c   :  { %v2375_v51 = vmul.f32 %v3364_v21, %v2374_v43  ;;  %v2381_v59 = vmul.f32 %v3366_v13, %v2315_v22  ;;  %vm2387_vm9 = vweird.f32 %v3366_v13 }
 0x44d   :  { %3367 = vrsqrt.f32 %v2316_v4  ;;  %vm2388_vm11 = vmor %vm2386_vm10, %vm2387_vm9  ;;  %vm2396_vm13 = vweird.f32 %v2316_v4 }
 0x44e   :  { %v2379_v8 = vsel %vm2378_vm8, %v3364_v21, %v2375_v51  ;;  %v2382_v19 = vmul.f32 %v3366_v13, %v2381_v59 }
 0x44f   :  { %v2732_v28 = vmul.f32 %v2379_v8, %v4317_v16 }
 0x450   :  { %v2383_v5 = vmul.f32 0.5, %v2382_v19  ;;  %v2011_v1 = vpop.f32.mrf.mxu2 }
 0x451   :  { %2770 = vst [vmem:[#allocation17 + $0x28] sm:$0xff] %v2732_v28  ;;  %v4479_v37 = vadd.f32 %v4295_v6, %v2011_v1 }
 0x452   :  { %v2384_v35 = vsub.f32 1.5, %v2383_v5  ;;  %v2229_v56 = vpop.f32.mrf.mxu3 }
 0x453   :  { %v3368_v23 = vpop.eup %3367  ;;  %2072 = vst [vmem:[#allocation17 + $0x170] sm:$0xff] %v4479_v37  ;;  %v2110_v38 = vmul.f32 %v4479_v37, %v4479_v37  ;;  %v2317_v7 = vmax.f32 %v2229_v56, 1e-08 }
 0x454   :  { %v2385_v16 = vmul.f32 %v3366_v13, %v2384_v35  ;;  %v2391_v15 = vmul.f32 %v3368_v23, %v2316_v4  ;;  %vm2397_vm12 = vweird.f32 %v3368_v23 }
 0x455   :  { %3369 = vrsqrt.f32 %v2317_v7  ;;  %v2136_v14 = vpack.c.bf16 %v2110_v38, %v2109_v44  ;;  %vm2398_vm14 = vmor %vm2396_vm13, %vm2397_vm12  ;;  %vm2406_vm0 = vweird.f32 %v2317_v7 }
 0x456   :  { %v2389_v48 = vsel %vm2388_vm11, %v3366_v13, %v2385_v16  ;;  %v2392_v29 = vmul.f32 %v3368_v23, %v2391_v15 }
 0x457   :  { %v2733_v24 = vmul.f32 %v2389_v48, %v4324_v46  ;;  %2271 = vmatmul.bf16.gmra.mxu3 %v2136_v14 }
 0x458   :  { %v2393_v53 = vmul.f32 0.5, %v2392_v29  ;;  %v2014_v54 = vpop.f32.mrf.mxu2 }
 0x459   :  { %2771 = vst [vmem:[#allocation17 + $0x38] sm:$0xff] %v2733_v24  ;;  %v4488_v62 = vadd.f32 %v4295_v6, %v2014_v54 }
 0x45a   :  { %v2394_v61 = vsub.f32 1.5, %v2393_v53  ;;  %v2232_v20 = vpop.f32.mrf.mxu3 }
 0x45b   :  { %v3370_v9 = vpop.eup %3369  ;;  %2073 = vst [vmem:[#allocation17 + $0x180] sm:$0xff] %v4488_v62  ;;  %v2318_v39 = vmax.f32 %v2232_v20, 1e-08  ;;  %v2111_v32 = vmul.f32 %v4488_v62, %v4488_v62 }
 0x45c   :  { %v2395_v21 = vmul.f32 %v3368_v23, %v2394_v61  ;;  %v2401_v42 = vmul.f32 %v3370_v9, %v2317_v7  ;;  %vm2407_vm15 = vweird.f32 %v3370_v9 }
 0x45d   :  { %3371 = vrsqrt.f32 %v2318_v39  ;;  %vm2408_vm1 = vmor %vm2406_vm0, %vm2407_vm15  ;;  %vm2416_vm3 = vweird.f32 %v2318_v39 }
 0x45e   :  { %v2399_v46 = vsel %vm2398_vm14, %v3368_v23, %v2395_v21  ;;  %v2402_v25 = vmul.f32 %v3370_v9, %v2401_v42 }
 0x45f   :  { %v2734_v22 = vmul.f32 %v2399_v46, %v4333_v17 }
 0x460   :  { %v2403_v63 = vmul.f32 0.5, %v2402_v25  ;;  %v2016_v26 = vpop.f32.mrf.mxu2 }
 0x461   :  { %2772 = vst [vmem:[#allocation17 + $0x48] sm:$0xff] %v2734_v22  ;;  %v4493_v49 = vadd.f32 %v4295_v6, %v2016_v26 }
 0x462   :  { %v2404_v30 = vsub.f32 1.5, %v2403_v63  ;;  %v2234_v3 = vpop.f32.mrf.mxu3 }
 0x463   :  { %v3372_v10 = vpop.eup %3371  ;;  %2074 = vst [vmem:[#allocation17 + $0x190] sm:$0xff] %v4493_v49  ;;  %v2112_v33 = vmul.f32 %v4493_v49, %v4493_v49  ;;  %v2319_v43 = vmax.f32 %v2234_v3, 1e-08 }
 0x464   :  { %v2405_v17 = vmul.f32 %v3370_v9, %v2404_v30  ;;  %v2411_v0 = vmul.f32 %v3372_v10, %v2318_v39  ;;  %vm2417_vm2 = vweird.f32 %v3372_v10 }
 0x465   :  { %3373 = vrsqrt.f32 %v2319_v43  ;;  %v2137_v13 = vpack.c.bf16 %v2112_v33, %v2111_v32  ;;  %vm2418_vm4 = vmor %vm2416_vm3, %vm2417_vm2  ;;  %vm2426_vm6 = vweird.f32 %v2319_v43 }
 0x466   :  { %v2409_v4 = vsel %vm2408_vm1, %v3370_v9, %v2405_v17  ;;  %v2412_v51 = vmul.f32 %v3372_v10, %v2411_v0 }
 0x467   :  { %v2735_v59 = vmul.f32 %v2409_v4, %v4340_v34  ;;  %2276 = vmatmul.bf16.gmra.mxu3 %v2137_v13 }
 0x468   :  { %v2413_v8 = vmul.f32 0.5, %v2412_v51  ;;  %v2019_v19 = vpop.f32.mrf.mxu2 }
 0x469   :  { %2773 = vst [vmem:[#allocation17 + $0x58] sm:$0xff] %v2735_v59  ;;  %v4502_v28 = vadd.f32 %v4295_v6, %v2019_v19 }
 0x46a   :  { %v2414_v5 = vsub.f32 1.5, %v2413_v8  ;;  %v2237_v1 = vpop.f32.mrf.mxu3 }
 0x46b   :  { %v3374_v35 = vpop.eup %3373  ;;  %2075 = vst [vmem:[#allocation17 + $0x1a0] sm:$0xff] %v4502_v28  ;;  %v2320_v56 = vmax.f32 %v2237_v1, 1e-08  ;;  %v2113_v53 = vmul.f32 %v4502_v28, %v4502_v28 }
 0x46c   :  { %v2415_v23 = vmul.f32 %v3372_v10, %v2414_v5  ;;  %v2421_v44 = vmul.f32 %v3374_v35, %v2319_v43  ;;  %vm2427_vm5 = vweird.f32 %v3374_v35 }
 0x46d   :  { %3375 = vrsqrt.f32 %v2320_v56  ;;  %vm2428_vm7 = vmor %vm2426_vm6, %vm2427_vm5  ;;  %vm2436_vm9 = vweird.f32 %v2320_v56 }
 0x46e   :  { %v2419_v34 = vsel %vm2418_vm4, %v3372_v10, %v2415_v23  ;;  %v2422_v38 = vmul.f32 %v3374_v35, %v2421_v44 }
 0x46f   :  { %v2736_v7 = vmul.f32 %v2419_v34, %v4349_v47 }
 0x470   :  { %v2423_v16 = vmul.f32 0.5, %v2422_v38  ;;  %v2021_v15 = vpop.f32.mrf.mxu2 }
 0x471   :  { %2774 = vst [vmem:[#allocation17 + $0x68] sm:$0xff] %v2736_v7  ;;  %v4507_v14 = vadd.f32 %v4295_v6, %v2021_v15 }
 0x472   :  { %v2424_v48 = vsub.f32 1.5, %v2423_v16  ;;  %v2239_v29 = vpop.f32.mrf.mxu3 }
 0x473   :  { %v3376_v24 = vpop.eup %3375  ;;  %2076 = vst [vmem:[#allocation17 + $0x1b0] sm:$0xff] %v4507_v14  ;;  %v2114_v54 = vmul.f32 %v4507_v14, %v4507_v14  ;;  %v2321_v61 = vmax.f32 %v2239_v29, 1e-08 }
 0x474   :  { %v2425_v47 = vmul.f32 %v3374_v35, %v2424_v48  ;;  %v2431_v20 = vmul.f32 %v3376_v24, %v2320_v56  ;;  %vm2437_vm8 = vweird.f32 %v3376_v24 }
 0x475   :  { %3377 = vrsqrt.f32 %v2321_v61  ;;  %v2138_v9 = vpack.c.bf16 %v2114_v54, %v2113_v53  ;;  %vm2438_vm10 = vmor %vm2436_vm9, %vm2437_vm8  ;;  %vm2446_vm12 = vweird.f32 %v2321_v61 }
 0x476   :  { %v2429_v39 = vsel %vm2428_vm7, %v3374_v35, %v2425_v47  ;;  %v2432_v21 = vmul.f32 %v3376_v24, %v2431_v20 }
 0x477   :  { %v2737_v42 = vmul.f32 %v2429_v39, %v4356_v27  ;;  %2281 = vmatmul.bf16.gmra.mxu3 %v2138_v9 }
 0x478   :  { %v2433_v46 = vmul.f32 0.5, %v2432_v21  ;;  %v2024_v25 = vpop.f32.mrf.mxu2 }
 0x479   :  { %2775 = vst [vmem:[#allocation17 + $0x78] sm:$0xff] %v2737_v42  ;;  %v4516_v22 = vadd.f32 %v4295_v6, %v2024_v25 }
 0x47a   :  { %v2434_v63 = vsub.f32 1.5, %v2433_v46  ;;  %v2242_v26 = vpop.f32.mrf.mxu3 }
 0x47b   :  { %v3378_v30 = vpop.eup %3377  ;;  %2077 = vst [vmem:[#allocation17 + $0x1c0] sm:$0xff] %v4516_v22  ;;  %v2322_v3 = vmax.f32 %v2242_v26, 1e-08  ;;  %v2115_v8 = vmul.f32 %v4516_v22, %v4516_v22 }
 0x47c   :  { %v2435_v10 = vmul.f32 %v3376_v24, %v2434_v63  ;;  %v2441_v32 = vmul.f32 %v3378_v30, %v2321_v61  ;;  %vm2447_vm11 = vweird.f32 %v3378_v30 }
 0x47d   :  { %3379 = vrsqrt.f32 %v2322_v3  ;;  %vm2448_vm13 = vmor %vm2446_vm12, %vm2447_vm11  ;;  %vm2456_vm15 = vweird.f32 %v2322_v3 }
 0x47e   :  { %v2439_v27 = vsel %vm2438_vm10, %v3376_v24, %v2435_v10  ;;  %v2442_v33 = vmul.f32 %v3378_v30, %v2441_v32 }
 0x47f   :  { %v2738_v43 = vmul.f32 %v2439_v27, %v4365_v60 }
 0x480   :  { %v2443_v17 = vmul.f32 0.5, %v2442_v33  ;;  %v2026_v0 = vpop.f32.mrf.mxu2 }
 0x481   :  { %2776 = vst [vmem:[#allocation17 + $0x88] sm:$0xff] %v2738_v43  ;;  %v4521_v13 = vadd.f32 %v4295_v6, %v2026_v0 }
 0x482   :  { %v2444_v4 = vsub.f32 1.5, %v2443_v17  ;;  %v2244_v51 = vpop.f32.mrf.mxu3 }
 0x483   :  { %v3380_v59 = vpop.eup %3379  ;;  %2078 = vst [vmem:[#allocation17 + $0x1d0] sm:$0xff] %v4521_v13  ;;  %v2116_v19 = vmul.f32 %v4521_v13, %v4521_v13  ;;  %v2323_v5 = vmax.f32 %v2244_v51, 1e-08 }
 0x484   :  { %v2445_v60 = vmul.f32 %v3378_v30, %v2444_v4  ;;  %v2451_v1 = vmul.f32 %v3380_v59, %v2322_v3  ;;  %vm2457_vm14 = vweird.f32 %v3380_v59 }
 0x485   :  { %3381 = vrsqrt.f32 %v2323_v5  ;;  %v2139_v35 = vpack.c.bf16 %v2116_v19, %v2115_v8  ;;  %vm2458_vm0 = vmor %vm2456_vm15, %vm2457_vm14  ;;  %vm2466_vm2 = vweird.f32 %v2323_v5 }
 0x486   :  { %v2449_v56 = vsel %vm2448_vm13, %v3378_v30, %v2445_v60  ;;  %v2452_v23 = vmul.f32 %v3380_v59, %v2451_v1 }
 0x487   :  { %v2739_v44 = vmul.f32 %v2449_v56, %v4372_v36  ;;  %2286 = vmatmul.bf16.gmra.mxu3 %v2139_v35 }
 0x488   :  { %v2453_v34 = vmul.f32 0.5, %v2452_v23  ;;  %v2029_v38 = vpop.f32.mrf.mxu2 }
 0x489   :  { %2777 = vst [vmem:[#allocation17 + $0x98] sm:$0xff] %v2739_v44  ;;  %v4530_v7 = vadd.f32 %v4295_v6, %v2029_v38 }
 0x48a   :  { %v2454_v16 = vsub.f32 1.5, %v2453_v34  ;;  %v2247_v15 = vpop.f32.mrf.mxu3 }
 0x48b   :  { %v3382_v48 = vpop.eup %3381  ;;  %2079 = vst [vmem:[#allocation17 + $0x1e0] sm:$0xff] %v4530_v7  ;;  %v2324_v29 = vmax.f32 %v2247_v15, 1e-08  ;;  %v2117_v46 = vmul.f32 %v4530_v7, %v4530_v7 }
 0x48c   :  { %v2455_v24 = vmul.f32 %v3380_v59, %v2454_v16  ;;  %v2461_v53 = vmul.f32 %v3382_v48, %v2323_v5  ;;  %vm2467_vm1 = vweird.f32 %v3382_v48 }
 0x48d   :  { %3383 = vrsqrt.f32 %v2324_v29  ;;  %vm2468_vm3 = vmor %vm2466_vm2, %vm2467_vm1  ;;  %vm2476_vm5 = vweird.f32 %v2324_v29 }
 0x48e   :  { %v2459_v36 = vsel %vm2458_vm0, %v3380_v59, %v2455_v24  ;;  %v2462_v54 = vmul.f32 %v3382_v48, %v2461_v53 }
 0x48f   :  { %v2740_v61 = vmul.f32 %v2459_v36, %v4381_v58 }
 0x490   :  { %v2463_v47 = vmul.f32 0.5, %v2462_v54  ;;  %v2031_v20 = vpop.f32.mrf.mxu2 }
 0x491   :  { %2778 = vst [vmem:[#allocation17 + $0xa8] sm:$0xff] %v2740_v61  ;;  %v4535_v9 = vadd.f32 %v4295_v6, %v2031_v20 }
 0x492   :  { %v2464_v39 = vsub.f32 1.5, %v2463_v47  ;;  %v2249_v21 = vpop.f32.mrf.mxu3 }
 0x493   :  { %v3384_v42 = vpop.eup %3383  ;;  %2080 = vst [vmem:[#allocation17 + $0x1f0] sm:$0xff] %v4535_v9  ;;  %v2118_v25 = vmul.f32 %v4535_v9, %v4535_v9  ;;  %v2325_v63 = vmax.f32 %v2249_v21, 1e-08 }
 0x494   :  { %v2465_v58 = vmul.f32 %v3382_v48, %v2464_v39  ;;  %v2471_v26 = vmul.f32 %v3384_v42, %v2324_v29  ;;  %vm2477_vm4 = vweird.f32 %v3384_v42 }
 0x495   :  { %3385 = vrsqrt.f32 %v2325_v63  ;;  %v2140_v30 = vpack.c.bf16 %v2118_v25, %v2117_v46  ;;  %vm2478_vm6 = vmor %vm2476_vm5, %vm2477_vm4  ;;  %vm2486_vm8 = vweird.f32 %v2325_v63 }
 0x496   :  { %v2469_v3 = vsel %vm2468_vm3, %v3382_v48, %v2465_v58  ;;  %v2472_v10 = vmul.f32 %v3384_v42, %v2471_v26 }
 0x497   :  { %v2741_v32 = vmul.f32 %v2469_v3, %v4388_v57  ;;  %2291 = vmatmul.bf16.gmra.mxu3 %v2140_v30 }
 0x498   :  { %v2473_v27 = vmul.f32 0.5, %v2472_v10  ;;  %v2034_v33 = vpop.f32.mrf.mxu2 }
 0x499   :  { %2779 = vst [vmem:[#allocation17 + $0xb8] sm:$0xff] %v2741_v32  ;;  %v4544_v43 = vadd.f32 %v4295_v6, %v2034_v33 }
 0x49a   :  { %v2474_v17 = vsub.f32 1.5, %v2473_v27  ;;  %v2252_v0 = vpop.f32.mrf.mxu3 }
 0x49b   :  { %v3386_v4 = vpop.eup %3385  ;;  %2081 = vst [vmem:[#allocation17 + $0x200] sm:$0xff] %v4544_v43  ;;  %v2326_v51 = vmax.f32 %v2252_v0, 1e-08  ;;  %v2119_v34 = vmul.f32 %v4544_v43, %v4544_v43 }
 0x49c   :  { %v2475_v59 = vmul.f32 %v3384_v42, %v2474_v17  ;;  %v2481_v8 = vmul.f32 %v3386_v4, %v2325_v63  ;;  %vm2487_vm7 = vweird.f32 %v3386_v4 }
 0x49d   :  { %3387 = vrsqrt.f32 %v2326_v51  ;;  %vm2488_vm9 = vmor %vm2486_vm8, %vm2487_vm7  ;;  %vm2496_vm11 = vweird.f32 %v2326_v51 }
 0x49e   :  { %v2479_v57 = vsel %vm2478_vm6, %v3384_v42, %v2475_v59  ;;  %v2482_v19 = vmul.f32 %v3386_v4, %v2481_v8 }
 0x49f   :  { %v2742_v5 = vmul.f32 %v2479_v57, %v4397_v11 }
 0x4a0   :  { %v2483_v60 = vmul.f32 0.5, %v2482_v19  ;;  %v2036_v1 = vpop.f32.mrf.mxu2 }
 0x4a1   :  { %2780 = vst [vmem:[#allocation17 + $0xc8] sm:$0xff] %v2742_v5  ;;  %v4549_v35 = vadd.f32 %v4295_v6, %v2036_v1 }
 0x4a2   :  { %v2484_v56 = vsub.f32 1.5, %v2483_v60  ;;  %v2254_v23 = vpop.f32.mrf.mxu3 }
 0x4a3   :  { %v3388_v44 = vpop.eup %3387  ;;  %2082 = vst [vmem:[#allocation17 + $0x210] sm:$0xff] %v4549_v35  ;;  %v2120_v38 = vmul.f32 %v4549_v35, %v4549_v35  ;;  %v2327_v16 = vmax.f32 %v2254_v23, 1e-08 }
 0x4a4   :  { %v2485_v11 = vmul.f32 %v3386_v4, %v2484_v56  ;;  %v2491_v15 = vmul.f32 %v3388_v44, %v2326_v51  ;;  %vm2497_vm10 = vweird.f32 %v3388_v44 }
 0x4a5   :  { %3389 = vrsqrt.f32 %v2327_v16  ;;  %v2141_v48 = vpack.c.bf16 %v2120_v38, %v2119_v34  ;;  %vm2498_vm12 = vmor %vm2496_vm11, %vm2497_vm10  ;;  %vm2506_vm14 = vweird.f32 %v2327_v16 }
 0x4a6   :  { %v2489_v29 = vsel %vm2488_vm9, %v3386_v4, %v2485_v11  ;;  %v2492_v24 = vmul.f32 %v3388_v44, %v2491_v15 }
 0x4a7   :  { %v2743_v53 = vmul.f32 %v2489_v29, %v4404_v52  ;;  %2296 = vmatmul.bf16.gmra.mxu3 %v2141_v48 }
 0x4a8   :  { %v2493_v36 = vmul.f32 0.5, %v2492_v24  ;;  %v2039_v54 = vpop.f32.mrf.mxu2 }
 0x4a9   :  { %2781 = vst [vmem:[#allocation17 + $0xd8] sm:$0xff] %v2743_v53  ;;  %v4558_v61 = vadd.f32 %v4295_v6, %v2039_v54  ;;  %v3435_v6 = vld [vmem:[%s4618_s10] ss:$0 sm:$0xff]  ;;  %s3699_s10 = smov [#allocation17]  }
 0x4aa   :  { %v2494_v47 = vsub.f32 1.5, %v2493_v36  ;;  %v2257_v20 = vpop.f32.mrf.mxu3  ;;  %s2810_s13 = sshll.u32 %s3699_s10, 4  ;;  %s2811_s13 = int_to_ptr.vmem [resolvable:$true] %s2810_s13 }
 0x4ab   :  { %v3390_v39 = vpop.eup %3389  ;;  %2083 = vst [vmem:[#allocation17 + $0x220] sm:$0xff] %v4558_v61  ;;  %v2328_v21 = vmax.f32 %v2257_v20, 1e-08  ;;  %v2121_v27 = vmul.f32 %v4558_v61, %v4558_v61 }
 0x4ac   :  { %v2495_v42 = vmul.f32 %v3388_v44, %v2494_v47  ;;  %v2501_v46 = vmul.f32 %v3390_v39, %v2327_v16  ;;  %vm2507_vm13 = vweird.f32 %v3390_v39 }
 0x4ad   :  { %3391 = vrsqrt.f32 %v2328_v21  ;;  %vm2508_vm15 = vmor %vm2506_vm14, %vm2507_vm13  ;;  %vm2516_vm1 = vweird.f32 %v2328_v21 }
 0x4ae   :  { %v2499_v52 = vsel %vm2498_vm12, %v3388_v44, %v2495_v42  ;;  %v2502_v25 = vmul.f32 %v3390_v39, %v2501_v46 }
 0x4af   :  { %v2744_v63 = vmul.f32 %v2499_v52, %v4413_v2 }
 0x4b0   :  { %v2503_v58 = vmul.f32 0.5, %v2502_v25  ;;  %v2041_v26 = vpop.f32.mrf.mxu2 }
 0x4b1   :  { %2782 = vst [vmem:[#allocation17 + $0xe8] sm:$0xff] %v2744_v63  ;;  %v4565_v30 = vadd.f32 %v3435_v6, %v2041_v26 }
 0x4b2   :  { %v2504_v3 = vsub.f32 1.5, %v2503_v58  ;;  %v2259_v10 = vpop.f32.mrf.mxu3 }
 0x4b3   :  { %v3392_v32 = vpop.eup %3391  ;;  %2084 = vst [vmem:[#allocation17 + $0x230] sm:$0xff] %v4565_v30  ;;  %v2122_v2 = vmul.f32 %v4565_v30, %v4565_v30  ;;  %v2329_v33 = vmax.f32 %v2259_v10, 1e-08 }
 0x4b4   :  { %v2505_v17 = vmul.f32 %v3390_v39, %v2504_v3  ;;  %v2511_v0 = vmul.f32 %v3392_v32, %v2328_v21  ;;  %vm2517_vm0 = vweird.f32 %v3392_v32 }
 0x4b5   :  { %3393 = vrsqrt.f32 %v2329_v33  ;;  %v2142_v4 = vpack.c.bf16 %v2122_v2, %v2121_v27  ;;  %vm2518_vm2 = vmor %vm2516_vm1, %vm2517_vm0  ;;  %vm2526_vm4 = vweird.f32 %v2329_v33 }
 0x4b6   :  { %v2509_v51 = vsel %vm2508_vm15, %v3390_v39, %v2505_v17  ;;  %v2512_v59 = vmul.f32 %v3392_v32, %v2511_v0 }
 0x4b7   :  { %v2745_v8 = vmul.f32 %v2509_v51, %v4420_v45  ;;  %2301 = vmatmul.bf16.gmra.mxu3 %v2142_v4 }
 0x4b8   :  { %v2513_v57 = vmul.f32 0.5, %v2512_v59  ;;  %v2044_v19 = vpop.f32.mrf.mxu2 }
 0x4b9   :  { %2783 = vst [vmem:[#allocation17 + $0xf8] sm:$0xff] %v2745_v8  ;;  %v4573_v5 = vadd.f32 %v3435_v6, %v2044_v19 }
 0x4ba   :  { %v2514_v60 = vsub.f32 1.5, %v2513_v57  ;;  %v2262_v1 = vpop.f32.mrf.mxu3 }
 0x4bb   :  { %v3394_v56 = vpop.eup %3393  ;;  %2085 = vst [vmem:[#allocation17 + $0x240] sm:$0xff] %v4573_v5  ;;  %v2330_v23 = vmax.f32 %v2262_v1, 1e-08  ;;  %v2123_v36 = vmul.f32 %v4573_v5, %v4573_v5 }
 0x4bc   :  { %v2515_v44 = vmul.f32 %v3392_v32, %v2514_v60  ;;  %v2521_v34 = vmul.f32 %v3394_v56, %v2329_v33  ;;  %vm2527_vm3 = vweird.f32 %v3394_v56 }
 0x4bd   :  { %3395 = vrsqrt.f32 %v2330_v23  ;;  %vm2528_vm5 = vmor %vm2526_vm4, %vm2527_vm3  ;;  %vm2536_vm7 = vweird.f32 %v2330_v23 }
 0x4be   :  { %v2519_v38 = vsel %vm2518_vm2, %v3392_v32, %v2515_v44  ;;  %v2522_v45 = vmul.f32 %v3394_v56, %v2521_v34 }
 0x4bf   :  { %v2746_v16 = vmul.f32 %v2519_v38, %v4429_v40 }
 0x4c0   :  { %v2523_v11 = vmul.f32 0.5, %v2522_v45  ;;  %v2046_v15 = vpop.f32.mrf.mxu2 }
 0x4c1   :  { %2784 = vst [vmem:[#allocation17 + $0x108] sm:$0xff] %v2746_v16  ;;  %v4577_v48 = vadd.f32 %v3435_v6, %v2046_v15 }
 0x4c2   :  { %v2524_v29 = vsub.f32 1.5, %v2523_v11  ;;  %v2264_v24 = vpop.f32.mrf.mxu3 }
 0x4c3   :  { %v3396_v53 = vpop.eup %3395  ;;  %2086 = vst [vmem:[#allocation17 + $0x250] sm:$0xff] %v4577_v48  ;;  %v2124_v54 = vmul.f32 %v4577_v48, %v4577_v48  ;;  %v2331_v47 = vmax.f32 %v2264_v24, 1e-08 }
 0x4c4   :  { %v2525_v20 = vmul.f32 %v3394_v56, %v2524_v29  ;;  %v2531_v40 = vmul.f32 %v3396_v53, %v2330_v23  ;;  %vm2537_vm6 = vweird.f32 %v3396_v53 }
 0x4c5   :  { %3397 = vrsqrt.f32 %v2331_v47  ;;  %v2143_v39 = vpack.c.bf16 %v2124_v54, %v2123_v36  ;;  %vm2538_vm8 = vmor %vm2536_vm7, %vm2537_vm6  ;;  %vm2546_vm10 = vweird.f32 %v2331_v47 }
 0x4c6   :  { %v2529_v21 = vsel %vm2528_vm5, %v3394_v56, %v2525_v20  ;;  %v2532_v42 = vmul.f32 %v3396_v53, %v2531_v40 }
 0x4c7   :  { %v2747_v46 = vmul.f32 %v2529_v21, %v4436_v50  ;;  %2306 = vmatmul.bf16.gmra.mxu3 %v2143_v39 }
 0x4c8   :  { %v2533_v52 = vmul.f32 0.5, %v2532_v42 }
 0x4c9   :  { %2785 = vst [vmem:[#allocation17 + $0x118] sm:$0xff] %v2747_v46 }
 0x4ca   :  { %v2534_v25 = vsub.f32 1.5, %v2533_v52  ;;  %v2267_v63 = vpop.f32.mrf.mxu3 }
 0x4cb   :  { %v3398_v58 = vpop.eup %3397  ;;  %v2332_v26 = vmax.f32 %v2267_v63, 1e-08 }
 0x4cc   :  { %v2535_v6 = vmul.f32 %v3396_v53, %v2534_v25  ;;  %v2541_v3 = vmul.f32 %v3398_v58, %v2331_v47  ;;  %vm2547_vm9 = vweird.f32 %v3398_v58 }
 0x4cd   :  { %3399 = vrsqrt.f32 %v2332_v26  ;;  %vm2548_vm11 = vmor %vm2546_vm10, %vm2547_vm9  ;;  %vm2556_vm13 = vweird.f32 %v2332_v26 }
 0x4ce   :  { %v2539_v10 = vsel %vm2538_vm8, %v3396_v53, %v2535_v6  ;;  %v2542_v32 = vmul.f32 %v3398_v58, %v2541_v3 }
 0x4cf   :  { %v2748_v27 = vmul.f32 %v2539_v10, %v4445_v18 }
 0x4d0   :  { %v2543_v2 = vmul.f32 0.5, %v2542_v32 }
 0x4d1   :  { %2786 = vst [vmem:[#allocation17 + $0x128] sm:$0xff] %v2748_v27 }
 0x4d2   :  { %v2544_v50 = vsub.f32 1.5, %v2543_v2  ;;  %v2269_v33 = vpop.f32.mrf.mxu3 }
 0x4d3   :  { %v3400_v17 = vpop.eup %3399  ;;  %v2333_v0 = vmax.f32 %v2269_v33, 1e-08 }
 0x4d4   :  { %v2545_v4 = vmul.f32 %v3398_v58, %v2544_v50  ;;  %v2551_v51 = vmul.f32 %v3400_v17, %v2332_v26  ;;  %vm2557_vm12 = vweird.f32 %v3400_v17 }
 0x4d5   :  { %3401 = vrsqrt.f32 %v2333_v0  ;;  %vm2558_vm14 = vmor %vm2556_vm13, %vm2557_vm12  ;;  %vm2566_vm0 = vweird.f32 %v2333_v0 }
 0x4d6   :  { %v2549_v59 = vsel %vm2548_vm11, %v3398_v58, %v2545_v4  ;;  %v2552_v8 = vmul.f32 %v3400_v17, %v2551_v51 }
 0x4d7   :  { %v2749_v57 = vmul.f32 %v2549_v59, %v4452_v41 }
 0x4d8   :  { %v2553_v19 = vmul.f32 0.5, %v2552_v8 }
 0x4d9   :  { %2787 = vst [vmem:[#allocation17 + $0x138] sm:$0xff] %v2749_v57 }
 0x4da   :  { %v2554_v60 = vsub.f32 1.5, %v2553_v19  ;;  %v2272_v18 = vpop.f32.mrf.mxu3 }
 0x4db   :  { %v3402_v1 = vpop.eup %3401  ;;  %v2334_v56 = vmax.f32 %v2272_v18, 1e-08 }
 0x4dc   :  { %v2555_v23 = vmul.f32 %v3400_v17, %v2554_v60  ;;  %v2561_v44 = vmul.f32 %v3402_v1, %v2333_v0  ;;  %vm2567_vm15 = vweird.f32 %v3402_v1 }
 0x4dd   :  { %3403 = vrsqrt.f32 %v2334_v56  ;;  %vm2568_vm1 = vmor %vm2566_vm0, %vm2567_vm15  ;;  %vm2576_vm3 = vweird.f32 %v2334_v56 }
 0x4de   :  { %v2559_v34 = vsel %vm2558_vm14, %v3400_v17, %v2555_v23  ;;  %v2562_v38 = vmul.f32 %v3402_v1, %v2561_v44 }
 0x4df   :  { %v2750_v45 = vmul.f32 %v2559_v34, %v4460_v12 }
 0x4e0   :  { %v2563_v16 = vmul.f32 0.5, %v2562_v38 }
 0x4e1   :  { %2788 = vst [vmem:[#allocation17 + $0x148] sm:$0xff] %v2750_v45 }
 0x4e2   :  { %v2564_v11 = vsub.f32 1.5, %v2563_v16  ;;  %v2274_v41 = vpop.f32.mrf.mxu3 }
 0x4e3   :  { %v3404_v15 = vpop.eup %3403  ;;  %v2335_v29 = vmax.f32 %v2274_v41, 1e-08 }
 0x4e4   :  { %v2565_v24 = vmul.f32 %v3402_v1, %v2564_v11  ;;  %v2571_v53 = vmul.f32 %v3404_v15, %v2334_v56  ;;  %vm2577_vm2 = vweird.f32 %v3404_v15 }
 0x4e5   :  { %3405 = vrsqrt.f32 %v2335_v29  ;;  %vm2578_vm4 = vmor %vm2576_vm3, %vm2577_vm2  ;;  %vm2586_vm6 = vweird.f32 %v2335_v29 }
 0x4e6   :  { %v2569_v36 = vsel %vm2568_vm1, %v3402_v1, %v2565_v24  ;;  %v2572_v54 = vmul.f32 %v3404_v15, %v2571_v53 }
 0x4e7   :  { %v2751_v47 = vmul.f32 %v2569_v36, %v4465_v31 }
 0x4e8   :  { %v2573_v20 = vmul.f32 0.5, %v2572_v54 }
 0x4e9   :  { %2789 = vst [vmem:[#allocation17 + $0x158] sm:$0xff] %v2751_v47 }
 0x4ea   :  { %v2574_v40 = vsub.f32 1.5, %v2573_v20  ;;  %v2277_v12 = vpop.f32.mrf.mxu3 }
 0x4eb   :  { %v3406_v39 = vpop.eup %3405  ;;  %v2336_v21 = vmax.f32 %v2277_v12, 1e-08 }
 0x4ec   :  { %v2575_v42 = vmul.f32 %v3404_v15, %v2574_v40  ;;  %v2581_v46 = vmul.f32 %v3406_v39, %v2335_v29  ;;  %vm2587_vm5 = vweird.f32 %v3406_v39 }
 0x4ed   :  { %3407 = vrsqrt.f32 %v2336_v21  ;;  %vm2588_vm7 = vmor %vm2586_vm6, %vm2587_vm5  ;;  %vm2596_vm9 = vweird.f32 %v2336_v21 }
 0x4ee   :  { %v2579_v52 = vsel %vm2578_vm4, %v3404_v15, %v2575_v42  ;;  %v2582_v25 = vmul.f32 %v3406_v39, %v2581_v46 }
 0x4ef   :  { %v2752_v63 = vmul.f32 %v2579_v52, %v4474_v55 }
 0x4f0   :  { %v2583_v58 = vmul.f32 0.5, %v2582_v25 }
 0x4f1   :  { %2790 = vst [vmem:[#allocation17 + $0x168] sm:$0xff] %v2752_v63 }
 0x4f2   :  { %v2584_v26 = vsub.f32 1.5, %v2583_v58  ;;  %v2279_v31 = vpop.f32.mrf.mxu3 }
 0x4f3   :  { %v3408_v6 = vpop.eup %3407  ;;  %v2337_v3 = vmax.f32 %v2279_v31, 1e-08 }
 0x4f4   :  { %v2585_v10 = vmul.f32 %v3406_v39, %v2584_v26  ;;  %v2591_v32 = vmul.f32 %v3408_v6, %v2336_v21  ;;  %vm2597_vm8 = vweird.f32 %v3408_v6 }
 0x4f5   :  { %3409 = vrsqrt.f32 %v2337_v3  ;;  %vm2598_vm10 = vmor %vm2596_vm9, %vm2597_vm8  ;;  %vm2606_vm12 = vweird.f32 %v2337_v3 }
 0x4f6   :  { %v2589_v27 = vsel %vm2588_vm7, %v3406_v39, %v2585_v10  ;;  %v2592_v2 = vmul.f32 %v3408_v6, %v2591_v32 }
 0x4f7   :  { %v2753_v50 = vmul.f32 %v2589_v27, %v4479_v37 }
 0x4f8   :  { %v2593_v33 = vmul.f32 0.5, %v2592_v2 }
 0x4f9   :  { %2791 = vst [vmem:[#allocation17 + $0x178] sm:$0xff] %v2753_v50 }
 0x4fa   :  { %v2594_v17 = vsub.f32 1.5, %v2593_v33  ;;  %v2282_v55 = vpop.f32.mrf.mxu3 }
 0x4fb   :  { %v3410_v0 = vpop.eup %3409  ;;  %v2338_v4 = vmax.f32 %v2282_v55, 1e-08 }
 0x4fc   :  { %v2595_v51 = vmul.f32 %v3408_v6, %v2594_v17  ;;  %v2601_v59 = vmul.f32 %v3410_v0, %v2337_v3  ;;  %vm2607_vm11 = vweird.f32 %v3410_v0 }
 0x4fd   :  { %3411 = vrsqrt.f32 %v2338_v4  ;;  %vm2608_vm13 = vmor %vm2606_vm12, %vm2607_vm11  ;;  %vm2616_vm15 = vweird.f32 %v2338_v4 }
 0x4fe   :  { %v2599_v8 = vsel %vm2598_vm10, %v3408_v6, %v2595_v51  ;;  %v2602_v57 = vmul.f32 %v3410_v0, %v2601_v59 }
 0x4ff   :  { %v2754_v19 = vmul.f32 %v2599_v8, %v4488_v62 }
 0x500   :  { %v2603_v60 = vmul.f32 0.5, %v2602_v57 }
 0x501   :  { %2792 = vst [vmem:[#allocation17 + $0x188] sm:$0xff] %v2754_v19 }
 0x502   :  { %v2604_v18 = vsub.f32 1.5, %v2603_v60  ;;  %v2284_v37 = vpop.f32.mrf.mxu3 }
 0x503   :  { %v3412_v1 = vpop.eup %3411  ;;  %v2339_v56 = vmax.f32 %v2284_v37, 1e-08 }
 0x504   :  { %v2605_v23 = vmul.f32 %v3410_v0, %v2604_v18  ;;  %v2611_v44 = vmul.f32 %v3412_v1, %v2338_v4  ;;  %vm2617_vm14 = vweird.f32 %v3412_v1 }
 0x505   :  { %3413 = vrsqrt.f32 %v2339_v56  ;;  %vm2618_vm0 = vmor %vm2616_vm15, %vm2617_vm14  ;;  %vm2626_vm2 = vweird.f32 %v2339_v56 }
 0x506   :  { %v2609_v34 = vsel %vm2608_vm13, %v3410_v0, %v2605_v23  ;;  %v2612_v38 = vmul.f32 %v3412_v1, %v2611_v44 }
 0x507   :  { %v2755_v45 = vmul.f32 %v2609_v34, %v4493_v49 }
 0x508   :  { %v2613_v16 = vmul.f32 0.5, %v2612_v38 }
 0x509   :  { %2793 = vst [vmem:[#allocation17 + $0x198] sm:$0xff] %v2755_v45 }
 0x50a   :  { %v2614_v11 = vsub.f32 1.5, %v2613_v16  ;;  %v2287_v62 = vpop.f32.mrf.mxu3 }
 0x50b   :  { %v3414_v41 = vpop.eup %3413  ;;  %v2340_v15 = vmax.f32 %v2287_v62, 1e-08 }
 0x50c   :  { %v2615_v29 = vmul.f32 %v3412_v1, %v2614_v11  ;;  %v2621_v24 = vmul.f32 %v3414_v41, %v2339_v56  ;;  %vm2627_vm1 = vweird.f32 %v3414_v41 }
 0x50d   :  { %3415 = vrsqrt.f32 %v2340_v15  ;;  %vm2628_vm3 = vmor %vm2626_vm2, %vm2627_vm1  ;;  %vm2636_vm5 = vweird.f32 %v2340_v15 }
 0x50e   :  { %v2619_v53 = vsel %vm2618_vm0, %v3412_v1, %v2615_v29  ;;  %v2622_v36 = vmul.f32 %v3414_v41, %v2621_v24 }
 0x50f   :  { %v2756_v54 = vmul.f32 %v2619_v53, %v4502_v28 }
 0x510   :  { %v2623_v47 = vmul.f32 0.5, %v2622_v36 }
 0x511   :  { %2794 = vst [vmem:[#allocation17 + $0x1a8] sm:$0xff] %v2756_v54 }
 0x512   :  { %v2624_v20 = vsub.f32 1.5, %v2623_v47  ;;  %v2289_v49 = vpop.f32.mrf.mxu3 }
 0x513   :  { %v3416_v40 = vpop.eup %3415  ;;  %v2341_v12 = vmax.f32 %v2289_v49, 1e-08 }
 0x514   :  { %v2625_v39 = vmul.f32 %v3414_v41, %v2624_v20  ;;  %v2631_v21 = vmul.f32 %v3416_v40, %v2340_v15  ;;  %vm2637_vm4 = vweird.f32 %v3416_v40 }
 0x515   :  { %3417 = vrsqrt.f32 %v2341_v12  ;;  %vm2638_vm6 = vmor %vm2636_vm5, %vm2637_vm4  ;;  %vm2646_vm8 = vweird.f32 %v2341_v12 }
 0x516   :  { %v2629_v42 = vsel %vm2628_vm3, %v3414_v41, %v2625_v39  ;;  %v2632_v46 = vmul.f32 %v3416_v40, %v2631_v21 }
 0x517   :  { %v2757_v52 = vmul.f32 %v2629_v42, %v4507_v14 }
 0x518   :  { %v2633_v25 = vmul.f32 0.5, %v2632_v46 }
 0x519   :  { %2795 = vst [vmem:[#allocation17 + $0x1b8] sm:$0xff] %v2757_v52 }
 0x51a   :  { %v2634_v63 = vsub.f32 1.5, %v2633_v25  ;;  %v2292_v28 = vpop.f32.mrf.mxu3 }
 0x51b   :  { %v3418_v58 = vpop.eup %3417  ;;  %v2342_v26 = vmax.f32 %v2292_v28, 1e-08 }
 0x51c   :  { %v2635_v31 = vmul.f32 %v3416_v40, %v2634_v63  ;;  %v2641_v6 = vmul.f32 %v3418_v58, %v2341_v12  ;;  %vm2647_vm7 = vweird.f32 %v3418_v58 }
 0x51d   :  { %3419 = vrsqrt.f32 %v2342_v26  ;;  %vm2648_vm9 = vmor %vm2646_vm8, %vm2647_vm7  ;;  %vm2656_vm11 = vweird.f32 %v2342_v26 }
 0x51e   :  { %v2639_v3 = vsel %vm2638_vm6, %v3416_v40, %v2635_v31  ;;  %v2642_v10 = vmul.f32 %v3418_v58, %v2641_v6 }
 0x51f   :  { %v2758_v32 = vmul.f32 %v2639_v3, %v4516_v22 }
 0x520   :  { %v2643_v27 = vmul.f32 0.5, %v2642_v10 }
 0x521   :  { %2796 = vst [vmem:[#allocation17 + $0x1c8] sm:$0xff] %v2758_v32 }
 0x522   :  { %v2644_v2 = vsub.f32 1.5, %v2643_v27  ;;  %v2294_v14 = vpop.f32.mrf.mxu3 }
 0x523   :  { %v3420_v50 = vpop.eup %3419  ;;  %v2343_v33 = vmax.f32 %v2294_v14, 1e-08 }
 0x524   :  { %v2645_v17 = vmul.f32 %v3418_v58, %v2644_v2  ;;  %v2651_v55 = vmul.f32 %v3420_v50, %v2342_v26  ;;  %vm2657_vm10 = vweird.f32 %v3420_v50 }
 0x525   :  { %3421 = vrsqrt.f32 %v2343_v33  ;;  %vm2658_vm12 = vmor %vm2656_vm11, %vm2657_vm10  ;;  %vm2666_vm14 = vweird.f32 %v2343_v33 }
 0x526   :  { %v2649_v0 = vsel %vm2648_vm9, %v3418_v58, %v2645_v17  ;;  %v2652_v4 = vmul.f32 %v3420_v50, %v2651_v55 }
 0x527   :  { %v2759_v51 = vmul.f32 %v2649_v0, %v4521_v13 }
 0x528   :  { %v2653_v59 = vmul.f32 0.5, %v2652_v4 }
 0x529   :  { %2797 = vst [vmem:[#allocation17 + $0x1d8] sm:$0xff] %v2759_v51 }
 0x52a   :  { %v2654_v8 = vsub.f32 1.5, %v2653_v59  ;;  %v2297_v22 = vpop.f32.mrf.mxu3 }
 0x52b   :  { %v3422_v57 = vpop.eup %3421  ;;  %v2344_v19 = vmax.f32 %v2297_v22, 1e-08 }
 0x52c   :  { %v2655_v60 = vmul.f32 %v3420_v50, %v2654_v8  ;;  %v2661_v18 = vmul.f32 %v3422_v57, %v2343_v33  ;;  %vm2667_vm13 = vweird.f32 %v3422_v57 }
 0x52d   :  { %3423 = vrsqrt.f32 %v2344_v19  ;;  %vm2668_vm15 = vmor %vm2666_vm14, %vm2667_vm13  ;;  %vm2676_vm1 = vweird.f32 %v2344_v19 }
 0x52e   :  { %v2659_v37 = vsel %vm2658_vm12, %v3420_v50, %v2655_v60  ;;  %v2662_v1 = vmul.f32 %v3422_v57, %v2661_v18 }
 0x52f   :  { %v2760_v56 = vmul.f32 %v2659_v37, %v4530_v7 }
 0x530   :  { %v2663_v23 = vmul.f32 0.5, %v2662_v1 }
 0x531   :  { %2798 = vst [vmem:[#allocation17 + $0x1e8] sm:$0xff] %v2760_v56 }
 0x532   :  { %v2664_v44 = vsub.f32 1.5, %v2663_v23  ;;  %v2299_v13 = vpop.f32.mrf.mxu3 }
 0x533   :  { %v3424_v34 = vpop.eup %3423  ;;  %v2345_v38 = vmax.f32 %v2299_v13, 1e-08 }
 0x534   :  { %v2665_v45 = vmul.f32 %v3422_v57, %v2664_v44  ;;  %v2671_v16 = vmul.f32 %v3424_v34, %v2344_v19  ;;  %vm2677_vm0 = vweird.f32 %v3424_v34 }
 0x535   :  { %3425 = vrsqrt.f32 %v2345_v38  ;;  %vm2678_vm2 = vmor %vm2676_vm1, %vm2677_vm0  ;;  %vm2686_vm4 = vweird.f32 %v2345_v38 }
 0x536   :  { %v2669_v11 = vsel %vm2668_vm15, %v3422_v57, %v2665_v45  ;;  %v2672_v62 = vmul.f32 %v3424_v34, %v2671_v16 }
 0x537   :  { %v2761_v41 = vmul.f32 %v2669_v11, %v4535_v9 }
 0x538   :  { %v2673_v15 = vmul.f32 0.5, %v2672_v62 }
 0x539   :  { %2799 = vst [vmem:[#allocation17 + $0x1f8] sm:$0xff] %v2761_v41 }
 0x53a   :  { %v2674_v29 = vsub.f32 1.5, %v2673_v15  ;;  %v2302_v7 = vpop.f32.mrf.mxu3 }
 0x53b   :  { %v3426_v24 = vpop.eup %3425  ;;  %v2346_v53 = vmax.f32 %v2302_v7, 1e-08 }
 0x53c   :  { %v2675_v36 = vmul.f32 %v3424_v34, %v2674_v29  ;;  %v2681_v54 = vmul.f32 %v3426_v24, %v2345_v38  ;;  %vm2687_vm3 = vweird.f32 %v3426_v24 }
 0x53d   :  { %3427 = vrsqrt.f32 %v2346_v53  ;;  %vm2688_vm5 = vmor %vm2686_vm4, %vm2687_vm3  ;;  %vm2696_vm7 = vweird.f32 %v2346_v53 }
 0x53e   :  { %v2679_v47 = vsel %vm2678_vm2, %v3424_v34, %v2675_v36  ;;  %v2682_v20 = vmul.f32 %v3426_v24, %v2681_v54 }
 0x53f   :  { %v2762_v49 = vmul.f32 %v2679_v47, %v4544_v43 }
 0x540   :  { %v2683_v40 = vmul.f32 0.5, %v2682_v20 }
 0x541   :  { %2800 = vst [vmem:[#allocation17 + $0x208] sm:$0xff] %v2762_v49 }
 0x542   :  { %v2684_v12 = vsub.f32 1.5, %v2683_v40  ;;  %v2304_v9 = vpop.f32.mrf.mxu3 }
 0x543   :  { %v3428_v39 = vpop.eup %3427  ;;  %v2347_v21 = vmax.f32 %v2304_v9, 1e-08 }
 0x544   :  { %v2685_v42 = vmul.f32 %v3426_v24, %v2684_v12  ;;  %v2691_v46 = vmul.f32 %v3428_v39, %v2346_v53  ;;  %vm2697_vm6 = vweird.f32 %v3428_v39 }
 0x545   :  { %3429 = vrsqrt.f32 %v2347_v21  ;;  %vm2698_vm8 = vmor %vm2696_vm7, %vm2697_vm6  ;;  %vm2706_vm10 = vweird.f32 %v2347_v21 }
 0x546   :  { %v2689_v52 = vsel %vm2688_vm5, %v3426_v24, %v2685_v42  ;;  %v2692_v25 = vmul.f32 %v3428_v39, %v2691_v46 }
 0x547   :  { %v2763_v63 = vmul.f32 %v2689_v52, %v4549_v35 }
 0x548   :  { %v2693_v28 = vmul.f32 0.5, %v2692_v25 }
 0x549   :  { %2801 = vst [vmem:[#allocation17 + $0x218] sm:$0xff] %v2763_v63 }
 0x54a   :  { %v2694_v58 = vsub.f32 1.5, %v2693_v28  ;;  %v2307_v43 = vpop.f32.mrf.mxu3 }
 0x54b   :  { %v3430_v26 = vpop.eup %3429  ;;  %v2348_v31 = vmax.f32 %v2307_v43, 1e-08 }
 0x54c   :  { %v2695_v6 = vmul.f32 %v3428_v39, %v2694_v58  ;;  %v2701_v3 = vmul.f32 %v3430_v26, %v2347_v21  ;;  %vm2707_vm9 = vweird.f32 %v3430_v26 }
 0x54d   :  { %3431 = vrsqrt.f32 %v2348_v31  ;;  %vm2708_vm11 = vmor %vm2706_vm10, %vm2707_vm9  ;;  %vm2716_vm13 = vweird.f32 %v2348_v31 }
 0x54e   :  { %v2699_v10 = vsel %vm2698_vm8, %v3428_v39, %v2695_v6  ;;  %v2702_v32 = vmul.f32 %v3430_v26, %v2701_v3 }
 0x54f   :  { %v2764_v27 = vmul.f32 %v2699_v10, %v4558_v61 }
 0x550   :  { %v2703_v2 = vmul.f32 0.5, %v2702_v32 }
 0x551   :  { %2802 = vst [vmem:[#allocation17 + $0x228] sm:$0xff] %v2764_v27 }
 0x552   :  { %v2704_v14 = vsub.f32 1.5, %v2703_v2  ;;  %v2309_v35 = vpop.f32.mrf.mxu3 }
 0x553   :  { %v3432_v50 = vpop.eup %3431  ;;  %v2349_v33 = vmax.f32 %v2309_v35, 1e-08 }
 0x554   :  { %v2705_v17 = vmul.f32 %v3430_v26, %v2704_v14  ;;  %v2711_v55 = vmul.f32 %v3432_v50, %v2348_v31  ;;  %vm2717_vm12 = vweird.f32 %v3432_v50 }
 0x555   :  { %3433 = vrsqrt.f32 %v2349_v33  ;;  %vm2718_vm14 = vmor %vm2716_vm13, %vm2717_vm12  ;;  %vm2726_vm0 = vweird.f32 %v2349_v33 }
 0x556   :  { %v2709_v0 = vsel %vm2708_vm11, %v3430_v26, %v2705_v17  ;;  %v2712_v4 = vmul.f32 %v3432_v50, %v2711_v55 }
 0x557   :  { %v2765_v51 = vmul.f32 %v2709_v0, %v4565_v30 }
 0x558   :  { %v2713_v59 = vmul.f32 0.5, %v2712_v4 }
 0x559   :  { %2803 = vst [vmem:[#allocation17 + $0x238] sm:$0xff] %v2765_v51 }
 0x55a   :  { %v2714_v8 = vsub.f32 1.5, %v2713_v59 }
 0x55b   :  { %v3434_v61 = vpop.eup %3433 }
 0x55c   :  { %v2715_v22 = vmul.f32 %v3432_v50, %v2714_v8  ;;  %v2721_v57 = vmul.f32 %v3434_v61, %v2349_v33  ;;  %vm2727_vm15 = vweird.f32 %v3434_v61 }
 0x55d   :  { %vm2728_vm1 = vmor %vm2726_vm0, %vm2727_vm15 }
 0x55e   :  { %v2719_v19 = vsel %vm2718_vm14, %v3432_v50, %v2715_v22  ;;  %v2722_v60 = vmul.f32 %v3434_v61, %v2721_v57 }
 0x55f   :  { %v2766_v18 = vmul.f32 %v2719_v19, %v4573_v5 }
 0x560   :  { %v2723_v37 = vmul.f32 0.5, %v2722_v60 }
 0x561   :  { %2804 = vst [vmem:[#allocation17 + $0x248] sm:$0xff] %v2766_v18 }
 0x562   :  { %v2724_v1 = vsub.f32 1.5, %v2723_v37 }
 0x564   :  { %v2725_v30 = vmul.f32 %v3434_v61, %v2724_v1 }
 0x566   :  { %v2729_v56 = vsel %vm2728_vm1, %v3434_v61, %v2725_v30 }
 0x567   :  { %v2767_v23 = vmul.f32 %v2729_v56, %v4577_v48 }
 0x569   :  { %2805 = vst [vmem:[#allocation17 + $0x258] sm:$0xff] %v2767_v23 }
 0x56a   :  { %2818 = dma.vmem_to_hbm [thread:$0]  %s2811_s13, 9728, %s2813_s15, [#allocation4], %s3700_s16, %s3700_s16, %s3701_s2  }
 0x56b   :  { %3686 = dma.done.wait [#allocation4], 9728  }
 0x56c   :  { %3687 = vsyncadd [#allocation4], 4294957568 }
 0x56d   :  { %2823 = vsyncpa [#allocation3], 1 }
 0x56e   :  { %2824 = vsyncpa [#allocation6], 1 }
 0x56f   :  { %2825 = vsyncpa [#allocation9], 1 }
 0x570   :  { %2826 = vsyncpa [#allocation12], 1 }
 0x571   :  { %2827 = vsyncpa [#allocation15], 1 }
 0x572   :  { %2828 = vsyncpa [#allocation4], 1 }

</bundles_post_ra>
